<compile_context>
chip_gen: v7x
topology: tpu7x:2x2x1
jax: 0.10.0
libtpu: 0.0.40
codegen_flags: <defaults>
</compile_context>

<pallas_src>
import jax
import jax.numpy as jnp
from jax.experimental import pallas as pl
from jax.experimental.pallas import tpu as pltpu

# Logical layer sizes of the MLP (matching MNIST_Net.__init__) and padded sizes
# actually used by the kernel (lane-aligned to 128 where it matters).
DIMS = [784, 512, 256, 256, 128, 64, 10]
PDIMS = [896, 512, 256, 256, 128, 128, 128]
NUM_CLASSES = DIMS[-1]        # 10 real classes
PADDED_CLASSES = PDIMS[-1]    # 128-wide lane-dense output slab
NEG_INF = -1e30               # bias value for padded class columns


def mnist_mlp_kernel(x_ref,
                     w1_ref, b1_ref,
                     w2_ref, b2_ref,
                     w3_ref, b3_ref,
                     w4_ref, b4_ref,
                     w5_ref, b5_ref,
                     w6_ref, b6_ref,
                     out_ref):
    """Fused forward for one (TB, 896) bf16 batch tile:
    5x (bf16 Linear -> f32 bias+ReLU), final Linear (padded classes pre-masked via
    -1e30 bias), f32 softmax over the class axis."""

    def linear_relu(h_bf16, w_ref, b_ref):
        # bf16 x bf16 matmul, f32 accumulate; bias add + ReLU in f32, then back to bf16.
        y = jnp.dot(h_bf16, w_ref[...], preferred_element_type=jnp.float32) + b_ref[...]
        return jnp.maximum(y, 0.0).astype(jnp.bfloat16)

    h = x_ref[...]                      # (TB, 896) bf16
    h = linear_relu(h, w1_ref, b1_ref)  # (TB, 512)
    h = linear_relu(h, w2_ref, b2_ref)  # (TB, 256)
    h = linear_relu(h, w3_ref, b3_ref)  # (TB, 256)
    h = linear_relu(h, w4_ref, b4_ref)  # (TB, 128)
    h = linear_relu(h, w5_ref, b5_ref)  # (TB, 128)  (cols 64..127 are exact zeros)

    # Final linear; padded class columns get logit ~ -1e30 directly from b6.
    logits = jnp.dot(h, w6_ref[...], preferred_element_type=jnp.float32) + b6_ref[...]

    # Numerically stable softmax over dim=1; exp(-1e30 - m) underflows to 0 for pads.
    m = jnp.max(logits, axis=-1, keepdims=True)
    e = jnp.exp(logits - m)
    denom = jnp.sum(e, axis=-1, keepdims=True)
    out_ref[...] = e * pl.reciprocal(denom, approx=True)


def mnist_net_forward(x, params, *, batch_tile=256):
    """x: (B, 784) float32.  params: list of (W, b), W (in, out) f32, b (1, out) f32.

    Returns (B, 10) float32 softmax probabilities.
    batch_tile: 256 fills the 256-wide MXU on v6e/v7x; on v7x pick it so that
    ceil(B / batch_tile) >= 2 to engage both TensorCores on large batches.
    """
    B = x.shape[0]
    n_layers = len(DIMS) - 1

    # --- pad batch to a tile multiple, pad features 784 -> 896, cast to bf16 ---
    b_pad = pl.cdiv(B, batch_tile) * batch_tile
    x = jnp.pad(x.astype(jnp.float32),
                ((0, b_pad - B), (0, PDIMS[0] - DIMS[0])))
    x = x.astype(jnp.bfloat16)

    # --- pad + cast parameters (weights -> bf16, biases stay f32) ---
    flat_params = []
    for li, (w, b) in enumerate(params):
        w = w.astype(jnp.float32)
        b = b.astype(jnp.float32)
        if li == 0:
            # extra input features are zero in x, so zero W1 rows are exact
            w = jnp.pad(w, ((0, PDIMS[0] - DIMS[0]), (0, 0)))
        if li == 4:
            # 128 -> 64 layer: pad output to 128 (zero cols / zero bias, ReLU(0)=0)
            w = jnp.pad(w, ((0, 0), (0, PDIMS[5] - DIMS[5])))
            b = jnp.pad(b, ((0, 0), (0, PDIMS[5] - DIMS[5])))
        if li == 5:
            # 64 -> 10 layer: pad input rows (zero activations there) and output cols;
            # padded bias entries are -1e30 so padded logits are pre-masked.
            w = jnp.pad(w, ((0, PDIMS[5] - DIMS[5]), (0, PADDED_CLASSES - DIMS[6])))
            b = jnp.pad(b, ((0, 0), (0, PADDED_CLASSES - DIMS[6])),
                        constant_values=NEG_INF)
        flat_params.append(w.astype(jnp.bfloat16))   # MXU-native weight dtype
        flat_params.append(b)                        # f32 bias

    grid = (b_pad // batch_tile,)

    # Activations/outputs march over the batch; params stay resident (block (0, 0)).
    x_spec = pl.BlockSpec((batch_tile, PDIMS[0]), lambda i: (i, 0))
    out_spec = pl.BlockSpec((batch_tile, PADDED_CLASSES), lambda i: (i, 0))
    param_specs = [pl.BlockSpec(arr.shape, lambda i: (0, 0)) for arr in flat_params]

    # Advisory cost estimate for the XLA scheduler (padded dims).
    flops = 2 * b_pad * sum(PDIMS[i] * PDIMS[i + 1] for i in range(n_layers))
    bytes_accessed = (x.size * 2
                      + sum(int(a.size) * a.dtype.itemsize for a in flat_params)
                      + b_pad * PADDED_CLASSES * 4)
    transcendentals = b_pad * (PADDED_CLASSES + 1)   # exp row + reciprocal

    out = pl.pallas_call(
        mnist_mlp_kernel,
        out_shape=jax.ShapeDtypeStruct((b_pad, PADDED_CLASSES), jnp.float32),
        grid_spec=pltpu.PrefetchScalarGridSpec(
            num_scalar_prefetch=0,
            grid=grid,
            in_specs=[x_spec] + param_specs,
            out_specs=out_spec,
        ),
        compiler_params=pltpu.CompilerParams(
            dimension_semantics=("parallel",)),
        cost_estimate=pl.CostEstimate(
            flops=flops,
            transcendentals=transcendentals,
            bytes_accessed=bytes_accessed),
    )(x, *flat_params)

    # Strip batch padding and the padded class columns.
    return out[:B, :NUM_CLASSES]


def init_params(key):
    """PyTorch nn.Linear-style init, stored as (in, out) / (1, out) in f32."""
    params = []
    for i in range(len(DIMS) - 1):
        fan_in, fan_out = DIMS[i], DIMS[i + 1]
        key, kw, kb = jax.random.split(key, 3)
        bound = 1.0 / jnp.sqrt(fan_in)
        w = jax.random.uniform(kw, (fan_in, fan_out), jnp.float32, -bound, bound)
        b = jax.random.uniform(kb, (1, fan_out), jnp.float32, -bound, bound)
        params.append((w, b))
    return params


def reference_forward(x, params):
    """Plain-JAX f32 reference matching the PyTorch module."""
    h = x
    for i, (w, b) in enumerate(params):
        h = h @ w + b
        if i < len(params) - 1:
            h = jnp.maximum(h, 0.0)
    return jax.nn.softmax(h, axis=1)


if __name__ == "__main__":
    key = jax.random.PRNGKey(0)
    key, kx = jax.random.split(key)

    B = 8  # small batch; padded to one 256-row tile inside the wrapper
    x = jax.random.normal(kx, (B, DIMS[0]), jnp.float32)  # flattened (B, 1*28*28)

    params = init_params(key)

    out = mnist_net_forward(x, params)
    out = jax.block_until_ready(out)

    # Sanity check vs f32 reference; tolerance covers bf16 matmul operands and the
    # approximate EUP reciprocal in the softmax.
    ref = reference_forward(x, params)
    assert out.shape == (B, NUM_CLASSES)
    assert jnp.allclose(out, ref, atol=3e-2, rtol=3e-2), "mismatch vs reference"
    assert jnp.allclose(jnp.sum(out, axis=1), 1.0, atol=1e-2), "rows not normalized"

    print("KERNEL_OK")
</pallas_src>

<mosaic_0001>
module attributes {stable_mosaic.version = 11 : i64} {
  func.func @mnist_mlp_kernel(%arg0: i32, %arg1: memref<256x896xbf16, #tpu.memory_space<vmem>>, %arg2: memref<896x512xbf16, #tpu.memory_space<vmem>>, %arg3: memref<1x512xf32, #tpu.memory_space<vmem>>, %arg4: memref<512x256xbf16, #tpu.memory_space<vmem>>, %arg5: memref<1x256xf32, #tpu.memory_space<vmem>>, %arg6: memref<256x256xbf16, #tpu.memory_space<vmem>>, %arg7: memref<1x256xf32, #tpu.memory_space<vmem>>, %arg8: memref<256x128xbf16, #tpu.memory_space<vmem>>, %arg9: memref<1x128xf32, #tpu.memory_space<vmem>>, %arg10: memref<128x128xbf16, #tpu.memory_space<vmem>>, %arg11: memref<1x128xf32, #tpu.memory_space<vmem>>, %arg12: memref<128x128xbf16, #tpu.memory_space<vmem>>, %arg13: memref<1x128xf32, #tpu.memory_space<vmem>>, %arg14: memref<256x128xf32, #tpu.memory_space<vmem>>) attributes {dimension_semantics = [#tpu.dimension_semantics<parallel>], iteration_bounds = array<i64: 1>, scalar_prefetch = 0 : i64, scratch_operands = 0 : i64, tpu.core_type = #tpu.core_type<tc>, window_params = [{transform_indices = @transform_0, window_bounds = array<i64: 256, 896>}, {pipeline_mode = #tpu.pipeline_mode<synchronous>, transform_indices = @transform_1, window_bounds = array<i64: 896, 512>}, {pipeline_mode = #tpu.pipeline_mode<synchronous>, transform_indices = @transform_2, window_bounds = array<i64: 1, 512>}, {pipeline_mode = #tpu.pipeline_mode<synchronous>, transform_indices = @transform_3, window_bounds = array<i64: 512, 256>}, {pipeline_mode = #tpu.pipeline_mode<synchronous>, transform_indices = @transform_4, window_bounds = array<i64: 1, 256>}, {pipeline_mode = #tpu.pipeline_mode<synchronous>, transform_indices = @transform_5, window_bounds = array<i64: 256, 256>}, {pipeline_mode = #tpu.pipeline_mode<synchronous>, transform_indices = @transform_6, window_bounds = array<i64: 1, 256>}, {pipeline_mode = #tpu.pipeline_mode<synchronous>, transform_indices = @transform_7, window_bounds = array<i64: 256, 128>}, {pipeline_mode = #tpu.pipeline_mode<synchronous>, transform_indices = @transform_8, window_bounds = array<i64: 1, 128>}, {pipeline_mode = #tpu.pipeline_mode<synchronous>, transform_indices = @transform_9, window_bounds = array<i64: 128, 128>}, {pipeline_mode = #tpu.pipeline_mode<synchronous>, transform_indices = @transform_10, window_bounds = array<i64: 1, 128>}, {pipeline_mode = #tpu.pipeline_mode<synchronous>, transform_indices = @transform_11, window_bounds = array<i64: 128, 128>}, {pipeline_mode = #tpu.pipeline_mode<synchronous>, transform_indices = @transform_12, window_bounds = array<i64: 1, 128>}, {transform_indices = @transform_13, window_bounds = array<i64: 256, 128>}]} {
    %c0 = arith.constant 0 : index
    %c0_0 = arith.constant 0 : index
    %0 = vector.load %arg1[%c0, %c0_0] : memref<256x896xbf16, #tpu.memory_space<vmem>>, vector<256x896xbf16>
    %c0_1 = arith.constant 0 : index
    %c0_2 = arith.constant 0 : index
    %1 = vector.load %arg2[%c0_1, %c0_2] : memref<896x512xbf16, #tpu.memory_space<vmem>>, vector<896x512xbf16>
    %cst = arith.constant dense<0.000000e+00> : vector<256x512xf32>
    %2 = tpu.matmul %0, %1, %cst {dimension_numbers = #tpu.dot_dimension_numbers<[1], [0], [0], [1], [0, 0, 1, 1], [], []>} : vector<256x896xbf16>, vector<896x512xbf16>, vector<256x512xf32> -> vector<256x512xf32>
    %c0_3 = arith.constant 0 : index
    %c0_4 = arith.constant 0 : index
    %3 = vector.load %arg3[%c0_3, %c0_4] : memref<1x512xf32, #tpu.memory_space<vmem>>, vector<1x512xf32>
    %4 = vector.broadcast %3 : vector<1x512xf32> to vector<256x512xf32>
    %5 = arith.addf %2, %4 : vector<256x512xf32>
    %cst_5 = arith.constant 0.000000e+00 : f32
    %6 = vector.broadcast %cst_5 : f32 to vector<256x512xf32>
    %7 = arith.maximumf %5, %6 : vector<256x512xf32>
    %8 = arith.truncf %7 : vector<256x512xf32> to vector<256x512xbf16>
    %c0_6 = arith.constant 0 : index
    %c0_7 = arith.constant 0 : index
    %9 = vector.load %arg4[%c0_6, %c0_7] : memref<512x256xbf16, #tpu.memory_space<vmem>>, vector<512x256xbf16>
    %cst_8 = arith.constant dense<0.000000e+00> : vector<256x256xf32>
    %10 = tpu.matmul %8, %9, %cst_8 {dimension_numbers = #tpu.dot_dimension_numbers<[1], [0], [0], [1], [0, 0, 1, 1], [], []>} : vector<256x512xbf16>, vector<512x256xbf16>, vector<256x256xf32> -> vector<256x256xf32>
    %c0_9 = arith.constant 0 : index
    %c0_10 = arith.constant 0 : index
    %11 = vector.load %arg5[%c0_9, %c0_10] : memref<1x256xf32, #tpu.memory_space<vmem>>, vector<1x256xf32>
    %12 = vector.broadcast %11 : vector<1x256xf32> to vector<256x256xf32>
    %13 = arith.addf %10, %12 : vector<256x256xf32>
    %cst_11 = arith.constant 0.000000e+00 : f32
    %14 = vector.broadcast %cst_11 : f32 to vector<256x256xf32>
    %15 = arith.maximumf %13, %14 : vector<256x256xf32>
    %16 = arith.truncf %15 : vector<256x256xf32> to vector<256x256xbf16>
    %c0_12 = arith.constant 0 : index
    %c0_13 = arith.constant 0 : index
    %17 = vector.load %arg6[%c0_12, %c0_13] : memref<256x256xbf16, #tpu.memory_space<vmem>>, vector<256x256xbf16>
    %cst_14 = arith.constant dense<0.000000e+00> : vector<256x256xf32>
    %18 = tpu.matmul %16, %17, %cst_14 {dimension_numbers = #tpu.dot_dimension_numbers<[1], [0], [0], [1], [0, 0, 1, 1], [], []>} : vector<256x256xbf16>, vector<256x256xbf16>, vector<256x256xf32> -> vector<256x256xf32>
    %c0_15 = arith.constant 0 : index
    %c0_16 = arith.constant 0 : index
    %19 = vector.load %arg7[%c0_15, %c0_16] : memref<1x256xf32, #tpu.memory_space<vmem>>, vector<1x256xf32>
    %20 = vector.broadcast %19 : vector<1x256xf32> to vector<256x256xf32>
    %21 = arith.addf %18, %20 : vector<256x256xf32>
    %cst_17 = arith.constant 0.000000e+00 : f32
    %22 = vector.broadcast %cst_17 : f32 to vector<256x256xf32>
    %23 = arith.maximumf %21, %22 : vector<256x256xf32>
    %24 = arith.truncf %23 : vector<256x256xf32> to vector<256x256xbf16>
    %c0_18 = arith.constant 0 : index
    %c0_19 = arith.constant 0 : index
    %25 = vector.load %arg8[%c0_18, %c0_19] : memref<256x128xbf16, #tpu.memory_space<vmem>>, vector<256x128xbf16>
    %cst_20 = arith.constant dense<0.000000e+00> : vector<256x128xf32>
    %26 = tpu.matmul %24, %25, %cst_20 {dimension_numbers = #tpu.dot_dimension_numbers<[1], [0], [0], [1], [0, 0, 1, 1], [], []>} : vector<256x256xbf16>, vector<256x128xbf16>, vector<256x128xf32> -> vector<256x128xf32>
    %c0_21 = arith.constant 0 : index
    %c0_22 = arith.constant 0 : index
    %27 = vector.load %arg9[%c0_21, %c0_22] : memref<1x128xf32, #tpu.memory_space<vmem>>, vector<1x128xf32>
    %28 = vector.broadcast %27 : vector<1x128xf32> to vector<256x128xf32>
    %29 = arith.addf %26, %28 : vector<256x128xf32>
    %cst_23 = arith.constant 0.000000e+00 : f32
    %30 = vector.broadcast %cst_23 : f32 to vector<256x128xf32>
    %31 = arith.maximumf %29, %30 : vector<256x128xf32>
    %32 = arith.truncf %31 : vector<256x128xf32> to vector<256x128xbf16>
    %c0_24 = arith.constant 0 : index
    %c0_25 = arith.constant 0 : index
    %33 = vector.load %arg10[%c0_24, %c0_25] : memref<128x128xbf16, #tpu.memory_space<vmem>>, vector<128x128xbf16>
    %cst_26 = arith.constant dense<0.000000e+00> : vector<256x128xf32>
    %34 = tpu.matmul %32, %33, %cst_26 {dimension_numbers = #tpu.dot_dimension_numbers<[1], [0], [0], [1], [0, 0, 1, 1], [], []>} : vector<256x128xbf16>, vector<128x128xbf16>, vector<256x128xf32> -> vector<256x128xf32>
    %c0_27 = arith.constant 0 : index
    %c0_28 = arith.constant 0 : index
    %35 = vector.load %arg11[%c0_27, %c0_28] : memref<1x128xf32, #tpu.memory_space<vmem>>, vector<1x128xf32>
    %36 = vector.broadcast %35 : vector<1x128xf32> to vector<256x128xf32>
    %37 = arith.addf %34, %36 : vector<256x128xf32>
    %cst_29 = arith.constant 0.000000e+00 : f32
    %38 = vector.broadcast %cst_29 : f32 to vector<256x128xf32>
    %39 = arith.maximumf %37, %38 : vector<256x128xf32>
    %40 = arith.truncf %39 : vector<256x128xf32> to vector<256x128xbf16>
    %c0_30 = arith.constant 0 : index
    %c0_31 = arith.constant 0 : index
    %41 = vector.load %arg12[%c0_30, %c0_31] : memref<128x128xbf16, #tpu.memory_space<vmem>>, vector<128x128xbf16>
    %cst_32 = arith.constant dense<0.000000e+00> : vector<256x128xf32>
    %42 = tpu.matmul %40, %41, %cst_32 {dimension_numbers = #tpu.dot_dimension_numbers<[1], [0], [0], [1], [0, 0, 1, 1], [], []>} : vector<256x128xbf16>, vector<128x128xbf16>, vector<256x128xf32> -> vector<256x128xf32>
    %c0_33 = arith.constant 0 : index
    %c0_34 = arith.constant 0 : index
    %43 = vector.load %arg13[%c0_33, %c0_34] : memref<1x128xf32, #tpu.memory_space<vmem>>, vector<1x128xf32>
    %44 = vector.broadcast %43 : vector<1x128xf32> to vector<256x128xf32>
    %45 = arith.addf %42, %44 : vector<256x128xf32>
    %cst_35 = arith.constant dense<0xFF800000> : vector<256xf32>
    %46 = vector.multi_reduction <maximumf>, %45, %cst_35 [1] : vector<256x128xf32> to vector<256xf32>
    %47 = vector.shape_cast %46 : vector<256xf32> to vector<256x1xf32>
    %48 = vector.broadcast %47 : vector<256x1xf32> to vector<256x128xf32>
    %49 = arith.subf %45, %48 : vector<256x128xf32>
    %50 = math.exp %49 : vector<256x128xf32>
    %cst_36 = arith.constant dense<0.000000e+00> : vector<256xf32>
    %51 = vector.multi_reduction <add>, %50, %cst_36 [1] : vector<256x128xf32> to vector<256xf32>
    %52 = vector.shape_cast %51 : vector<256xf32> to vector<256x1xf32>
    %53 = tpu.reciprocal %52 {approx = true} : vector<256x1xf32> -> vector<256x1xf32>
    %54 = vector.broadcast %53 : vector<256x1xf32> to vector<256x128xf32>
    %55 = arith.mulf %50, %54 : vector<256x128xf32>
    %c0_37 = arith.constant 0 : index
    %c0_38 = arith.constant 0 : index
    %56 = vector.load %arg14[%c0_37, %c0_38] : memref<256x128xf32, #tpu.memory_space<vmem>>, vector<256x128xf32>
    tpu.vector_store %arg14[%c0_37, %c0_38], %55 {strides = array<i32>} : memref<256x128xf32, #tpu.memory_space<vmem>>, vector<256x128xf32>,
    return
  }
  func.func @transform_0(%arg0: i32) -> (i32, i32) {
    %c0_i32 = arith.constant 0 : i32
    %c0_i32_0 = arith.constant 0 : i32
    return %arg0, %c0_i32 : i32, i32
  }
  func.func @transform_1(%arg0: i32) -> (i32, i32) {
    %c0_i32 = arith.constant 0 : i32
    %c0_i32_0 = arith.constant 0 : i32
    %c0_i32_1 = arith.constant 0 : i32
    return %c0_i32, %c0_i32_0 : i32, i32
  }
  func.func @transform_2(%arg0: i32) -> (i32, i32) {
    %c0_i32 = arith.constant 0 : i32
    %c0_i32_0 = arith.constant 0 : i32
    %c0_i32_1 = arith.constant 0 : i32
    return %c0_i32, %c0_i32_0 : i32, i32
  }
  func.func @transform_3(%arg0: i32) -> (i32, i32) {
    %c0_i32 = arith.constant 0 : i32
    %c0_i32_0 = arith.constant 0 : i32
    %c0_i32_1 = arith.constant 0 : i32
    return %c0_i32, %c0_i32_0 : i32, i32
  }
  func.func @transform_4(%arg0: i32) -> (i32, i32) {
    %c0_i32 = arith.constant 0 : i32
    %c0_i32_0 = arith.constant 0 : i32
    %c0_i32_1 = arith.constant 0 : i32
    return %c0_i32, %c0_i32_0 : i32, i32
  }
  func.func @transform_5(%arg0: i32) -> (i32, i32) {
    %c0_i32 = arith.constant 0 : i32
    %c0_i32_0 = arith.constant 0 : i32
    %c0_i32_1 = arith.constant 0 : i32
    return %c0_i32, %c0_i32_0 : i32, i32
  }
  func.func @transform_6(%arg0: i32) -> (i32, i32) {
    %c0_i32 = arith.constant 0 : i32
    %c0_i32_0 = arith.constant 0 : i32
    %c0_i32_1 = arith.constant 0 : i32
    return %c0_i32, %c0_i32_0 : i32, i32
  }
  func.func @transform_7(%arg0: i32) -> (i32, i32) {
    %c0_i32 = arith.constant 0 : i32
    %c0_i32_0 = arith.constant 0 : i32
    %c0_i32_1 = arith.constant 0 : i32
    return %c0_i32, %c0_i32_0 : i32, i32
  }
  func.func @transform_8(%arg0: i32) -> (i32, i32) {
    %c0_i32 = arith.constant 0 : i32
    %c0_i32_0 = arith.constant 0 : i32
    %c0_i32_1 = arith.constant 0 : i32
    return %c0_i32, %c0_i32_0 : i32, i32
  }
  func.func @transform_9(%arg0: i32) -> (i32, i32) {
    %c0_i32 = arith.constant 0 : i32
    %c0_i32_0 = arith.constant 0 : i32
    %c0_i32_1 = arith.constant 0 : i32
    return %c0_i32, %c0_i32_0 : i32, i32
  }
  func.func @transform_10(%arg0: i32) -> (i32, i32) {
    %c0_i32 = arith.constant 0 : i32
    %c0_i32_0 = arith.constant 0 : i32
    %c0_i32_1 = arith.constant 0 : i32
    return %c0_i32, %c0_i32_0 : i32, i32
  }
  func.func @transform_11(%arg0: i32) -> (i32, i32) {
    %c0_i32 = arith.constant 0 : i32
    %c0_i32_0 = arith.constant 0 : i32
    %c0_i32_1 = arith.constant 0 : i32
    return %c0_i32, %c0_i32_0 : i32, i32
  }
  func.func @transform_12(%arg0: i32) -> (i32, i32) {
    %c0_i32 = arith.constant 0 : i32
    %c0_i32_0 = arith.constant 0 : i32
    %c0_i32_1 = arith.constant 0 : i32
    return %c0_i32, %c0_i32_0 : i32, i32
  }
  func.func @transform_13(%arg0: i32) -> (i32, i32) {
    %c0_i32 = arith.constant 0 : i32
    %c0_i32_0 = arith.constant 0 : i32
    return %arg0, %c0_i32 : i32, i32
  }
}

</mosaic_0001>

<bundles_post_ra>
// kernel: tpu_custom_call.1
= control target key start
LH: loop header
LB: loop body
LE: loop exit
PB: predicated region body
PF: predicated region fallthrough
CT: control target
= control target key end

     0   :  { %18 = vsyncpa [#allocation3], 0  ;;  %s9881_s0 = inlined_call_operand.hbm [shape: bf16[256,896], index: 0, kind: input, shape index: {}]   ;;  %s9882_s1 = inlined_call_operand.hbm [shape: bf16[896,512], index: 1, kind: input, shape index: {}]   ;;  %s9883_s2 = inlined_call_operand.vmem [shape: f32[1,512], index: 2, kind: input, shape index: {}]   ;;  %s9884_s3 = inlined_call_operand.hbm [shape: bf16[512,256], index: 3, kind: input, shape index: {}]   ;;  %s9885_s4 = inlined_call_operand.vmem [shape: f32[1,256], index: 4, kind: input, shape index: {}]   ;;  %s9886_s5 = inlined_call_operand.hbm [shape: bf16[256,256], index: 5, kind: input, shape index: {}]   ;;  %s9887_s6 = inlined_call_operand.vmem [shape: f32[1,256], index: 6, kind: input, shape index: {}]   ;;  %s9888_s7 = inlined_call_operand.hbm [shape: bf16[256,128], index: 7, kind: input, shape index: {}]   ;;  %s9889_s8 = inlined_call_operand.vmem [shape: f32[1,128], index: 8, kind: input, shape index: {}]   ;;  %s9890_s9 = inlined_call_operand.hbm [shape: bf16[128,128], index: 9, kind: input, shape index: {}]   ;;  %s9891_s10 = inlined_call_operand.vmem [shape: f32[1,128], index: 10, kind: input, shape index: {}]   ;;  %s9892_s11 = inlined_call_operand.hbm [shape: bf16[128,128], index: 11, kind: input, shape index: {}]   ;;  %s9893_s12 = inlined_call_operand.vmem [shape: f32[1,128], index: 12, kind: input, shape index: {}]   ;;  %s9894_s13 = inlined_call_operand.hbm [shape: f32[256,128], index: 13, kind: output, shape index: {}]  }
   0x1   :  { %19 = vsyncpa [#allocation6], 0 }
   0x2   :  { %20 = vsyncpa [#allocation9], 0 }
   0x3   :  { %21 = vsyncpa [#allocation12], 0 }
   0x4   :  { %22 = vsyncpa [#allocation4], 0  ;;  %s8880_s25 = smov [#allocation5]   ;;  %s8694_s29 = scalar_lea.hbm %s9882_s1, 28672 }
   0x5   :  { %s40_s26 = sshll.u32 %s8880_s25, 4  ;;  %p8695_p0 = scmp.ne.s32.totalorder %s9882_s1, %s8694_s29  ;;  %s41_s26 = int_to_ptr.vmem [resolvable:$true] %s40_s26 }
   0x6   :  { %p8698_p1 = scmp.lt.u32.totalorder %s8694_s29, %s9882_s1 }
   0x8   :  { %p8700_p2 = pnand %p8698_p1, %p8695_p0 }
   0xa   :  { %8703 = shalt.err (!%p8700_p2)
}
   0xb   :  { %s8704_s17 = scalar_lea.vmem %s41_s26, 28672  ;;  %p8709_p4 = scmp.lt.s32.totalorder %s41_s26, %s41_s26 }
   0xc   :  { %p8705_p3 = scmp.ne.s32.totalorder %s41_s26, %s8704_s17  ;;  %p8710_p5 = scmp.lt.s32.totalorder %s8704_s17, %s8704_s17 }
   0xe   :  { %p8711_p6 = por %p8710_p5, %p8709_p4 }
  0x10   :  { %p8712_p7 = pnand %p8711_p6, %p8705_p3 }
  0x12   :  { %8715 = shalt.err (!%p8712_p7)
}
  0x13   :  { %s8881_s18 = smov 256   ;;  %s8882_s19 = smov 16  }
  0x14   :  { %46 = dma.hbm_to_vmem [thread:$0]  %s9882_s1, 28672, %s41_s26, [#allocation6], %s8881_s18, %s8881_s18, %s8882_s19  }
  0x15   :  { %s8883_s22 = smov [#allocation8]   ;;  %s8716_s27 = scalar_lea.hbm %s9886_s5, 4096 }
  0x16   :  { %s68_s23 = sshll.u32 %s8883_s22, 4  ;;  %p8717_p8 = scmp.ne.s32.totalorder %s9886_s5, %s8716_s27  ;;  %s69_s23 = int_to_ptr.vmem [resolvable:$true] %s68_s23 }
  0x17   :  { %p8720_p9 = scmp.lt.u32.totalorder %s8716_s27, %s9886_s5 }
  0x19   :  { %p8722_p10 = pnand %p8720_p9, %p8717_p8 }
  0x1b   :  { %8725 = shalt.err (!%p8722_p10)
}
  0x1c   :  { %s8726_s15 = scalar_lea.vmem %s69_s23, 4096  ;;  %p8731_p12 = scmp.lt.s32.totalorder %s69_s23, %s69_s23 }
  0x1d   :  { %p8727_p11 = scmp.ne.s32.totalorder %s69_s23, %s8726_s15  ;;  %p8732_p13 = scmp.lt.s32.totalorder %s8726_s15, %s8726_s15 }
  0x1f   :  { %p8733_p0 = por %p8732_p13, %p8731_p12 }
  0x21   :  { %p8734_p1 = pnand %p8733_p0, %p8727_p11 }
  0x23   :  { %8737 = shalt.err (!%p8734_p1)
}
  0x24   :  { %s8884_s1 = smov 128   ;;  %s8885_s26 = smov 8  }
  0x25   :  { %74 = dma.hbm_to_vmem [thread:$0]  %s9886_s5, 4096, %s69_s23, [#allocation9], %s8884_s1, %s8884_s1, %s8885_s26  }
  0x26   :  { %s8886_s18 = smov [#allocation11]   ;;  %s8887_s20 = smov [#allocation2]  }
  0x27   :  { %s96_s19 = sshll.u32 %s8886_s18, 4  ;;  %s28_s21 = sshll.u32 %s8887_s20, 4  ;;  %s97_s19 = int_to_ptr.vmem [resolvable:$true] %s96_s19  ;;  %s8994_s21 = int_to_ptr.vmem [resolvable:$true] %s28_s21 }
  0x28   :  { %s8738_s25 = scalar_lea.hbm %s9890_s9, 1024 }
  0x29   :  { %p8739_p2 = scmp.ne.s32.totalorder %s9890_s9, %s8738_s25  ;;  %p8742_p3 = scmp.lt.u32.totalorder %s8738_s25, %s9890_s9 }
  0x2b   :  { %p8744_p4 = pnand %p8742_p3, %p8739_p2 }
  0x2d   :  { %8747 = shalt.err (!%p8744_p4)
}
  0x2e   :  { %s8748_s5 = scalar_lea.vmem %s97_s19, 1024  ;;  %p8753_p6 = scmp.lt.s32.totalorder %s97_s19, %s97_s19 }
  0x2f   :  { %p8749_p5 = scmp.ne.s32.totalorder %s97_s19, %s8748_s5  ;;  %p8754_p7 = scmp.lt.s32.totalorder %s8748_s5, %s8748_s5 }
  0x31   :  { %p8755_p8 = por %p8754_p7, %p8753_p6 }
  0x33   :  { %p8756_p9 = pnand %p8755_p8, %p8749_p5 }
  0x35   :  { %8759 = shalt.err (!%p8756_p9)
}
  0x36   :  { %s8888_s23 = smov 64   ;;  %s8889_s14 = smov 4  }
  0x37   :  { %102 = dma.hbm_to_vmem [thread:$0]  %s9890_s9, 1024, %s97_s19, [#allocation12], %s8888_s23, %s8888_s23, %s8889_s14  }
  0x38   :  { %s8760_s20 = scalar_lea.hbm %s9881_s0, 14336 }
  0x39   :  { %p8761_p10 = scmp.ne.s32.totalorder %s9881_s0, %s8760_s20  ;;  %p8764_p11 = scmp.lt.u32.totalorder %s8760_s20, %s9881_s0 }
  0x3b   :  { %p8766_p12 = pnand %p8764_p11, %p8761_p10 }
  0x3d   :  { %8769 = shalt.err (!%p8766_p12)
}
  0x3e   :  { %s8770_s28 = scalar_lea.vmem %s8994_s21, 14336  ;;  %p8775_p0 = scmp.lt.s32.totalorder %s8994_s21, %s8994_s21 }
  0x3f   :  { %p8771_p13 = scmp.ne.s32.totalorder %s8994_s21, %s8770_s28  ;;  %p8776_p1 = scmp.lt.s32.totalorder %s8770_s28, %s8770_s28 }
  0x41   :  { %p8777_p2 = por %p8776_p1, %p8775_p0 }
  0x43   :  { %p8778_p3 = pnand %p8777_p2, %p8771_p13 }
  0x45   :  { %8781 = shalt.err (!%p8778_p3)
}
  0x46   :  { %s8890_s9 = smov 448   ;;  %s8891_s19 = smov 28  }
  0x47   :  { %34 = dma.hbm_to_vmem [thread:$0]  %s9881_s0, 14336, %s8994_s21, [#allocation3], %s8890_s9, %s8890_s9, %s8891_s19  }
  0x48   :  { %s8892_s5 = smov [#allocation7]   ;;  %s8893_s16 = smov [#allocation10]  }
  0x49   :  { %s54_s15 = sshll.u32 %s8892_s5, 4  ;;  %s82_s17 = sshll.u32 %s8893_s16, 4  ;;  %s55_s15 = int_to_ptr.vmem [resolvable:$true] %s54_s15  ;;  %s9028_s17 = int_to_ptr.vmem [resolvable:$true] %s82_s17 }
  0x4a   :  { %s8782_s22 = scalar_lea.hbm %s9884_s3, 8192 }
  0x4b   :  { %p8783_p4 = scmp.ne.s32.totalorder %s9884_s3, %s8782_s22  ;;  %p8786_p5 = scmp.lt.u32.totalorder %s8782_s22, %s9884_s3 }
  0x4d   :  { %p8788_p6 = pnand %p8786_p5, %p8783_p4 }
  0x4f   :  { %8791 = shalt.err (!%p8788_p6)
}
  0x50   :  { %s8792_s0 = scalar_lea.vmem %s55_s15, 8192  ;;  %p8797_p8 = scmp.lt.s32.totalorder %s55_s15, %s55_s15 }
  0x51   :  { %p8793_p7 = scmp.ne.s32.totalorder %s55_s15, %s8792_s0  ;;  %p8798_p9 = scmp.lt.s32.totalorder %s8792_s0, %s8792_s0 }
  0x53   :  { %p8799_p10 = por %p8798_p9, %p8797_p8 }
  0x55   :  { %p8800_p11 = pnand %p8799_p10, %p8793_p7 }
  0x57   :  { %8803 = shalt.err (!%p8800_p11)
}
  0x58   :  { %60 = dma.hbm_to_vmem [thread:$0]  %s9884_s3, 8192, %s55_s15, [#allocation6], %s8884_s1, %s8884_s1, %s8885_s26  }
  0x59   :  { %s8804_s30 = scalar_lea.hbm %s9888_s7, 2048 }
  0x5a   :  { %p8805_p12 = scmp.ne.s32.totalorder %s9888_s7, %s8804_s30  ;;  %p8808_p13 = scmp.lt.u32.totalorder %s8804_s30, %s9888_s7 }
  0x5c   :  { %p8810_p0 = pnand %p8808_p13, %p8805_p12 }
  0x5e   :  { %8813 = shalt.err (!%p8810_p0)
}
  0x5f   :  { %s8814_s22 = scalar_lea.vmem %s9028_s17, 2048  ;;  %p8819_p2 = scmp.lt.s32.totalorder %s9028_s17, %s9028_s17 }
  0x60   :  { %p8815_p1 = scmp.ne.s32.totalorder %s9028_s17, %s8814_s22  ;;  %p8820_p3 = scmp.lt.s32.totalorder %s8814_s22, %s8814_s22 }
  0x62   :  { %p8821_p4 = por %p8820_p3, %p8819_p2 }
  0x64   :  { %p8822_p5 = pnand %p8821_p4, %p8815_p1 }
  0x66   :  { %8825 = shalt.err (!%p8822_p5)
}
  0x67   :  { %88 = dma.hbm_to_vmem [thread:$0]  %s9888_s7, 2048, %s9028_s17, [#allocation9], %s8888_s23, %s8888_s23, %s8889_s14  }
  0x68   :  { %s8894_s24 = smov [#allocation13]   ;;  %s8826_s0 = scalar_lea.hbm %s9892_s11, 1024 }
  0x69   :  { %s110_s25 = sshll.u32 %s8894_s24, 4  ;;  %p8827_p6 = scmp.ne.s32.totalorder %s9892_s11, %s8826_s0  ;;  %s111_s25 = int_to_ptr.vmem [resolvable:$true] %s110_s25 }
  0x6a   :  { %p8830_p7 = scmp.lt.u32.totalorder %s8826_s0, %s9892_s11 }
  0x6c   :  { %p8832_p8 = pnand %p8830_p7, %p8827_p6 }
  0x6e   :  { %8835 = shalt.err (!%p8832_p8)
}
  0x6f   :  { %s8836_s30 = scalar_lea.vmem %s111_s25, 1024  ;;  %p8841_p10 = scmp.lt.s32.totalorder %s111_s25, %s111_s25 }
  0x70   :  { %p8837_p9 = scmp.ne.s32.totalorder %s111_s25, %s8836_s30  ;;  %p8842_p11 = scmp.lt.s32.totalorder %s8836_s30, %s8836_s30 }
  0x72   :  { %p8843_p12 = por %p8842_p11, %p8841_p10 }
  0x74   :  { %p8844_p13 = pnand %p8843_p12, %p8837_p9 }
  0x76   :  { %8847 = shalt.err (!%p8844_p13)
}
  0x77   :  { %116 = dma.hbm_to_vmem [thread:$0]  %s9892_s11, 1024, %s111_s25, [#allocation12], %s8888_s23, %s8888_s23, %s8889_s14  }
  0x78   :  { %8870 = dma.done.wait [#allocation3], 14336  }
  0x79   :  { %8871 = vsyncadd [#allocation3], 4294952960 }
  0x7a   :  { %8872 = dma.done.wait [#allocation6], 36864  }
  0x7b   :  { %8873 = vsyncadd [#allocation6], 4294930432 }
  0x7c   :  { %8874 = dma.done.wait [#allocation9], 6144  }
  0x7d   :  { %8875 = vsyncadd [#allocation9], 4294961152 }
  0x7e   :  { %8876 = dma.done.wait [#allocation12], 2048  }
  0x7f   :  { %8877 = vsyncadd [#allocation12], 4294965248  ;;  %v7894_v0 = vld [vmem:[#allocation5 + $0x4] ss:$16 sps:$4 sm:$0xff]   ;;  %v7896_v1 = vld [vmem:[#allocation5 + $0xc] ss:$16 sps:$4 sm:$0xff]  }
  0x80   :  { %2211 = vmatprep.subr.bf16.mxu0 %v7894_v0  ;;  %v7898_v2 = vld [vmem:[#allocation5] ss:$16 sps:$4 sm:$0xff]   ;;  %v7899_v3 = vld [vmem:[#allocation5 + $0x8] ss:$16 sps:$4 sm:$0xff]   ;;  %2983 = vmatprep.subr.bf16.mxu1 %v7896_v1  ;;  %v7900_v4 = vld [vmem:[#allocation5 + $0x24] ss:$16 sps:$4 sm:$0xff]  }
  0x81   :  { %2212 = vmatpush1.bf16.msra.mxu0 %v7898_v2  ;;  %2984 = vmatpush1.bf16.msra.mxu1 %v7899_v3  ;;  %v7902_v5 = vld [vmem:[#allocation5 + $0x2c] ss:$16 sps:$4 sm:$0xff]   ;;  %v7904_v6 = vld [vmem:[#allocation5 + $0x20] ss:$16 sps:$4 sm:$0xff]   ;;  %v7905_v7 = vld [vmem:[#allocation5 + $0x28] ss:$16 sps:$4 sm:$0xff]  }
  0x82   :  { %2213 = vmatprep.subr.bf16.mxu0 %v7900_v4  ;;  %2985 = vmatprep.subr.bf16.mxu1 %v7902_v5  ;;  %v7906_v8 = vld [vmem:[#allocation5 + $0x44] ss:$16 sps:$4 sm:$0xff]   ;;  %v7908_v9 = vld [vmem:[#allocation5 + $0x4c] ss:$16 sps:$4 sm:$0xff]   ;;  %v7910_v10 = vld [vmem:[#allocation5 + $0x40] ss:$16 sps:$4 sm:$0xff]  }
  0x83   :  { %v7911_v11 = vld [vmem:[#allocation5 + $0x48] ss:$16 sps:$4 sm:$0xff]   ;;  %v7912_v12 = vld [vmem:[#allocation5 + $0x64] ss:$16 sps:$4 sm:$0xff]   ;;  %v7914_v13 = vld [vmem:[#allocation5 + $0x6c] ss:$16 sps:$4 sm:$0xff]  }
  0x84   :  { %v7916_v14 = vld [vmem:[#allocation5 + $0x60] ss:$16 sps:$4 sm:$0xff]   ;;  %v7917_v15 = vld [vmem:[#allocation5 + $0x68] ss:$16 sps:$4 sm:$0xff]   ;;  %v7918_v16 = vld [vmem:[#allocation5 + $0x84] ss:$16 sps:$4 sm:$0xff]  }
  0x85   :  { %2214 = vmatpush1.bf16.msra.mxu0 %v7904_v6  ;;  %2986 = vmatpush1.bf16.msra.mxu1 %v7905_v7  ;;  %v7920_v17 = vld [vmem:[#allocation5 + $0x8c] ss:$16 sps:$4 sm:$0xff]   ;;  %v7922_v18 = vld [vmem:[#allocation5 + $0x80] ss:$16 sps:$4 sm:$0xff]   ;;  %v7923_v19 = vld [vmem:[#allocation5 + $0x88] ss:$16 sps:$4 sm:$0xff]  }
  0x86   :  { %2215 = vmatprep.subr.bf16.mxu0 %v7906_v8  ;;  %2987 = vmatprep.subr.bf16.mxu1 %v7908_v9  ;;  %v7924_v20 = vld [vmem:[#allocation5 + $0xa4] ss:$16 sps:$4 sm:$0xff]   ;;  %v7926_v21 = vld [vmem:[#allocation5 + $0xac] ss:$16 sps:$4 sm:$0xff]   ;;  %v7928_v22 = vld [vmem:[#allocation5 + $0xa0] ss:$16 sps:$4 sm:$0xff]  }
  0x87   :  { %v7929_v23 = vld [vmem:[#allocation5 + $0xa8] ss:$16 sps:$4 sm:$0xff]   ;;  %v7930_v24 = vld [vmem:[#allocation5 + $0xc4] ss:$16 sps:$4 sm:$0xff]   ;;  %v7932_v25 = vld [vmem:[#allocation5 + $0xcc] ss:$16 sps:$4 sm:$0xff]  }
  0x88   :  { %v7934_v26 = vld [vmem:[#allocation5 + $0xc0] ss:$16 sps:$4 sm:$0xff]   ;;  %v7935_v27 = vld [vmem:[#allocation5 + $0xc8] ss:$16 sps:$4 sm:$0xff]   ;;  %v7936_v28 = vld [vmem:[#allocation5 + $0xe4] ss:$16 sps:$4 sm:$0xff]  }
  0x89   :  { %2216 = vmatpush1.bf16.msra.mxu0 %v7910_v10  ;;  %2988 = vmatpush1.bf16.msra.mxu1 %v7911_v11  ;;  %v7938_v29 = vld [vmem:[#allocation5 + $0xec] ss:$16 sps:$4 sm:$0xff]   ;;  %v7940_v30 = vld [vmem:[#allocation5 + $0xe0] ss:$16 sps:$4 sm:$0xff]   ;;  %v7941_v31 = vld [vmem:[#allocation5 + $0xe8] ss:$16 sps:$4 sm:$0xff]  }
  0x8a   :  { %2217 = vmatprep.subr.bf16.mxu0 %v7912_v12  ;;  %2989 = vmatprep.subr.bf16.mxu1 %v7914_v13  ;;  %v7942_v32 = vld [vmem:[#allocation5 + $0x104] ss:$16 sps:$4 sm:$0xff]   ;;  %v7944_v33 = vld [vmem:[#allocation5 + $0x10c] ss:$16 sps:$4 sm:$0xff]   ;;  %v7946_v34 = vld [vmem:[#allocation5 + $0x100] ss:$16 sps:$4 sm:$0xff]  }
  0x8b   :  { %v7947_v35 = vld [vmem:[#allocation5 + $0x108] ss:$16 sps:$4 sm:$0xff]   ;;  %v7948_v36 = vld [vmem:[#allocation5 + $0x124] ss:$16 sps:$4 sm:$0xff]   ;;  %v7950_v37 = vld [vmem:[#allocation5 + $0x12c] ss:$16 sps:$4 sm:$0xff]  }
  0x8c   :  { %v7952_v38 = vld [vmem:[#allocation5 + $0x120] ss:$16 sps:$4 sm:$0xff]   ;;  %v7953_v39 = vld [vmem:[#allocation5 + $0x128] ss:$16 sps:$4 sm:$0xff]   ;;  %v7954_v40 = vld [vmem:[#allocation5 + $0x144] ss:$16 sps:$4 sm:$0xff]  }
  0x8d   :  { %2218 = vmatpush1.bf16.msra.mxu0 %v7916_v14  ;;  %2990 = vmatpush1.bf16.msra.mxu1 %v7917_v15  ;;  %v7956_v41 = vld [vmem:[#allocation5 + $0x14c] ss:$16 sps:$4 sm:$0xff]   ;;  %v7958_v42 = vld [vmem:[#allocation5 + $0x140] ss:$16 sps:$4 sm:$0xff]   ;;  %v7959_v43 = vld [vmem:[#allocation5 + $0x148] ss:$16 sps:$4 sm:$0xff]  }
  0x8e   :  { %2219 = vmatprep.subr.bf16.mxu0 %v7918_v16  ;;  %2991 = vmatprep.subr.bf16.mxu1 %v7920_v17  ;;  %v7960_v44 = vld [vmem:[#allocation5 + $0x164] ss:$16 sps:$4 sm:$0xff]   ;;  %v7962_v45 = vld [vmem:[#allocation5 + $0x16c] ss:$16 sps:$4 sm:$0xff]   ;;  %v7964_v46 = vld [vmem:[#allocation5 + $0x160] ss:$16 sps:$4 sm:$0xff]  }
  0x8f   :  { %v7965_v47 = vld [vmem:[#allocation5 + $0x168] ss:$16 sps:$4 sm:$0xff]   ;;  %v7992_v48 = vld [vmem:[#allocation2 + $0x4] ss:$28 sps:$4 sm:$0xff]   ;;  %v7968_v50 = vld [vmem:[#allocation5 + $0x18c] ss:$16 sps:$4 sm:$0xff]  }
  0x90   :  { %v7966_v49 = vld [vmem:[#allocation5 + $0x184] ss:$16 sps:$4 sm:$0xff]   ;;  %2243 = vmatprep.mubr.bf16.mxu0 %v7992_v48  ;;  %3015 = vmatprep.mubr.bf16.mxu1 %v7992_v48  ;;  %v7970_v51 = vld [vmem:[#allocation5 + $0x180] ss:$16 sps:$4 sm:$0xff]   ;;  %v7971_v52 = vld [vmem:[#allocation5 + $0x188] ss:$16 sps:$4 sm:$0xff]  }
  0x91   :  { %2220 = vmatpush1.bf16.msra.mxu0 %v7922_v18  ;;  %2992 = vmatpush1.bf16.msra.mxu1 %v7923_v19  ;;  %v7972_v53 = vld [vmem:[#allocation5 + $0x1a4] ss:$16 sps:$4 sm:$0xff]   ;;  %v7974_v54 = vld [vmem:[#allocation5 + $0x1ac] ss:$16 sps:$4 sm:$0xff]   ;;  %v7976_v55 = vld [vmem:[#allocation5 + $0x1a0] ss:$16 sps:$4 sm:$0xff]  }
  0x92   :  { %2221 = vmatprep.subr.bf16.mxu0 %v7924_v20  ;;  %2993 = vmatprep.subr.bf16.mxu1 %v7926_v21  ;;  %v7977_v56 = vld [vmem:[#allocation5 + $0x1a8] ss:$16 sps:$4 sm:$0xff]   ;;  %v7978_v57 = vld [vmem:[#allocation5 + $0x1c4] ss:$16 sps:$4 sm:$0xff]   ;;  %v7980_v58 = vld [vmem:[#allocation5 + $0x1cc] ss:$16 sps:$4 sm:$0xff]  }
  0x93   :  { %v7982_v59 = vld [vmem:[#allocation5 + $0x1c0] ss:$16 sps:$4 sm:$0xff]   ;;  %v7983_v60 = vld [vmem:[#allocation5 + $0x1c8] ss:$16 sps:$4 sm:$0xff]   ;;  %v7984_v61 = vld [vmem:[#allocation5 + $0x1e4] ss:$16 sps:$4 sm:$0xff]  }
  0x94   :  { %v7986_v62 = vld [vmem:[#allocation5 + $0x1ec] ss:$16 sps:$4 sm:$0xff]   ;;  %v7988_v63 = vld [vmem:[#allocation5 + $0x1e0] ss:$16 sps:$4 sm:$0xff]   ;;  %v7989_v0 = vld [vmem:[#allocation5 + $0x1e8] ss:$16 sps:$4 sm:$0xff]  }
  0x95   :  { %2222 = vmatpush1.bf16.msra.mxu0 %v7928_v22  ;;  %2994 = vmatpush1.bf16.msra.mxu1 %v7929_v23  ;;  %v7995_v1 = vld [vmem:[#allocation5 + $0x204] ss:$16 sps:$4 sm:$0xff]   ;;  %v7990_v2 = vld [vmem:[#allocation2] ss:$28 sps:$4 sm:$0xff]   ;;  %v8044_v7 = vld [vmem:[#allocation5 + $0x208] ss:$16 sps:$4 sm:$0xff]  }
  0x96   :  { %2223 = vmatprep.subr.bf16.mxu0 %v7930_v24  ;;  %2995 = vmatprep.subr.bf16.mxu1 %v7932_v25  ;;  %v7993_v3 = vld [vmem:[#allocation5 + $0x200] ss:$16 sps:$4 sm:$0xff]   ;;  %v7996_v4 = vld [vmem:[#allocation2 + $0x3c] ss:$28 sps:$4 sm:$0xff]   ;;  %v8001_v5 = vld [vmem:[#allocation5 + $0x224] ss:$16 sps:$4 sm:$0xff]  }
  0x97   :  { %v7999_v6 = vld [vmem:[#allocation5 + $0x220] ss:$16 sps:$4 sm:$0xff]   ;;  %v8046_v8 = vld [vmem:[#allocation5 + $0x20c] ss:$16 sps:$4 sm:$0xff]   ;;  %v8007_v9 = vld [vmem:[#allocation5 + $0x244] ss:$16 sps:$4 sm:$0xff]  }
  0x98   :  { %v8049_v10 = vld [vmem:[#allocation5 + $0x22c] ss:$16 sps:$4 sm:$0xff]   ;;  %v7998_v11 = vld [vmem:[#allocation2 + $0x38] ss:$28 sps:$4 sm:$0xff]   ;;  %v8005_v13 = vld [vmem:[#allocation5 + $0x240] ss:$16 sps:$4 sm:$0xff]  }
  0x99   :  { %2224 = vmatpush1.bf16.msra.mxu0 %v7934_v26  ;;  %2996 = vmatpush1.bf16.msra.mxu1 %v7935_v27  ;;  %v8002_v12 = vld [vmem:[#allocation2 + $0x74] ss:$28 sps:$4 sm:$0xff]   ;;  %v8047_v14 = vld [vmem:[#allocation5 + $0x228] ss:$16 sps:$4 sm:$0xff]   ;;  %v8058_v16 = vld [vmem:[#allocation5 + $0x24c] ss:$16 sps:$4 sm:$0xff]  }
  0x9a   :  { %2225 = vmatprep.subr.bf16.mxu0 %v7936_v28  ;;  %2997 = vmatprep.subr.bf16.mxu1 %v7938_v29  ;;  %v8013_v15 = vld [vmem:[#allocation5 + $0x264] ss:$16 sps:$4 sm:$0xff]   ;;  %v8011_v17 = vld [vmem:[#allocation5 + $0x260] ss:$16 sps:$4 sm:$0xff]   ;;  %v8056_v18 = vld [vmem:[#allocation5 + $0x248] ss:$16 sps:$4 sm:$0xff]  }
  0x9b   :  { %v8019_v19 = vld [vmem:[#allocation5 + $0x284] ss:$16 sps:$4 sm:$0xff]   ;;  %v8061_v20 = vld [vmem:[#allocation5 + $0x26c] ss:$16 sps:$4 sm:$0xff]   ;;  %v8017_v23 = vld [vmem:[#allocation5 + $0x280] ss:$16 sps:$4 sm:$0xff]  }
  0x9c   :  { %v8004_v21 = vld [vmem:[#allocation2 + $0x70] ss:$28 sps:$4 sm:$0xff]   ;;  %v8059_v24 = vld [vmem:[#allocation5 + $0x268] ss:$16 sps:$4 sm:$0xff]   ;;  %v8025_v25 = vld [vmem:[#allocation5 + $0x2a4] ss:$16 sps:$4 sm:$0xff]  }
  0x9d   :  { %2226 = vmatpush1.bf16.msra.mxu0 %v7940_v30  ;;  %2998 = vmatpush1.bf16.msra.mxu1 %v7941_v31  ;;  %v8008_v22 = vld [vmem:[#allocation2 + $0xac] ss:$28 sps:$4 sm:$0xff]   ;;  %v8023_v27 = vld [vmem:[#allocation5 + $0x2a0] ss:$16 sps:$4 sm:$0xff]   ;;  %v8031_v29 = vld [vmem:[#allocation5 + $0x2c4] ss:$16 sps:$4 sm:$0xff]  }
  0x9e   :  { %2227 = vmatprep.subr.bf16.mxu0 %v7942_v32  ;;  %2999 = vmatprep.subr.bf16.mxu1 %v7944_v33  ;;  %v8070_v26 = vld [vmem:[#allocation5 + $0x28c] ss:$16 sps:$4 sm:$0xff]   ;;  %v8068_v28 = vld [vmem:[#allocation5 + $0x288] ss:$16 sps:$4 sm:$0xff]   ;;  %v8014_v32 = vld [vmem:[#allocation2 + $0xe4] ss:$28 sps:$4 sm:$0xff]  }
  0x9f   :  { %v8073_v30 = vld [vmem:[#allocation5 + $0x2ac] ss:$16 sps:$4 sm:$0xff]   ;;  %v8010_v31 = vld [vmem:[#allocation2 + $0xa8] ss:$28 sps:$4 sm:$0xff]   ;;  %v8029_v33 = vld [vmem:[#allocation5 + $0x2c0] ss:$16 sps:$4 sm:$0xff]  }
  0xa0   :  { %v8092_v48 = vld [vmem:[#allocation5 + $0x308] ss:$16 sps:$4 sm:$0xff]  }
  0xa1   :  { %2228 = vmatpush1.bf16.msra.mxu0 %v7946_v34  ;;  %3000 = vmatpush1.bf16.msra.mxu1 %v7947_v35  ;;  %v8071_v34 = vld [vmem:[#allocation5 + $0x2a8] ss:$16 sps:$4 sm:$0xff]   ;;  %v8037_v35 = vld [vmem:[#allocation5 + $0x2e4] ss:$16 sps:$4 sm:$0xff]  }
  0xa2   :  { %2229 = vmatprep.subr.bf16.mxu0 %v7948_v36  ;;  %3001 = vmatprep.subr.bf16.mxu1 %v7950_v37  ;;  %v8082_v36 = vld [vmem:[#allocation5 + $0x2cc] ss:$16 sps:$4 sm:$0xff]   ;;  %v8035_v37 = vld [vmem:[#allocation5 + $0x2e0] ss:$16 sps:$4 sm:$0xff]  }
  0xa5   :  { %2230 = vmatpush1.bf16.msra.mxu0 %v7952_v38  ;;  %3002 = vmatpush1.bf16.msra.mxu1 %v7953_v39  ;;  %v8080_v38 = vld [vmem:[#allocation5 + $0x2c8] ss:$16 sps:$4 sm:$0xff]   ;;  %v8043_v39 = vld [vmem:[#allocation5 + $0x304] ss:$16 sps:$4 sm:$0xff]  }
  0xa6   :  { %2231 = vmatprep.subr.bf16.mxu0 %v7954_v40  ;;  %3003 = vmatprep.subr.bf16.mxu1 %v7956_v41  ;;  %v8085_v40 = vld [vmem:[#allocation5 + $0x2ec] ss:$16 sps:$4 sm:$0xff]  }
  0xa7   :  { %v8016_v41 = vld [vmem:[#allocation2 + $0xe0] ss:$28 sps:$4 sm:$0xff]  }
  0xa9   :  { %2232 = vmatpush1.bf16.msra.mxu0 %v7958_v42  ;;  %3004 = vmatpush1.bf16.msra.mxu1 %v7959_v43  ;;  %v8020_v42 = vld [vmem:[#allocation2 + $0x11c] ss:$28 sps:$4 sm:$0xff]   ;;  %v8041_v43 = vld [vmem:[#allocation5 + $0x300] ss:$16 sps:$4 sm:$0xff]  }
  0xaa   :  { %2233 = vmatprep.subr.bf16.mxu0 %v7960_v44  ;;  %3005 = vmatprep.subr.bf16.mxu1 %v7962_v45  ;;  %v8083_v44 = vld [vmem:[#allocation5 + $0x2e8] ss:$16 sps:$4 sm:$0xff]   ;;  %v8055_v45 = vld [vmem:[#allocation5 + $0x324] ss:$16 sps:$4 sm:$0xff]  }
  0xad   :  { %2234 = vmatpush1.bf16.msra.mxu0 %v7964_v46  ;;  %3006 = vmatpush1.bf16.msra.mxu1 %v7965_v47  ;;  %v8094_v46 = vld [vmem:[#allocation5 + $0x30c] ss:$16 sps:$4 sm:$0xff]   ;;  %v8053_v47 = vld [vmem:[#allocation5 + $0x320] ss:$16 sps:$4 sm:$0xff]  }
  0xae   :  { %2235 = vmatprep.subr.bf16.mxu0 %v7966_v49  ;;  %3007 = vmatprep.subr.bf16.mxu1 %v7968_v50  ;;  %v8067_v49 = vld [vmem:[#allocation5 + $0x344] ss:$16 sps:$4 sm:$0xff]   ;;  %v8097_v50 = vld [vmem:[#allocation5 + $0x32c] ss:$16 sps:$4 sm:$0xff]  }
  0xb1   :  { %2236 = vmatpush1.bf16.msra.mxu0 %v7970_v51  ;;  %3008 = vmatpush1.bf16.msra.mxu1 %v7971_v52  ;;  %v8022_v51 = vld [vmem:[#allocation2 + $0x118] ss:$28 sps:$4 sm:$0xff]  }
  0xb2   :  { %2237 = vmatprep.subr.bf16.mxu0 %v7972_v53  ;;  %3009 = vmatprep.subr.bf16.mxu1 %v7974_v54  ;;  %v8026_v52 = vld [vmem:[#allocation2 + $0x154] ss:$28 sps:$4 sm:$0xff]   ;;  %v8095_v54 = vld [vmem:[#allocation5 + $0x328] ss:$16 sps:$4 sm:$0xff]  }
  0xb3   :  { %v8065_v53 = vld [vmem:[#allocation5 + $0x340] ss:$16 sps:$4 sm:$0xff]  }
  0xb5   :  { %2238 = vmatpush1.bf16.msra.mxu0 %v7976_v55  ;;  %3010 = vmatpush1.bf16.msra.mxu1 %v7977_v56  ;;  %v8079_v55 = vld [vmem:[#allocation5 + $0x364] ss:$16 sps:$4 sm:$0xff]   ;;  %v8106_v56 = vld [vmem:[#allocation5 + $0x34c] ss:$16 sps:$4 sm:$0xff]  }
  0xb6   :  { %2239 = vmatprep.subr.bf16.mxu0 %v7978_v57  ;;  %3011 = vmatprep.subr.bf16.mxu1 %v7980_v58  ;;  %v8077_v57 = vld [vmem:[#allocation5 + $0x360] ss:$16 sps:$4 sm:$0xff]   ;;  %v8104_v58 = vld [vmem:[#allocation5 + $0x348] ss:$16 sps:$4 sm:$0xff]  }
  0xb9   :  { %2240 = vmatpush1.bf16.msra.mxu0 %v7982_v59  ;;  %3012 = vmatpush1.bf16.msra.mxu1 %v7983_v60  ;;  %v8091_v59 = vld [vmem:[#allocation5 + $0x384] ss:$16 sps:$4 sm:$0xff]   ;;  %v8109_v60 = vld [vmem:[#allocation5 + $0x36c] ss:$16 sps:$4 sm:$0xff]  }
  0xba   :  { %2241 = vmatprep.subr.bf16.mxu0 %v7984_v61  ;;  %3013 = vmatprep.subr.bf16.mxu1 %v7986_v62  ;;  %v8028_v61 = vld [vmem:[#allocation2 + $0x150] ss:$28 sps:$4 sm:$0xff]  }
  0xbb   :  { %v8032_v62 = vld [vmem:[#allocation2 + $0x18c] ss:$28 sps:$4 sm:$0xff]  }
  0xbd   :  { %2242 = vmatpush1.bf16.msra.mxu0 %v7988_v63  ;;  %3014 = vmatpush1.bf16.msra.mxu1 %v7989_v0  ;;  %v8089_v63 = vld [vmem:[#allocation5 + $0x380] ss:$16 sps:$4 sm:$0xff]   ;;  %v8107_v0 = vld [vmem:[#allocation5 + $0x368] ss:$16 sps:$4 sm:$0xff]  }
  0xbe   :  { %2404 = vmatprep.subr.bf16.mxu0 %v7995_v1  ;;  %3176 = vmatprep.subr.bf16.mxu1 %v8046_v8  ;;  %v8103_v1 = vld [vmem:[#allocation5 + $0x3a4] ss:$16 sps:$4 sm:$0xff]  }
  0xbf   :  { %v8038_v8 = vld [vmem:[#allocation2 + $0x1c4] ss:$28 sps:$4 sm:$0xff]  }
  0xc0   :  { %2244 = vmatmul.mubr.bf16.vlgmr.msra.gmra.mrb[0].mxu0 %v7990_v2  ;;  %3016 = vmatmul.mubr.bf16.vlgmr.msra.gmra.mrb[0].mxu1 %v7990_v2  ;;  %v8118_v2 = vld [vmem:[#allocation5 + $0x38c] ss:$16 sps:$4 sm:$0xff]  }
  0xc1   :  { %2405 = vmatpush1.bf16.msra.mxu0 %v7993_v3  ;;  %2253 = vmatprep.mubr.bf16.mxu0 %v7996_v4  ;;  %v8101_v3 = vld [vmem:[#allocation5 + $0x3a0] ss:$16 sps:$4 sm:$0xff]  }
  0xc2   :  { %3025 = vmatprep.mubr.bf16.mxu1 %v7996_v4  ;;  %2406 = vmatprep.subr.bf16.mxu0 %v8001_v5  ;;  %v8116_v4 = vld [vmem:[#allocation5 + $0x388] ss:$16 sps:$4 sm:$0xff]   ;;  %v8115_v5 = vld [vmem:[#allocation5 + $0x3c4] ss:$16 sps:$4 sm:$0xff]  }
  0xc3   :  { %3177 = vmatpush1.bf16.msra.mxu1 %v8044_v7  ;;  %v8034_v7 = vld [vmem:[#allocation2 + $0x188] ss:$28 sps:$4 sm:$0xff]  }
  0xc4   :  { %3178 = vmatprep.subr.bf16.mxu1 %v8049_v10  ;;  %v8119_v10 = vld [vmem:[#allocation5 + $0x3a8] ss:$16 sps:$4 sm:$0xff]  }
  0xc5   :  { %2407 = vmatpush1.bf16.msra.mxu0 %v7999_v6  ;;  %v8121_v6 = vld [vmem:[#allocation5 + $0x3ac] ss:$16 sps:$4 sm:$0xff]  }
  0xc6   :  { %2408 = vmatprep.subr.bf16.mxu0 %v8007_v9  ;;  %v8113_v9 = vld [vmem:[#allocation5 + $0x3c0] ss:$16 sps:$4 sm:$0xff]  }
  0xc7   :  { %3179 = vmatpush1.bf16.msra.mxu1 %v8047_v14  ;;  %v8128_v14 = vld [vmem:[#allocation5 + $0x3c8] ss:$16 sps:$4 sm:$0xff]  }
  0xc8   :  { %2254 = vmatmul.mubr.bf16.gmra.mrb[4].mxu0 %v7998_v11  ;;  %3026 = vmatmul.mubr.bf16.gmra.mrb[4].mxu1 %v7998_v11  ;;  %v8127_v11 = vld [vmem:[#allocation5 + $0x3e4] ss:$16 sps:$4 sm:$0xff]  }
  0xc9   :  { %2263 = vmatprep.mubr.bf16.mxu0 %v8002_v12  ;;  %3035 = vmatprep.mubr.bf16.mxu1 %v8002_v12  ;;  %v8130_v12 = vld [vmem:[#allocation5 + $0x3cc] ss:$16 sps:$4 sm:$0xff]  }
  0xca   :  { %2409 = vmatpush1.bf16.msra.mxu0 %v8005_v13  ;;  %3180 = vmatprep.subr.bf16.mxu1 %v8058_v16  ;;  %v8125_v13 = vld [vmem:[#allocation5 + $0x3e0] ss:$16 sps:$4 sm:$0xff]   ;;  %v8139_v16 = vld [vmem:[#allocation5 + $0x404] ss:$16 sps:$4 sm:$0xff]  }
  0xcb   :  { %2410 = vmatprep.subr.bf16.mxu0 %v8013_v15  ;;  %3181 = vmatpush1.bf16.msra.mxu1 %v8056_v18  ;;  %v8133_v15 = vld [vmem:[#allocation5 + $0x3ec] ss:$16 sps:$4 sm:$0xff]  }
  0xcc   :  { %3182 = vmatprep.subr.bf16.mxu1 %v8061_v20  ;;  %v8050_v18 = vld [vmem:[#allocation2 + $0x1fc] ss:$28 sps:$4 sm:$0xff]  }
  0xcd   :  { %v8190_v20 = vld [vmem:[#allocation5 + $0x40c] ss:$16 sps:$4 sm:$0xff]  }
  0xce   :  { %2411 = vmatpush1.bf16.msra.mxu0 %v8011_v17  ;;  %v8040_v17 = vld [vmem:[#allocation2 + $0x1c0] ss:$28 sps:$4 sm:$0xff]  }
  0xcf   :  { %2412 = vmatprep.subr.bf16.mxu0 %v8019_v19  ;;  %3183 = vmatpush1.bf16.msra.mxu1 %v8059_v24  ;;  %v8131_v19 = vld [vmem:[#allocation5 + $0x3e8] ss:$16 sps:$4 sm:$0xff]  }
  0xd0   :  { %2264 = vmatmul.mubr.bf16.gmra.mrb[8].mxu0 %v8004_v21  ;;  %3036 = vmatmul.mubr.bf16.gmra.mrb[8].mxu1 %v8004_v21  ;;  %v8052_v21 = vld [vmem:[#allocation2 + $0x1f8] ss:$28 sps:$4 sm:$0xff]   ;;  %v8074_v24 = vld [vmem:[#allocation2 + $0x26c] ss:$28 sps:$4 sm:$0xff]  }
  0xd1   :  { %2273 = vmatprep.mubr.bf16.mxu0 %v8008_v22  ;;  %3045 = vmatprep.mubr.bf16.mxu1 %v8008_v22  ;;  %v8062_v22 = vld [vmem:[#allocation2 + $0x234] ss:$28 sps:$4 sm:$0xff]  }
  0xd2   :  { %2413 = vmatpush1.bf16.msra.mxu0 %v8017_v23  ;;  %3184 = vmatprep.subr.bf16.mxu1 %v8070_v26  ;;  %v8064_v23 = vld [vmem:[#allocation2 + $0x230] ss:$28 sps:$4 sm:$0xff]   ;;  %v8086_v26 = vld [vmem:[#allocation2 + $0x2a4] ss:$28 sps:$4 sm:$0xff]  }
  0xd3   :  { %2414 = vmatprep.subr.bf16.mxu0 %v8025_v25  ;;  %3185 = vmatpush1.bf16.msra.mxu1 %v8068_v28  ;;  %v8076_v25 = vld [vmem:[#allocation2 + $0x268] ss:$28 sps:$4 sm:$0xff]   ;;  %v8098_v28 = vld [vmem:[#allocation2 + $0x2dc] ss:$28 sps:$4 sm:$0xff]  }
  0xd4   :  { %3186 = vmatprep.subr.bf16.mxu1 %v8073_v30  ;;  %v8110_v30 = vld [vmem:[#allocation2 + $0x314] ss:$28 sps:$4 sm:$0xff]  }
  0xd6   :  { %2415 = vmatpush1.bf16.msra.mxu0 %v8023_v27  ;;  %v8088_v27 = vld [vmem:[#allocation2 + $0x2a0] ss:$28 sps:$4 sm:$0xff]  }
  0xd7   :  { %2416 = vmatprep.subr.bf16.mxu0 %v8031_v29  ;;  %3187 = vmatpush1.bf16.msra.mxu1 %v8071_v34  ;;  %v8100_v29 = vld [vmem:[#allocation2 + $0x2d8] ss:$28 sps:$4 sm:$0xff]   ;;  %v8136_v34 = vld [vmem:[#allocation2 + $0xc] ss:$28 sps:$4 sm:$0xff]  }
  0xd8   :  { %2274 = vmatmul.mubr.bf16.gmra.mrb[12].mxu0 %v8010_v31  ;;  %3046 = vmatmul.mubr.bf16.gmra.mrb[12].mxu1 %v8010_v31  ;;  %v8112_v31 = vld [vmem:[#allocation2 + $0x310] ss:$28 sps:$4 sm:$0xff]  }
  0xd9   :  { %2283 = vmatprep.mubr.bf16.mxu0 %v8014_v32  ;;  %3055 = vmatprep.mubr.bf16.mxu1 %v8014_v32  ;;  %v8122_v32 = vld [vmem:[#allocation2 + $0x34c] ss:$28 sps:$4 sm:$0xff]  }
  0xda   :  { %2417 = vmatpush1.bf16.msra.mxu0 %v8029_v33  ;;  %3188 = vmatprep.subr.bf16.mxu1 %v8082_v36  ;;  %v8124_v33 = vld [vmem:[#allocation2 + $0x348] ss:$28 sps:$4 sm:$0xff]   ;;  %v8137_v36 = vld [vmem:[#allocation5 + $0x400] ss:$16 sps:$4 sm:$0xff]  }
  0xdb   :  { %2418 = vmatprep.subr.bf16.mxu0 %v8037_v35  ;;  %3189 = vmatpush1.bf16.msra.mxu1 %v8080_v38  ;;  %v8134_v35 = vld [vmem:[#allocation2 + $0x8] ss:$28 sps:$4 sm:$0xff]  }
  0xdc   :  { %3190 = vmatprep.subr.bf16.mxu1 %v8085_v40  ;;  %v8145_v38 = vld [vmem:[#allocation5 + $0x424] ss:$16 sps:$4 sm:$0xff]   ;;  %v8143_v40 = vld [vmem:[#allocation5 + $0x420] ss:$16 sps:$4 sm:$0xff]  }
  0xde   :  { %2419 = vmatpush1.bf16.msra.mxu0 %v8035_v37  ;;  %v8140_v37 = vld [vmem:[#allocation2 + $0x44] ss:$28 sps:$4 sm:$0xff]  }
  0xdf   :  { %2420 = vmatprep.subr.bf16.mxu0 %v8043_v39  ;;  %3191 = vmatpush1.bf16.msra.mxu1 %v8083_v44  ;;  %v8188_v39 = vld [vmem:[#allocation5 + $0x408] ss:$16 sps:$4 sm:$0xff]  }
  0xe0   :  { %2284 = vmatmul.mubr.bf16.gmra.mrb[16].mxu0 %v8016_v41  ;;  %3056 = vmatmul.mubr.bf16.gmra.mrb[16].mxu1 %v8016_v41  ;;  %v8193_v41 = vld [vmem:[#allocation5 + $0x42c] ss:$16 sps:$4 sm:$0xff]   ;;  %v8191_v44 = vld [vmem:[#allocation5 + $0x428] ss:$16 sps:$4 sm:$0xff]  }
  0xe1   :  { %2293 = vmatprep.mubr.bf16.mxu0 %v8020_v42  ;;  %3065 = vmatprep.mubr.bf16.mxu1 %v8020_v42  ;;  %v8151_v42 = vld [vmem:[#allocation5 + $0x444] ss:$16 sps:$4 sm:$0xff]  }
  0xe2   :  { %2421 = vmatpush1.bf16.msra.mxu0 %v8041_v43  ;;  %3192 = vmatprep.subr.bf16.mxu1 %v8094_v46  ;;  %v8142_v43 = vld [vmem:[#allocation2 + $0x40] ss:$28 sps:$4 sm:$0xff]  }
  0xe3   :  { %2422 = vmatprep.subr.bf16.mxu0 %v8055_v45  ;;  %3193 = vmatpush1.bf16.msra.mxu1 %v8092_v48  ;;  %v8146_v45 = vld [vmem:[#allocation2 + $0x7c] ss:$28 sps:$4 sm:$0xff]   ;;  %v8149_v46 = vld [vmem:[#allocation5 + $0x440] ss:$16 sps:$4 sm:$0xff]   ;;  %v8157_v48 = vld [vmem:[#allocation5 + $0x464] ss:$16 sps:$4 sm:$0xff]  }
  0xe4   :  { %3194 = vmatprep.subr.bf16.mxu1 %v8097_v50  ;;  %v8155_v50 = vld [vmem:[#allocation5 + $0x460] ss:$16 sps:$4 sm:$0xff]  }
  0xe6   :  { %2423 = vmatpush1.bf16.msra.mxu0 %v8053_v47  ;;  %v8202_v47 = vld [vmem:[#allocation5 + $0x44c] ss:$16 sps:$4 sm:$0xff]  }
  0xe7   :  { %2424 = vmatprep.subr.bf16.mxu0 %v8067_v49  ;;  %3195 = vmatpush1.bf16.msra.mxu1 %v8095_v54  ;;  %v8200_v49 = vld [vmem:[#allocation5 + $0x448] ss:$16 sps:$4 sm:$0xff]  }
  0xe8   :  { %2294 = vmatmul.mubr.bf16.gmra.mrb[20].mxu0 %v8022_v51  ;;  %3066 = vmatmul.mubr.bf16.gmra.mrb[20].mxu1 %v8022_v51  ;;  %v8205_v51 = vld [vmem:[#allocation5 + $0x46c] ss:$16 sps:$4 sm:$0xff]   ;;  %v8148_v54 = vld [vmem:[#allocation2 + $0x78] ss:$28 sps:$4 sm:$0xff]  }
  0xe9   :  { %2303 = vmatprep.mubr.bf16.mxu0 %v8026_v52  ;;  %3075 = vmatprep.mubr.bf16.mxu1 %v8026_v52  ;;  %v8163_v52 = vld [vmem:[#allocation5 + $0x484] ss:$16 sps:$4 sm:$0xff]  }
  0xea   :  { %2425 = vmatpush1.bf16.msra.mxu0 %v8065_v53  ;;  %3196 = vmatprep.subr.bf16.mxu1 %v8106_v56  ;;  %v8203_v53 = vld [vmem:[#allocation5 + $0x468] ss:$16 sps:$4 sm:$0xff]   ;;  %v8161_v56 = vld [vmem:[#allocation5 + $0x480] ss:$16 sps:$4 sm:$0xff]  }
  0xeb   :  { %2426 = vmatprep.subr.bf16.mxu0 %v8079_v55  ;;  %3197 = vmatpush1.bf16.msra.mxu1 %v8104_v58  ;;  %v8152_v55 = vld [vmem:[#allocation2 + $0xb4] ss:$28 sps:$4 sm:$0xff]  }
  0xec   :  { %3198 = vmatprep.subr.bf16.mxu1 %v8109_v60  ;;  %v8169_v58 = vld [vmem:[#allocation5 + $0x4a4] ss:$16 sps:$4 sm:$0xff]   ;;  %v8167_v60 = vld [vmem:[#allocation5 + $0x4a0] ss:$16 sps:$4 sm:$0xff]  }
  0xee   :  { %2427 = vmatpush1.bf16.msra.mxu0 %v8077_v57  ;;  %v8214_v57 = vld [vmem:[#allocation5 + $0x48c] ss:$16 sps:$4 sm:$0xff]  }
  0xef   :  { %2428 = vmatprep.subr.bf16.mxu0 %v8091_v59  ;;  %3199 = vmatpush1.bf16.msra.mxu1 %v8107_v0  ;;  %v8212_v59 = vld [vmem:[#allocation5 + $0x488] ss:$16 sps:$4 sm:$0xff]   ;;  %v8154_v0 = vld [vmem:[#allocation2 + $0xb0] ss:$28 sps:$4 sm:$0xff]  }
  0xf0   :  { %2304 = vmatmul.mubr.bf16.gmra.mrb[24].mxu0 %v8028_v61  ;;  %3076 = vmatmul.mubr.bf16.gmra.mrb[24].mxu1 %v8028_v61  ;;  %v8217_v61 = vld [vmem:[#allocation5 + $0x4ac] ss:$16 sps:$4 sm:$0xff]  }
  0xf1   :  { %2313 = vmatprep.mubr.bf16.mxu0 %v8032_v62  ;;  %3085 = vmatprep.mubr.bf16.mxu1 %v8032_v62  ;;  %v8175_v62 = vld [vmem:[#allocation5 + $0x4c4] ss:$16 sps:$4 sm:$0xff]  }
  0xf2   :  { %2429 = vmatpush1.bf16.msra.mxu0 %v8089_v63  ;;  %3200 = vmatprep.subr.bf16.mxu1 %v8118_v2  ;;  %v8215_v63 = vld [vmem:[#allocation5 + $0x4a8] ss:$16 sps:$4 sm:$0xff]   ;;  %v8173_v2 = vld [vmem:[#allocation5 + $0x4c0] ss:$16 sps:$4 sm:$0xff]  }
  0xf3   :  { %2430 = vmatprep.subr.bf16.mxu0 %v8103_v1  ;;  %3201 = vmatpush1.bf16.msra.mxu1 %v8116_v4  ;;  %v8158_v1 = vld [vmem:[#allocation2 + $0xec] ss:$28 sps:$4 sm:$0xff]   ;;  %v8181_v4 = vld [vmem:[#allocation5 + $0x4e4] ss:$16 sps:$4 sm:$0xff]  }
  0xf4   :  { %3202 = vmatprep.subr.bf16.mxu1 %v8121_v6  ;;  %v8179_v6 = vld [vmem:[#allocation5 + $0x4e0] ss:$16 sps:$4 sm:$0xff]  }
  0xf6   :  { %2431 = vmatpush1.bf16.msra.mxu0 %v8101_v3  ;;  %v8226_v3 = vld [vmem:[#allocation5 + $0x4cc] ss:$16 sps:$4 sm:$0xff]  }
  0xf7   :  { %2432 = vmatprep.subr.bf16.mxu0 %v8115_v5  ;;  %3203 = vmatpush1.bf16.msra.mxu1 %v8119_v10  ;;  %v8224_v5 = vld [vmem:[#allocation5 + $0x4c8] ss:$16 sps:$4 sm:$0xff]  }
  0xf8   :  { %2314 = vmatmul.mubr.bf16.gmra.mrb[28].mxu0 %v8034_v7  ;;  %3086 = vmatmul.mubr.bf16.gmra.mrb[28].mxu1 %v8034_v7  ;;  %v8229_v7 = vld [vmem:[#allocation5 + $0x4ec] ss:$16 sps:$4 sm:$0xff]   ;;  %v8160_v10 = vld [vmem:[#allocation2 + $0xe8] ss:$28 sps:$4 sm:$0xff]  }
  0xf9   :  { %2323 = vmatprep.mubr.bf16.mxu0 %v8038_v8  ;;  %3095 = vmatprep.mubr.bf16.mxu1 %v8038_v8  ;;  %v8187_v8 = vld [vmem:[#allocation5 + $0x504] ss:$16 sps:$4 sm:$0xff]  }
  0xfa   :  { %2433 = vmatpush1.bf16.msra.mxu0 %v8113_v9  ;;  %3204 = vmatprep.subr.bf16.mxu1 %v8130_v12  ;;  %v8227_v9 = vld [vmem:[#allocation5 + $0x4e8] ss:$16 sps:$4 sm:$0xff]   ;;  %v8185_v12 = vld [vmem:[#allocation5 + $0x500] ss:$16 sps:$4 sm:$0xff]  }
  0xfb   :  { %2434 = vmatprep.subr.bf16.mxu0 %v8127_v11  ;;  %3205 = vmatpush1.bf16.msra.mxu1 %v8128_v14  ;;  %v8164_v11 = vld [vmem:[#allocation2 + $0x124] ss:$28 sps:$4 sm:$0xff]  }
  0xfc   :  { %3206 = vmatprep.subr.bf16.mxu1 %v8133_v15  ;;  %v8199_v14 = vld [vmem:[#allocation5 + $0x524] ss:$16 sps:$4 sm:$0xff]   ;;  %v8236_v15 = vld [vmem:[#allocation5 + $0x508] ss:$16 sps:$4 sm:$0xff]  }
  0xfe   :  { %2435 = vmatpush1.bf16.msra.mxu0 %v8125_v13  ;;  %v8238_v13 = vld [vmem:[#allocation5 + $0x50c] ss:$16 sps:$4 sm:$0xff]  }
  0xff   :  { %2597 = vmatprep.subr.bf16.mxu0 %v8139_v16  ;;  %3207 = vmatpush1.bf16.msra.mxu1 %v8131_v19  ;;  %v8197_v16 = vld [vmem:[#allocation5 + $0x520] ss:$16 sps:$4 sm:$0xff]   ;;  %v8239_v19 = vld [vmem:[#allocation5 + $0x528] ss:$16 sps:$4 sm:$0xff]  }
 0x100   :  { %2324 = vmatmul.mubr.bf16.gmra.mrb[32].mxu0 %v8040_v17  ;;  %3096 = vmatmul.mubr.bf16.gmra.mrb[32].mxu1 %v8040_v17  ;;  %v8241_v17 = vld [vmem:[#allocation5 + $0x52c] ss:$16 sps:$4 sm:$0xff]  }
 0x101   :  { %2333 = vmatprep.mubr.bf16.mxu0 %v8050_v18  ;;  %3105 = vmatprep.mubr.bf16.mxu1 %v8050_v18  ;;  %v8211_v18 = vld [vmem:[#allocation5 + $0x544] ss:$16 sps:$4 sm:$0xff]  }
 0x102   :  { %3369 = vmatprep.subr.bf16.mxu1 %v8190_v20  ;;  %v8166_v20 = vld [vmem:[#allocation2 + $0x120] ss:$28 sps:$4 sm:$0xff]  }
 0x108   :  { %2334 = vmatmul.mubr.bf16.gmra.mrb[36].mxu0 %v8052_v21  ;;  %3106 = vmatmul.mubr.bf16.gmra.mrb[36].mxu1 %v8052_v21  ;;  %v8170_v21 = vld [vmem:[#allocation2 + $0x15c] ss:$28 sps:$4 sm:$0xff]  }
 0x109   :  { %2343 = vmatprep.mubr.bf16.mxu0 %v8062_v22  ;;  %3115 = vmatprep.mubr.bf16.mxu1 %v8062_v22  ;;  %v8209_v22 = vld [vmem:[#allocation5 + $0x540] ss:$16 sps:$4 sm:$0xff]  }
 0x110   :  { %2344 = vmatmul.mubr.bf16.gmra.mrb[40].mxu0 %v8064_v23  ;;  %3116 = vmatmul.mubr.bf16.gmra.mrb[40].mxu1 %v8064_v23  ;;  %v8250_v23 = vld [vmem:[#allocation5 + $0x54c] ss:$16 sps:$4 sm:$0xff]  }
 0x111   :  { %2353 = vmatprep.mubr.bf16.mxu0 %v8074_v24  ;;  %3125 = vmatprep.mubr.bf16.mxu1 %v8074_v24  ;;  %v8223_v24 = vld [vmem:[#allocation5 + $0x564] ss:$16 sps:$4 sm:$0xff]  }
 0x118   :  { %2354 = vmatmul.mubr.bf16.gmra.mrb[44].mxu0 %v8076_v25  ;;  %3126 = vmatmul.mubr.bf16.gmra.mrb[44].mxu1 %v8076_v25  ;;  %v8248_v25 = vld [vmem:[#allocation5 + $0x548] ss:$16 sps:$4 sm:$0xff]  }
 0x119   :  { %2363 = vmatprep.mubr.bf16.mxu0 %v8086_v26  ;;  %3135 = vmatprep.mubr.bf16.mxu1 %v8086_v26  ;;  %v8221_v26 = vld [vmem:[#allocation5 + $0x560] ss:$16 sps:$4 sm:$0xff]  }
 0x120   :  { %2364 = vmatmul.mubr.bf16.gmra.mrb[48].mxu0 %v8088_v27  ;;  %3136 = vmatmul.mubr.bf16.gmra.mrb[48].mxu1 %v8088_v27  ;;  %v8253_v27 = vld [vmem:[#allocation5 + $0x56c] ss:$16 sps:$4 sm:$0xff]  }
 0x121   :  { %2373 = vmatprep.mubr.bf16.mxu0 %v8098_v28  ;;  %3145 = vmatprep.mubr.bf16.mxu1 %v8098_v28  ;;  %v8235_v28 = vld [vmem:[#allocation5 + $0x584] ss:$16 sps:$4 sm:$0xff]  }
 0x128   :  { %2374 = vmatmul.mubr.bf16.gmra.mrb[52].mxu0 %v8100_v29  ;;  %3146 = vmatmul.mubr.bf16.gmra.mrb[52].mxu1 %v8100_v29  ;;  %v8251_v29 = vld [vmem:[#allocation5 + $0x568] ss:$16 sps:$4 sm:$0xff]  }
 0x129   :  { %2383 = vmatprep.mubr.bf16.mxu0 %v8110_v30  ;;  %3155 = vmatprep.mubr.bf16.mxu1 %v8110_v30  ;;  %v8172_v30 = vld [vmem:[#allocation2 + $0x158] ss:$28 sps:$4 sm:$0xff]  }
 0x130   :  { %2384 = vmatmul.mubr.bf16.gmra.mrb[56].mxu0 %v8112_v31  ;;  %3156 = vmatmul.mubr.bf16.gmra.mrb[56].mxu1 %v8112_v31  ;;  %v8176_v31 = vld [vmem:[#allocation2 + $0x194] ss:$28 sps:$4 sm:$0xff]  }
 0x131   :  { %2393 = vmatprep.mubr.bf16.mxu0 %v8122_v32  ;;  %3165 = vmatprep.mubr.bf16.mxu1 %v8122_v32  ;;  %v8233_v32 = vld [vmem:[#allocation5 + $0x580] ss:$16 sps:$4 sm:$0xff]  }
 0x138   :  { %2394 = vmatmul.mubr.bf16.gmra.mrb[60].mxu0 %v8124_v33  ;;  %3166 = vmatmul.mubr.bf16.gmra.mrb[60].mxu1 %v8124_v33  ;;  %v8262_v33 = vld [vmem:[#allocation5 + $0x58c] ss:$16 sps:$4 sm:$0xff]  }
 0x139   :  { %2436 = vmatprep.mubr.bf16.mxu0 %v8136_v34  ;;  %3208 = vmatprep.mubr.bf16.mxu1 %v8136_v34  ;;  %v8247_v34 = vld [vmem:[#allocation5 + $0x5a4] ss:$16 sps:$4 sm:$0xff]  }
 0x140   :  { %2437 = vmatmul.mubr.bf16.vlgmr.msra.gmra.mrb[0].mxu0 %v8134_v35  ;;  %3209 = vmatmul.mubr.bf16.vlgmr.msra.gmra.mrb[0].mxu1 %v8134_v35  ;;  %v8260_v35 = vld [vmem:[#allocation5 + $0x588] ss:$16 sps:$4 sm:$0xff]  }
 0x141   :  { %2598 = vmatpush1.bf16.msra.mxu0 %v8137_v36  ;;  %2446 = vmatprep.mubr.bf16.mxu0 %v8140_v37  ;;  %v8245_v36 = vld [vmem:[#allocation5 + $0x5a0] ss:$16 sps:$4 sm:$0xff]  }
 0x142   :  { %3218 = vmatprep.mubr.bf16.mxu1 %v8140_v37  ;;  %2599 = vmatprep.subr.bf16.mxu0 %v8145_v38  ;;  %v8265_v37 = vld [vmem:[#allocation5 + $0x5ac] ss:$16 sps:$4 sm:$0xff]   ;;  %v8259_v38 = vld [vmem:[#allocation5 + $0x5c4] ss:$16 sps:$4 sm:$0xff]  }
 0x143   :  { %3370 = vmatpush1.bf16.msra.mxu1 %v8188_v39  ;;  %v8263_v39 = vld [vmem:[#allocation5 + $0x5a8] ss:$16 sps:$4 sm:$0xff]  }
 0x144   :  { %3371 = vmatprep.subr.bf16.mxu1 %v8193_v41  ;;  %v8182_v41 = vld [vmem:[#allocation2 + $0x1cc] ss:$28 sps:$4 sm:$0xff]  }
 0x145   :  { %2600 = vmatpush1.bf16.msra.mxu0 %v8143_v40  ;;  %v8178_v40 = vld [vmem:[#allocation2 + $0x190] ss:$28 sps:$4 sm:$0xff]  }
 0x146   :  { %2601 = vmatprep.subr.bf16.mxu0 %v8151_v42  ;;  %v8257_v42 = vld [vmem:[#allocation5 + $0x5c0] ss:$16 sps:$4 sm:$0xff]  }
 0x147   :  { %3372 = vmatpush1.bf16.msra.mxu1 %v8191_v44  ;;  %v8271_v44 = vld [vmem:[#allocation5 + $0x5e4] ss:$16 sps:$4 sm:$0xff]  }
 0x148   :  { %2447 = vmatmul.mubr.bf16.gmra.mrb[4].mxu0 %v8142_v43  ;;  %3219 = vmatmul.mubr.bf16.gmra.mrb[4].mxu1 %v8142_v43  ;;  %v8274_v43 = vld [vmem:[#allocation5 + $0x5cc] ss:$16 sps:$4 sm:$0xff]  }
 0x149   :  { %2456 = vmatprep.mubr.bf16.mxu0 %v8146_v45  ;;  %3228 = vmatprep.mubr.bf16.mxu1 %v8146_v45  ;;  %v8272_v45 = vld [vmem:[#allocation5 + $0x5c8] ss:$16 sps:$4 sm:$0xff]  }
 0x14a   :  { %2602 = vmatpush1.bf16.msra.mxu0 %v8149_v46  ;;  %3373 = vmatprep.subr.bf16.mxu1 %v8202_v47  ;;  %v8269_v46 = vld [vmem:[#allocation5 + $0x5e0] ss:$16 sps:$4 sm:$0xff]   ;;  %v8277_v47 = vld [vmem:[#allocation5 + $0x5ec] ss:$16 sps:$4 sm:$0xff]  }
 0x14b   :  { %2603 = vmatprep.subr.bf16.mxu0 %v8157_v48  ;;  %3374 = vmatpush1.bf16.msra.mxu1 %v8200_v49  ;;  %v8275_v48 = vld [vmem:[#allocation5 + $0x5e8] ss:$16 sps:$4 sm:$0xff]   ;;  %v8283_v49 = vld [vmem:[#allocation5 + $0x604] ss:$16 sps:$4 sm:$0xff]  }
 0x14c   :  { %3375 = vmatprep.subr.bf16.mxu1 %v8205_v51  ;;  %v8194_v51 = vld [vmem:[#allocation2 + $0x204] ss:$28 sps:$4 sm:$0xff]  }
 0x14e   :  { %2604 = vmatpush1.bf16.msra.mxu0 %v8155_v50  ;;  %v8184_v50 = vld [vmem:[#allocation2 + $0x1c8] ss:$28 sps:$4 sm:$0xff]  }
 0x14f   :  { %2605 = vmatprep.subr.bf16.mxu0 %v8163_v52  ;;  %3376 = vmatpush1.bf16.msra.mxu1 %v8203_v53  ;;  %v8196_v52 = vld [vmem:[#allocation2 + $0x200] ss:$28 sps:$4 sm:$0xff]  }
 0x150   :  { %2457 = vmatmul.mubr.bf16.gmra.mrb[8].mxu0 %v8148_v54  ;;  %3229 = vmatmul.mubr.bf16.gmra.mrb[8].mxu1 %v8148_v54  ;;  %v8206_v53 = vld [vmem:[#allocation2 + $0x23c] ss:$28 sps:$4 sm:$0xff]  }
 0x151   :  { %2466 = vmatprep.mubr.bf16.mxu0 %v8152_v55  ;;  %3238 = vmatprep.mubr.bf16.mxu1 %v8152_v55  ;;  %v8208_v54 = vld [vmem:[#allocation2 + $0x238] ss:$28 sps:$4 sm:$0xff]  }
 0x152   :  { %2606 = vmatpush1.bf16.msra.mxu0 %v8161_v56  ;;  %3377 = vmatprep.subr.bf16.mxu1 %v8214_v57  ;;  %v8218_v55 = vld [vmem:[#allocation2 + $0x274] ss:$28 sps:$4 sm:$0xff]   ;;  %v8230_v57 = vld [vmem:[#allocation2 + $0x2ac] ss:$28 sps:$4 sm:$0xff]  }
 0x153   :  { %2607 = vmatprep.subr.bf16.mxu0 %v8169_v58  ;;  %3378 = vmatpush1.bf16.msra.mxu1 %v8212_v59  ;;  %v8220_v56 = vld [vmem:[#allocation2 + $0x270] ss:$28 sps:$4 sm:$0xff]   ;;  %v8232_v58 = vld [vmem:[#allocation2 + $0x2a8] ss:$28 sps:$4 sm:$0xff]  }
 0x154   :  { %3379 = vmatprep.subr.bf16.mxu1 %v8217_v61  ;;  %v8242_v59 = vld [vmem:[#allocation2 + $0x2e4] ss:$28 sps:$4 sm:$0xff]  }
 0x155   :  { %v8244_v61 = vld [vmem:[#allocation2 + $0x2e0] ss:$28 sps:$4 sm:$0xff]  }
 0x156   :  { %2608 = vmatpush1.bf16.msra.mxu0 %v8167_v60  ;;  %v8340_v60 = vld [vmem:[#allocation5 + $0x60c] ss:$16 sps:$4 sm:$0xff]  }
 0x157   :  { %2609 = vmatprep.subr.bf16.mxu0 %v8175_v62  ;;  %3380 = vmatpush1.bf16.msra.mxu1 %v8215_v63  ;;  %v8254_v62 = vld [vmem:[#allocation2 + $0x31c] ss:$28 sps:$4 sm:$0xff]  }
 0x158   :  { %2467 = vmatmul.mubr.bf16.gmra.mrb[12].mxu0 %v8154_v0  ;;  %3239 = vmatmul.mubr.bf16.gmra.mrb[12].mxu1 %v8154_v0  ;;  %v8256_v63 = vld [vmem:[#allocation2 + $0x318] ss:$28 sps:$4 sm:$0xff]  }
 0x159   :  { %2476 = vmatprep.mubr.bf16.mxu0 %v8158_v1  ;;  %3248 = vmatprep.mubr.bf16.mxu1 %v8158_v1  ;;  %v8266_v0 = vld [vmem:[#allocation2 + $0x354] ss:$28 sps:$4 sm:$0xff]  }
 0x15a   :  { %2610 = vmatpush1.bf16.msra.mxu0 %v8173_v2  ;;  %3381 = vmatprep.subr.bf16.mxu1 %v8226_v3  ;;  %v8268_v1 = vld [vmem:[#allocation2 + $0x350] ss:$28 sps:$4 sm:$0xff]  }
 0x15b   :  { %2611 = vmatprep.subr.bf16.mxu0 %v8181_v4  ;;  %3382 = vmatpush1.bf16.msra.mxu1 %v8224_v5  ;;  %v8280_v2 = vld [vmem:[#allocation2 + $0x14] ss:$28 sps:$4 sm:$0xff]   ;;  %v8284_v5 = vld [vmem:[#allocation2 + $0x4c] ss:$28 sps:$4 sm:$0xff]  }
 0x15c   :  { %3383 = vmatprep.subr.bf16.mxu1 %v8229_v7  ;;  %v8278_v3 = vld [vmem:[#allocation2 + $0x10] ss:$28 sps:$4 sm:$0xff]   ;;  %v8338_v7 = vld [vmem:[#allocation5 + $0x608] ss:$16 sps:$4 sm:$0xff]  }
 0x15d   :  { %v8281_v4 = vld [vmem:[#allocation5 + $0x600] ss:$16 sps:$4 sm:$0xff]  }
 0x15e   :  { %2612 = vmatpush1.bf16.msra.mxu0 %v8179_v6  ;;  %v8292_v6 = vld [vmem:[#allocation5 + $0x624] ss:$16 sps:$4 sm:$0xff]  }
 0x15f   :  { %2613 = vmatprep.subr.bf16.mxu0 %v8187_v8  ;;  %3384 = vmatpush1.bf16.msra.mxu1 %v8227_v9  ;;  %v8343_v8 = vld [vmem:[#allocation5 + $0x62c] ss:$16 sps:$4 sm:$0xff]   ;;  %v8290_v9 = vld [vmem:[#allocation5 + $0x620] ss:$16 sps:$4 sm:$0xff]  }
 0x160   :  { %2477 = vmatmul.mubr.bf16.gmra.mrb[16].mxu0 %v8160_v10  ;;  %3249 = vmatmul.mubr.bf16.gmra.mrb[16].mxu1 %v8160_v10  ;;  %v8301_v10 = vld [vmem:[#allocation5 + $0x644] ss:$16 sps:$4 sm:$0xff]  }
 0x161   :  { %2486 = vmatprep.mubr.bf16.mxu0 %v8164_v11  ;;  %3258 = vmatprep.mubr.bf16.mxu1 %v8164_v11  ;;  %v8341_v11 = vld [vmem:[#allocation5 + $0x628] ss:$16 sps:$4 sm:$0xff]  }
 0x162   :  { %2614 = vmatpush1.bf16.msra.mxu0 %v8185_v12  ;;  %3385 = vmatprep.subr.bf16.mxu1 %v8238_v13  ;;  %v8286_v12 = vld [vmem:[#allocation2 + $0x48] ss:$28 sps:$4 sm:$0xff]  }
 0x163   :  { %2615 = vmatprep.subr.bf16.mxu0 %v8199_v14  ;;  %3386 = vmatpush1.bf16.msra.mxu1 %v8236_v15  ;;  %v8287_v13 = vld [vmem:[#allocation2 + $0x84] ss:$28 sps:$4 sm:$0xff]   ;;  %v8349_v15 = vld [vmem:[#allocation5 + $0x64c] ss:$16 sps:$4 sm:$0xff]  }
 0x164   :  { %3387 = vmatprep.subr.bf16.mxu1 %v8241_v17  ;;  %v8299_v14 = vld [vmem:[#allocation5 + $0x640] ss:$16 sps:$4 sm:$0xff]   ;;  %v8347_v17 = vld [vmem:[#allocation5 + $0x648] ss:$16 sps:$4 sm:$0xff]  }
 0x166   :  { %2616 = vmatpush1.bf16.msra.mxu0 %v8197_v16  ;;  %v8310_v16 = vld [vmem:[#allocation5 + $0x664] ss:$16 sps:$4 sm:$0xff]  }
 0x167   :  { %2617 = vmatprep.subr.bf16.mxu0 %v8211_v18  ;;  %3388 = vmatpush1.bf16.msra.mxu1 %v8239_v19  ;;  %v8352_v18 = vld [vmem:[#allocation5 + $0x66c] ss:$16 sps:$4 sm:$0xff]   ;;  %v8308_v19 = vld [vmem:[#allocation5 + $0x660] ss:$16 sps:$4 sm:$0xff]  }
 0x168   :  { %2487 = vmatmul.mubr.bf16.gmra.mrb[20].mxu0 %v8166_v20  ;;  %3259 = vmatmul.mubr.bf16.gmra.mrb[20].mxu1 %v8166_v20  ;;  %v8319_v20 = vld [vmem:[#allocation5 + $0x684] ss:$16 sps:$4 sm:$0xff]  }
 0x169   :  { %2496 = vmatprep.mubr.bf16.mxu0 %v8170_v21  ;;  %3268 = vmatprep.mubr.bf16.mxu1 %v8170_v21  ;;  %v8350_v21 = vld [vmem:[#allocation5 + $0x668] ss:$16 sps:$4 sm:$0xff]  }
 0x16a   :  { %2618 = vmatpush1.bf16.msra.mxu0 %v8209_v22  ;;  %3389 = vmatprep.subr.bf16.mxu1 %v8250_v23  ;;  %v8289_v22 = vld [vmem:[#allocation2 + $0x80] ss:$28 sps:$4 sm:$0xff]  }
 0x16b   :  { %2619 = vmatprep.subr.bf16.mxu0 %v8223_v24  ;;  %3390 = vmatpush1.bf16.msra.mxu1 %v8248_v25  ;;  %v8293_v23 = vld [vmem:[#allocation2 + $0xbc] ss:$28 sps:$4 sm:$0xff]   ;;  %v8317_v24 = vld [vmem:[#allocation5 + $0x680] ss:$16 sps:$4 sm:$0xff]  }
 0x16c   :  { %3391 = vmatprep.subr.bf16.mxu1 %v8253_v27  ;;  %v8361_v25 = vld [vmem:[#allocation5 + $0x68c] ss:$16 sps:$4 sm:$0xff]   ;;  %v8359_v27 = vld [vmem:[#allocation5 + $0x688] ss:$16 sps:$4 sm:$0xff]  }
 0x16e   :  { %2620 = vmatpush1.bf16.msra.mxu0 %v8221_v26  ;;  %v8328_v26 = vld [vmem:[#allocation5 + $0x6a4] ss:$16 sps:$4 sm:$0xff]  }
 0x16f   :  { %2621 = vmatprep.subr.bf16.mxu0 %v8235_v28  ;;  %3392 = vmatpush1.bf16.msra.mxu1 %v8251_v29  ;;  %v8364_v28 = vld [vmem:[#allocation5 + $0x6ac] ss:$16 sps:$4 sm:$0xff]   ;;  %v8326_v29 = vld [vmem:[#allocation5 + $0x6a0] ss:$16 sps:$4 sm:$0xff]  }
 0x170   :  { %2497 = vmatmul.mubr.bf16.gmra.mrb[24].mxu0 %v8172_v30  ;;  %3269 = vmatmul.mubr.bf16.gmra.mrb[24].mxu1 %v8172_v30  ;;  %v8337_v30 = vld [vmem:[#allocation5 + $0x6c4] ss:$16 sps:$4 sm:$0xff]  }
 0x171   :  { %2506 = vmatprep.mubr.bf16.mxu0 %v8176_v31  ;;  %3278 = vmatprep.mubr.bf16.mxu1 %v8176_v31  ;;  %v8362_v31 = vld [vmem:[#allocation5 + $0x6a8] ss:$16 sps:$4 sm:$0xff]  }
 0x172   :  { %2622 = vmatpush1.bf16.msra.mxu0 %v8233_v32  ;;  %3393 = vmatprep.subr.bf16.mxu1 %v8262_v33  ;;  %v8295_v32 = vld [vmem:[#allocation2 + $0xb8] ss:$28 sps:$4 sm:$0xff]  }
 0x173   :  { %2623 = vmatprep.subr.bf16.mxu0 %v8247_v34  ;;  %3394 = vmatpush1.bf16.msra.mxu1 %v8260_v35  ;;  %v8296_v33 = vld [vmem:[#allocation2 + $0xf4] ss:$28 sps:$4 sm:$0xff]   ;;  %v8370_v35 = vld [vmem:[#allocation5 + $0x6cc] ss:$16 sps:$4 sm:$0xff]  }
 0x174   :  { %3395 = vmatprep.subr.bf16.mxu1 %v8265_v37  ;;  %v8335_v34 = vld [vmem:[#allocation5 + $0x6c0] ss:$16 sps:$4 sm:$0xff]   ;;  %v8368_v37 = vld [vmem:[#allocation5 + $0x6c8] ss:$16 sps:$4 sm:$0xff]  }
 0x176   :  { %2624 = vmatpush1.bf16.msra.mxu0 %v8245_v36  ;;  %v8358_v36 = vld [vmem:[#allocation5 + $0x6e4] ss:$16 sps:$4 sm:$0xff]  }
 0x177   :  { %2625 = vmatprep.subr.bf16.mxu0 %v8259_v38  ;;  %3396 = vmatpush1.bf16.msra.mxu1 %v8263_v39  ;;  %v8373_v38 = vld [vmem:[#allocation5 + $0x6ec] ss:$16 sps:$4 sm:$0xff]   ;;  %v8356_v39 = vld [vmem:[#allocation5 + $0x6e0] ss:$16 sps:$4 sm:$0xff]  }
 0x178   :  { %2507 = vmatmul.mubr.bf16.gmra.mrb[28].mxu0 %v8178_v40  ;;  %3279 = vmatmul.mubr.bf16.gmra.mrb[28].mxu1 %v8178_v40  ;;  %v8371_v40 = vld [vmem:[#allocation5 + $0x6e8] ss:$16 sps:$4 sm:$0xff]  }
 0x179   :  { %2516 = vmatprep.mubr.bf16.mxu0 %v8182_v41  ;;  %3288 = vmatprep.mubr.bf16.mxu1 %v8182_v41  ;;  %v8298_v41 = vld [vmem:[#allocation2 + $0xf0] ss:$28 sps:$4 sm:$0xff]  }
 0x17a   :  { %2626 = vmatpush1.bf16.msra.mxu0 %v8257_v42  ;;  %3397 = vmatprep.subr.bf16.mxu1 %v8274_v43  ;;  %v8302_v42 = vld [vmem:[#allocation2 + $0x12c] ss:$28 sps:$4 sm:$0xff]  }
 0x17b   :  { %2627 = vmatprep.subr.bf16.mxu0 %v8271_v44  ;;  %3398 = vmatpush1.bf16.msra.mxu1 %v8272_v45  ;;  %v8304_v43 = vld [vmem:[#allocation2 + $0x128] ss:$28 sps:$4 sm:$0xff]   ;;  %v8307_v45 = vld [vmem:[#allocation2 + $0x160] ss:$28 sps:$4 sm:$0xff]  }
 0x17c   :  { %3399 = vmatprep.subr.bf16.mxu1 %v8277_v47  ;;  %v8305_v44 = vld [vmem:[#allocation2 + $0x164] ss:$28 sps:$4 sm:$0xff]   ;;  %v8313_v47 = vld [vmem:[#allocation2 + $0x198] ss:$28 sps:$4 sm:$0xff]  }
 0x17e   :  { %2628 = vmatpush1.bf16.msra.mxu0 %v8269_v46  ;;  %v8311_v46 = vld [vmem:[#allocation2 + $0x19c] ss:$28 sps:$4 sm:$0xff]  }
 0x17f   :  { %3400 = vmatpush1.bf16.msra.mxu1 %v8275_v48  ;;  %2790 = vmatprep.subr.bf16.mxu0 %v8283_v49  ;;  %v8314_v48 = vld [vmem:[#allocation2 + $0x1d4] ss:$28 sps:$4 sm:$0xff]  }
 0x180   :  { %2517 = vmatmul.mubr.bf16.gmra.mrb[32].mxu0 %v8184_v50  ;;  %3289 = vmatmul.mubr.bf16.gmra.mrb[32].mxu1 %v8184_v50  ;;  %v8316_v49 = vld [vmem:[#allocation2 + $0x1d0] ss:$28 sps:$4 sm:$0xff]  }
 0x181   :  { %2526 = vmatprep.mubr.bf16.mxu0 %v8194_v51  ;;  %3298 = vmatprep.mubr.bf16.mxu1 %v8194_v51  ;;  %v8320_v50 = vld [vmem:[#allocation2 + $0x20c] ss:$28 sps:$4 sm:$0xff]  }
 0x182   :  { %3562 = vmatprep.subr.bf16.mxu1 %v8340_v60  ;;  %v8322_v51 = vld [vmem:[#allocation2 + $0x208] ss:$28 sps:$4 sm:$0xff]  }
 0x183   :  { %v8346_v60 = vld [vmem:[#allocation2 + $0x2e8] ss:$28 sps:$4 sm:$0xff]  }
 0x188   :  { %2527 = vmatmul.mubr.bf16.gmra.mrb[36].mxu0 %v8196_v52  ;;  %3299 = vmatmul.mubr.bf16.gmra.mrb[36].mxu1 %v8196_v52  ;;  %v8323_v52 = vld [vmem:[#allocation2 + $0x244] ss:$28 sps:$4 sm:$0xff]  }
 0x189   :  { %2536 = vmatprep.mubr.bf16.mxu0 %v8206_v53  ;;  %3308 = vmatprep.mubr.bf16.mxu1 %v8206_v53  ;;  %v8325_v53 = vld [vmem:[#allocation2 + $0x240] ss:$28 sps:$4 sm:$0xff]  }
 0x190   :  { %2537 = vmatmul.mubr.bf16.gmra.mrb[40].mxu0 %v8208_v54  ;;  %3309 = vmatmul.mubr.bf16.gmra.mrb[40].mxu1 %v8208_v54  ;;  %v8329_v54 = vld [vmem:[#allocation2 + $0x27c] ss:$28 sps:$4 sm:$0xff]  }
 0x191   :  { %2546 = vmatprep.mubr.bf16.mxu0 %v8218_v55  ;;  %3318 = vmatprep.mubr.bf16.mxu1 %v8218_v55  ;;  %v8331_v55 = vld [vmem:[#allocation2 + $0x278] ss:$28 sps:$4 sm:$0xff]  }
 0x198   :  { %2547 = vmatmul.mubr.bf16.gmra.mrb[44].mxu0 %v8220_v56  ;;  %3319 = vmatmul.mubr.bf16.gmra.mrb[44].mxu1 %v8220_v56  ;;  %v8332_v56 = vld [vmem:[#allocation2 + $0x2b4] ss:$28 sps:$4 sm:$0xff]  }
 0x199   :  { %2556 = vmatprep.mubr.bf16.mxu0 %v8230_v57  ;;  %3328 = vmatprep.mubr.bf16.mxu1 %v8230_v57  ;;  %v8388_v57 = vld [vmem:[#allocation7 + $0x4] ss:$8 sps:$4 sm:$0xff]  }
 0x1a0   :  { %2557 = vmatmul.mubr.bf16.gmra.mrb[48].mxu0 %v8232_v58  ;;  %3329 = vmatmul.mubr.bf16.gmra.mrb[48].mxu1 %v8232_v58  ;;  %v8334_v58 = vld [vmem:[#allocation2 + $0x2b0] ss:$28 sps:$4 sm:$0xff]  }
 0x1a1   :  { %2566 = vmatprep.mubr.bf16.mxu0 %v8242_v59  ;;  %3338 = vmatprep.mubr.bf16.mxu1 %v8242_v59  ;;  %v8344_v59 = vld [vmem:[#allocation2 + $0x2ec] ss:$28 sps:$4 sm:$0xff]  }
 0x1a8   :  { %2567 = vmatmul.mubr.bf16.gmra.mrb[52].mxu0 %v8244_v61  ;;  %3339 = vmatmul.mubr.bf16.gmra.mrb[52].mxu1 %v8244_v61  ;;  %v8353_v61 = vld [vmem:[#allocation2 + $0x324] ss:$28 sps:$4 sm:$0xff]  }
 0x1a9   :  { %2576 = vmatprep.mubr.bf16.mxu0 %v8254_v62  ;;  %3348 = vmatprep.mubr.bf16.mxu1 %v8254_v62  ;;  %v8355_v62 = vld [vmem:[#allocation2 + $0x320] ss:$28 sps:$4 sm:$0xff]  }
 0x1b0   :  { %2577 = vmatmul.mubr.bf16.gmra.mrb[56].mxu0 %v8256_v63  ;;  %3349 = vmatmul.mubr.bf16.gmra.mrb[56].mxu1 %v8256_v63  ;;  %v8365_v63 = vld [vmem:[#allocation2 + $0x35c] ss:$28 sps:$4 sm:$0xff]  }
 0x1b1   :  { %2586 = vmatprep.mubr.bf16.mxu0 %v8266_v0  ;;  %3358 = vmatprep.mubr.bf16.mxu1 %v8266_v0  ;;  %v8367_v0 = vld [vmem:[#allocation2 + $0x358] ss:$28 sps:$4 sm:$0xff]  }
 0x1b8   :  { %2587 = vmatmul.mubr.bf16.gmra.mrb[60].mxu0 %v8268_v1  ;;  %3359 = vmatmul.mubr.bf16.gmra.mrb[60].mxu1 %v8268_v1  ;;  %v8895_v1 = vmov 0  }
 0x1b9   :  { %2629 = vmatprep.mubr.bf16.mxu0 %v8280_v2  ;;  %3401 = vmatprep.mubr.bf16.mxu1 %v8280_v2  ;;  %v8374_v2 = vld [vmem:[#allocation2 + $0x18] ss:$28 sps:$4 sm:$0xff]  }
 0x1c0   :  { %2630 = vmatmul.mubr.bf16.vlgmr.msra.gmra.mrb[0].mxu0 %v8278_v3  ;;  %3402 = vmatmul.mubr.bf16.vlgmr.msra.gmra.mrb[0].mxu1 %v8278_v3  ;;  %v8386_v3 = vld [vmem:[#allocation7] ss:$8 sps:$4 sm:$0xff]  }
 0x1c1   :  { %2791 = vmatpush1.bf16.msra.mxu0 %v8281_v4  ;;  %2639 = vmatprep.mubr.bf16.mxu0 %v8284_v5  ;;  %v8392_v4 = vld [vmem:[#allocation7 + $0x14] ss:$8 sps:$4 sm:$0xff]  }
 0x1c2   :  { %3411 = vmatprep.mubr.bf16.mxu1 %v8284_v5  ;;  %2792 = vmatprep.subr.bf16.mxu0 %v8292_v6  ;;  %v8390_v5 = vld [vmem:[#allocation7 + $0x10] ss:$8 sps:$4 sm:$0xff]   ;;  %v8396_v6 = vld [vmem:[#allocation7 + $0x24] ss:$8 sps:$4 sm:$0xff]  }
 0x1c3   :  { %3563 = vmatpush1.bf16.msra.mxu1 %v8338_v7  ;;  %v8375_v7 = vld [vmem:[#allocation2 + $0x50] ss:$28 sps:$4 sm:$0xff]  }
 0x1c4   :  { %3564 = vmatprep.subr.bf16.mxu1 %v8343_v8  ;;  %v8394_v8 = vld [vmem:[#allocation7 + $0x20] ss:$8 sps:$4 sm:$0xff]  }
 0x1c5   :  { %2793 = vmatpush1.bf16.msra.mxu0 %v8290_v9  ;;  %v8400_v9 = vld [vmem:[#allocation7 + $0x34] ss:$8 sps:$4 sm:$0xff]  }
 0x1c6   :  { %2794 = vmatprep.subr.bf16.mxu0 %v8301_v10  ;;  %v8398_v10 = vld [vmem:[#allocation7 + $0x30] ss:$8 sps:$4 sm:$0xff]  }
 0x1c7   :  { %3565 = vmatpush1.bf16.msra.mxu1 %v8341_v11  ;;  %v8404_v11 = vld [vmem:[#allocation7 + $0x44] ss:$8 sps:$4 sm:$0xff]  }
 0x1c8   :  { %2640 = vmatmul.mubr.bf16.gmra.mrb[4].mxu0 %v8286_v12  ;;  %3412 = vmatmul.mubr.bf16.gmra.mrb[4].mxu1 %v8286_v12  ;;  %v8376_v12 = vld [vmem:[#allocation2 + $0x88] ss:$28 sps:$4 sm:$0xff]  }
 0x1c9   :  { %2649 = vmatprep.mubr.bf16.mxu0 %v8287_v13  ;;  %3421 = vmatprep.mubr.bf16.mxu1 %v8287_v13  ;;  %v8402_v13 = vld [vmem:[#allocation7 + $0x40] ss:$8 sps:$4 sm:$0xff]  }
 0x1ca   :  { %2795 = vmatpush1.bf16.msra.mxu0 %v8299_v14  ;;  %3566 = vmatprep.subr.bf16.mxu1 %v8349_v15  ;;  %v8407_v14 = vld [vmem:[#allocation7 + $0x54] ss:$8 sps:$4 sm:$0xff]   ;;  %v8405_v15 = vld [vmem:[#allocation7 + $0x50] ss:$8 sps:$4 sm:$0xff]  }
 0x1cb   :  { %2796 = vmatprep.subr.bf16.mxu0 %v8310_v16  ;;  %3567 = vmatpush1.bf16.msra.mxu1 %v8347_v17  ;;  %v8410_v16 = vld [vmem:[#allocation7 + $0x64] ss:$8 sps:$4 sm:$0xff]   ;;  %v8377_v17 = vld [vmem:[#allocation2 + $0xc0] ss:$28 sps:$4 sm:$0xff]  }
 0x1cc   :  { %3568 = vmatprep.subr.bf16.mxu1 %v8352_v18  ;;  %v8408_v18 = vld [vmem:[#allocation7 + $0x60] ss:$8 sps:$4 sm:$0xff]  }
 0x1ce   :  { %2797 = vmatpush1.bf16.msra.mxu0 %v8308_v19  ;;  %v8413_v19 = vld [vmem:[#allocation7 + $0x74] ss:$8 sps:$4 sm:$0xff]  }
 0x1cf   :  { %2798 = vmatprep.subr.bf16.mxu0 %v8319_v20  ;;  %3569 = vmatpush1.bf16.msra.mxu1 %v8350_v21  ;;  %v8411_v20 = vld [vmem:[#allocation7 + $0x70] ss:$8 sps:$4 sm:$0xff]   ;;  %v8416_v21 = vld [vmem:[#allocation7 + $0x84] ss:$8 sps:$4 sm:$0xff]  }
 0x1d0   :  { %2650 = vmatmul.mubr.bf16.gmra.mrb[8].mxu0 %v8289_v22  ;;  %3422 = vmatmul.mubr.bf16.gmra.mrb[8].mxu1 %v8289_v22  ;;  %v8378_v22 = vld [vmem:[#allocation2 + $0xf8] ss:$28 sps:$4 sm:$0xff]  }
 0x1d1   :  { %2659 = vmatprep.mubr.bf16.mxu0 %v8293_v23  ;;  %3431 = vmatprep.mubr.bf16.mxu1 %v8293_v23  ;;  %v8414_v23 = vld [vmem:[#allocation7 + $0x80] ss:$8 sps:$4 sm:$0xff]  }
 0x1d2   :  { %2799 = vmatpush1.bf16.msra.mxu0 %v8317_v24  ;;  %3570 = vmatprep.subr.bf16.mxu1 %v8361_v25  ;;  %v8419_v24 = vld [vmem:[#allocation7 + $0x94] ss:$8 sps:$4 sm:$0xff]   ;;  %v8417_v25 = vld [vmem:[#allocation7 + $0x90] ss:$8 sps:$4 sm:$0xff]  }
 0x1d3   :  { %2800 = vmatprep.subr.bf16.mxu0 %v8328_v26  ;;  %3571 = vmatpush1.bf16.msra.mxu1 %v8359_v27  ;;  %v8422_v26 = vld [vmem:[#allocation7 + $0xa4] ss:$8 sps:$4 sm:$0xff]  }
 0x1d4   :  { %3572 = vmatprep.subr.bf16.mxu1 %v8364_v28  ;;  %v8379_v27 = vld [vmem:[#allocation2 + $0x130] ss:$28 sps:$4 sm:$0xff]   ;;  %v8420_v28 = vld [vmem:[#allocation7 + $0xa0] ss:$8 sps:$4 sm:$0xff]  }
 0x1d6   :  { %2801 = vmatpush1.bf16.msra.mxu0 %v8326_v29  ;;  %v8425_v29 = vld [vmem:[#allocation7 + $0xb4] ss:$8 sps:$4 sm:$0xff]  }
 0x1d7   :  { %2802 = vmatprep.subr.bf16.mxu0 %v8337_v30  ;;  %3573 = vmatpush1.bf16.msra.mxu1 %v8362_v31  ;;  %v8423_v30 = vld [vmem:[#allocation7 + $0xb0] ss:$8 sps:$4 sm:$0xff]   ;;  %v8428_v31 = vld [vmem:[#allocation7 + $0xc4] ss:$8 sps:$4 sm:$0xff]  }
 0x1d8   :  { %2660 = vmatmul.mubr.bf16.gmra.mrb[12].mxu0 %v8295_v32  ;;  %3432 = vmatmul.mubr.bf16.gmra.mrb[12].mxu1 %v8295_v32  ;;  %v8380_v32 = vld [vmem:[#allocation2 + $0x168] ss:$28 sps:$4 sm:$0xff]  }
 0x1d9   :  { %2669 = vmatprep.mubr.bf16.mxu0 %v8296_v33  ;;  %3441 = vmatprep.mubr.bf16.mxu1 %v8296_v33  ;;  %v8426_v33 = vld [vmem:[#allocation7 + $0xc0] ss:$8 sps:$4 sm:$0xff]  }
 0x1da   :  { %2803 = vmatpush1.bf16.msra.mxu0 %v8335_v34  ;;  %3574 = vmatprep.subr.bf16.mxu1 %v8370_v35  ;;  %v8431_v34 = vld [vmem:[#allocation7 + $0xd4] ss:$8 sps:$4 sm:$0xff]   ;;  %v8429_v35 = vld [vmem:[#allocation7 + $0xd0] ss:$8 sps:$4 sm:$0xff]  }
 0x1db   :  { %2804 = vmatprep.subr.bf16.mxu0 %v8358_v36  ;;  %3575 = vmatpush1.bf16.msra.mxu1 %v8368_v37  ;;  %v8434_v36 = vld [vmem:[#allocation7 + $0xe4] ss:$8 sps:$4 sm:$0xff]   ;;  %v8381_v37 = vld [vmem:[#allocation2 + $0x1a0] ss:$28 sps:$4 sm:$0xff]  }
 0x1dc   :  { %3576 = vmatprep.subr.bf16.mxu1 %v8373_v38  ;;  %v8432_v38 = vld [vmem:[#allocation7 + $0xe0] ss:$8 sps:$4 sm:$0xff]  }
 0x1de   :  { %2805 = vmatpush1.bf16.msra.mxu0 %v8356_v39  ;;  %v8382_v39 = vld [vmem:[#allocation2 + $0x1d8] ss:$28 sps:$4 sm:$0xff]  }
 0x1df   :  { %3577 = vmatpush1.bf16.msra.mxu1 %v8371_v40  ;;  %4343 = vmatprep.subr.bf16.mxu0 %v8388_v57  ;;  %v8383_v40 = vld [vmem:[#allocation2 + $0x210] ss:$28 sps:$4 sm:$0xff]  }
 0x1e0   :  { %2670 = vmatmul.mubr.bf16.gmra.mrb[16].mxu0 %v8298_v41  ;;  %3442 = vmatmul.mubr.bf16.gmra.mrb[16].mxu1 %v8298_v41  ;;  %v8384_v41 = vld [vmem:[#allocation2 + $0x248] ss:$28 sps:$4 sm:$0xff]  }
 0x1e1   :  { %2679 = vmatprep.mubr.bf16.mxu0 %v8302_v42  ;;  %3451 = vmatprep.mubr.bf16.mxu1 %v8302_v42  ;;  %v8385_v42 = vld [vmem:[#allocation2 + $0x280] ss:$28 sps:$4 sm:$0xff]  }
 0x1e8   :  { %2680 = vmatmul.mubr.bf16.gmra.mrb[20].mxu0 %v8304_v43  ;;  %3452 = vmatmul.mubr.bf16.gmra.mrb[20].mxu1 %v8304_v43  ;;  %v8437_v43 = vld [vmem:[#allocation7 + $0xf4] ss:$8 sps:$4 sm:$0xff]  }
 0x1e9   :  { %2689 = vmatprep.mubr.bf16.mxu0 %v8305_v44  ;;  %3461 = vmatprep.mubr.bf16.mxu1 %v8305_v44  ;;  %v8435_v44 = vld [vmem:[#allocation7 + $0xf0] ss:$8 sps:$4 sm:$0xff]  }
 0x1f0   :  { %2690 = vmatmul.mubr.bf16.gmra.mrb[24].mxu0 %v8307_v45  ;;  %3462 = vmatmul.mubr.bf16.gmra.mrb[24].mxu1 %v8307_v45  ;;  %v8389_v45 = vld [vmem:[#allocation2 + $0x2b8] ss:$28 sps:$4 sm:$0xff]  }
 0x1f1   :  { %2699 = vmatprep.mubr.bf16.mxu0 %v8311_v46  ;;  %3471 = vmatprep.mubr.bf16.mxu1 %v8311_v46  ;;  %v8440_v46 = vld [vmem:[#allocation7 + $0x104] ss:$8 sps:$4 sm:$0xff]  }
 0x1f8   :  { %2700 = vmatmul.mubr.bf16.gmra.mrb[28].mxu0 %v8313_v47  ;;  %3472 = vmatmul.mubr.bf16.gmra.mrb[28].mxu1 %v8313_v47  ;;  %v8393_v47 = vld [vmem:[#allocation2 + $0x2f0] ss:$28 sps:$4 sm:$0xff]  }
 0x1f9   :  { %2709 = vmatprep.mubr.bf16.mxu0 %v8314_v48  ;;  %3481 = vmatprep.mubr.bf16.mxu1 %v8314_v48  ;;  %v8397_v48 = vld [vmem:[#allocation2 + $0x328] ss:$28 sps:$4 sm:$0xff]  }
 0x200   :  { %2710 = vmatmul.mubr.bf16.gmra.mrb[32].mxu0 %v8316_v49  ;;  %3482 = vmatmul.mubr.bf16.gmra.mrb[32].mxu1 %v8316_v49  ;;  %v8401_v49 = vld [vmem:[#allocation2 + $0x360] ss:$28 sps:$4 sm:$0xff]  }
 0x201   :  { %2719 = vmatprep.mubr.bf16.mxu0 %v8320_v50  ;;  %3491 = vmatprep.mubr.bf16.mxu1 %v8320_v50  ;;  %v495_v50 = vlaneseq }
 0x208   :  { %2720 = vmatmul.mubr.bf16.gmra.mrb[36].mxu0 %v8322_v51  ;;  %3492 = vmatmul.mubr.bf16.gmra.mrb[36].mxu1 %v8322_v51  ;;  %v496_v51 = vshrl.u32 %v495_v50, 7 }
 0x209   :  { %2729 = vmatprep.mubr.bf16.mxu0 %v8323_v52  ;;  %3501 = vmatprep.mubr.bf16.mxu1 %v8323_v52 }
 0x20a   :  { %v9112_v52 = vsub.s32 0, %v496_v51 }
 0x210   :  { %2730 = vmatmul.mubr.bf16.gmra.mrb[40].mxu0 %v8325_v53  ;;  %3502 = vmatmul.mubr.bf16.gmra.mrb[40].mxu1 %v8325_v53  ;;  %v505_v53 = vsub.s32 2, %v496_v51 }
 0x211   :  { %2739 = vmatprep.mubr.bf16.mxu0 %v8329_v54  ;;  %3511 = vmatprep.mubr.bf16.mxu1 %v8329_v54  ;;  %v493_v54 = vld [vmem:[%s9883_s2] sm:$0xf] }
 0x212   :  { %v9120_v57 = vrot.slane %v493_v54, %v9112_v52 }
 0x218   :  { %2740 = vmatmul.mubr.bf16.gmra.mrb[44].mxu0 %v8331_v55  ;;  %3512 = vmatmul.mubr.bf16.gmra.mrb[44].mxu1 %v8331_v55  ;;  %v9117_v55 = vsub.s32 1, %v496_v51 }
 0x219   :  { %2749 = vmatprep.mubr.bf16.mxu0 %v8332_v56  ;;  %3521 = vmatprep.mubr.bf16.mxu1 %v8332_v56  ;;  %v509_v56 = vsub.s32 3, %v496_v51 }
 0x220   :  { %2750 = vmatmul.mubr.bf16.gmra.mrb[48].mxu0 %v8334_v58  ;;  %3522 = vmatmul.mubr.bf16.gmra.mrb[48].mxu1 %v8334_v58  ;;  %v9122_v58 = vrot.slane %v493_v54, %v505_v53 }
 0x221   :  { %2759 = vmatprep.mubr.bf16.mxu0 %v8344_v59  ;;  %3531 = vmatprep.mubr.bf16.mxu1 %v8344_v59  ;;  %v9125_v59 = vrot.slane %v493_v54, %v9117_v55 }
 0x228   :  { %2760 = vmatmul.mubr.bf16.gmra.mrb[52].mxu0 %v8346_v60  ;;  %3532 = vmatmul.mubr.bf16.gmra.mrb[52].mxu1 %v8346_v60  ;;  %v9127_v60 = vrot.slane %v493_v54, %v509_v56 }
 0x229   :  { %2769 = vmatprep.mubr.bf16.mxu0 %v8353_v61  ;;  %3541 = vmatprep.mubr.bf16.mxu1 %v8353_v61 }
 0x230   :  { %2770 = vmatmul.mubr.bf16.gmra.mrb[56].mxu0 %v8355_v62  ;;  %3542 = vmatmul.mubr.bf16.gmra.mrb[56].mxu1 %v8355_v62 }
 0x231   :  { %2779 = vmatprep.mubr.bf16.mxu0 %v8365_v63  ;;  %3551 = vmatprep.mubr.bf16.mxu1 %v8365_v63 }
 0x238   :  { %2780 = vmatmul.mubr.bf16.gmra.mrb[60].mxu0 %v8367_v0  ;;  %3552 = vmatmul.mubr.bf16.gmra.mrb[60].mxu1 %v8367_v0 }
 0x239   :  { %2822 = vmatprep.mubr.bf16.mxu0 %v8895_v1  ;;  %3594 = vmatprep.mubr.bf16.mxu1 %v8895_v1 }
 0x240   :  { %2823 = vmatmul.mubr.bf16.vlgmr.msra.gmra.mrb[0].mxu0 %v8374_v2  ;;  %3595 = vmatmul.mubr.bf16.vlgmr.msra.gmra.mrb[0].mxu1 %v8374_v2 }
 0x241   :  { %2832 = vmatprep.mubr.bf16.mxu0 %v8895_v1  ;;  %3604 = vmatprep.mubr.bf16.mxu1 %v8895_v1 }
 0x242   :  { %4344 = vmatpush1.bf16.msra.mxu0 %v8386_v3 }
 0x243   :  { %4345 = vmatprep.subr.bf16.mxu0 %v8392_v4 }
 0x246   :  { %4346 = vmatpush1.bf16.msra.mxu0 %v8390_v5 }
 0x247   :  { %4347 = vmatprep.subr.bf16.mxu0 %v8396_v6 }
 0x248   :  { %2833 = vmatmul.mubr.bf16.gmra.mrb[4].mxu0 %v8375_v7  ;;  %3605 = vmatmul.mubr.bf16.gmra.mrb[4].mxu1 %v8375_v7 }
 0x249   :  { %2842 = vmatprep.mubr.bf16.mxu0 %v8895_v1  ;;  %3614 = vmatprep.mubr.bf16.mxu1 %v8895_v1 }
 0x24a   :  { %4348 = vmatpush1.bf16.msra.mxu0 %v8394_v8 }
 0x24b   :  { %4349 = vmatprep.subr.bf16.mxu0 %v8400_v9 }
 0x24e   :  { %4350 = vmatpush1.bf16.msra.mxu0 %v8398_v10 }
 0x24f   :  { %4351 = vmatprep.subr.bf16.mxu0 %v8404_v11 }
 0x250   :  { %2843 = vmatmul.mubr.bf16.gmra.mrb[8].mxu0 %v8376_v12  ;;  %3615 = vmatmul.mubr.bf16.gmra.mrb[8].mxu1 %v8376_v12 }
 0x251   :  { %2852 = vmatprep.mubr.bf16.mxu0 %v8895_v1  ;;  %3624 = vmatprep.mubr.bf16.mxu1 %v8895_v1 }
 0x252   :  { %4352 = vmatpush1.bf16.msra.mxu0 %v8402_v13 }
 0x253   :  { %4353 = vmatprep.subr.bf16.mxu0 %v8407_v14 }
 0x256   :  { %4354 = vmatpush1.bf16.msra.mxu0 %v8405_v15 }
 0x257   :  { %4355 = vmatprep.subr.bf16.mxu0 %v8410_v16 }
 0x258   :  { %2853 = vmatmul.mubr.bf16.gmra.mrb[12].mxu0 %v8377_v17  ;;  %3625 = vmatmul.mubr.bf16.gmra.mrb[12].mxu1 %v8377_v17 }
 0x259   :  { %2862 = vmatprep.mubr.bf16.mxu0 %v8895_v1  ;;  %3634 = vmatprep.mubr.bf16.mxu1 %v8895_v1 }
 0x25a   :  { %4356 = vmatpush1.bf16.msra.mxu0 %v8408_v18 }
 0x25b   :  { %4357 = vmatprep.subr.bf16.mxu0 %v8413_v19 }
 0x25e   :  { %4358 = vmatpush1.bf16.msra.mxu0 %v8411_v20 }
 0x25f   :  { %4359 = vmatprep.subr.bf16.mxu0 %v8416_v21 }
 0x260   :  { %2863 = vmatmul.mubr.bf16.gmra.mrb[16].mxu0 %v8378_v22  ;;  %3635 = vmatmul.mubr.bf16.gmra.mrb[16].mxu1 %v8378_v22 }
 0x261   :  { %2872 = vmatprep.mubr.bf16.mxu0 %v8895_v1  ;;  %3644 = vmatprep.mubr.bf16.mxu1 %v8895_v1 }
 0x262   :  { %4360 = vmatpush1.bf16.msra.mxu0 %v8414_v23 }
 0x263   :  { %4361 = vmatprep.subr.bf16.mxu0 %v8419_v24 }
 0x266   :  { %4362 = vmatpush1.bf16.msra.mxu0 %v8417_v25 }
 0x267   :  { %4363 = vmatprep.subr.bf16.mxu0 %v8422_v26 }
 0x268   :  { %2873 = vmatmul.mubr.bf16.gmra.mrb[20].mxu0 %v8379_v27  ;;  %3645 = vmatmul.mubr.bf16.gmra.mrb[20].mxu1 %v8379_v27  ;;  %v8438_v27 = vld [vmem:[#allocation7 + $0x100] ss:$8 sps:$4 sm:$0xff]  }
 0x269   :  { %2882 = vmatprep.mubr.bf16.mxu0 %v8895_v1  ;;  %3654 = vmatprep.mubr.bf16.mxu1 %v8895_v1 }
 0x26a   :  { %4364 = vmatpush1.bf16.msra.mxu0 %v8420_v28 }
 0x26b   :  { %4365 = vmatprep.subr.bf16.mxu0 %v8425_v29 }
 0x26e   :  { %4366 = vmatpush1.bf16.msra.mxu0 %v8423_v30 }
 0x26f   :  { %4367 = vmatprep.subr.bf16.mxu0 %v8428_v31 }
 0x270   :  { %2883 = vmatmul.mubr.bf16.gmra.mrb[24].mxu0 %v8380_v32  ;;  %3655 = vmatmul.mubr.bf16.gmra.mrb[24].mxu1 %v8380_v32  ;;  %v8443_v32 = vld [vmem:[#allocation7 + $0x114] ss:$8 sps:$4 sm:$0xff]  }
 0x271   :  { %2892 = vmatprep.mubr.bf16.mxu0 %v8895_v1  ;;  %3664 = vmatprep.mubr.bf16.mxu1 %v8895_v1 }
 0x272   :  { %4368 = vmatpush1.bf16.msra.mxu0 %v8426_v33 }
 0x273   :  { %4369 = vmatprep.subr.bf16.mxu0 %v8431_v34 }
 0x276   :  { %4370 = vmatpush1.bf16.msra.mxu0 %v8429_v35 }
 0x277   :  { %4371 = vmatprep.subr.bf16.mxu0 %v8434_v36 }
 0x278   :  { %2893 = vmatmul.mubr.bf16.gmra.mrb[28].mxu0 %v8381_v37  ;;  %3665 = vmatmul.mubr.bf16.gmra.mrb[28].mxu1 %v8381_v37 }
 0x279   :  { %2902 = vmatprep.mubr.bf16.mxu0 %v8895_v1  ;;  %3674 = vmatprep.mubr.bf16.mxu1 %v8895_v1 }
 0x27a   :  { %4372 = vmatpush1.bf16.msra.mxu0 %v8432_v38 }
 0x27b   :  { %4373 = vmatprep.subr.bf16.mxu0 %v8437_v43  ;;  %v8441_v43 = vld [vmem:[#allocation7 + $0x110] ss:$8 sps:$4 sm:$0xff]  }
 0x27e   :  { %4374 = vmatpush1.bf16.msra.mxu0 %v8435_v44 }
 0x27f   :  { %4536 = vmatprep.subr.bf16.mxu0 %v8440_v46 }
 0x280   :  { %2903 = vmatmul.mubr.bf16.gmra.mrb[32].mxu0 %v8382_v39  ;;  %3675 = vmatmul.mubr.bf16.gmra.mrb[32].mxu1 %v8382_v39 }
 0x281   :  { %2912 = vmatprep.mubr.bf16.mxu0 %v8895_v1  ;;  %3684 = vmatprep.mubr.bf16.mxu1 %v8895_v1 }
 0x288   :  { %2913 = vmatmul.mubr.bf16.gmra.mrb[36].mxu0 %v8383_v40  ;;  %3685 = vmatmul.mubr.bf16.gmra.mrb[36].mxu1 %v8383_v40 }
 0x289   :  { %2922 = vmatprep.mubr.bf16.mxu0 %v8895_v1  ;;  %3694 = vmatprep.mubr.bf16.mxu1 %v8895_v1 }
 0x290   :  { %2923 = vmatmul.mubr.bf16.gmra.mrb[40].mxu0 %v8384_v41  ;;  %3695 = vmatmul.mubr.bf16.gmra.mrb[40].mxu1 %v8384_v41 }
 0x291   :  { %2932 = vmatprep.mubr.bf16.mxu0 %v8895_v1  ;;  %3704 = vmatprep.mubr.bf16.mxu1 %v8895_v1 }
 0x298   :  { %2933 = vmatmul.mubr.bf16.gmra.mrb[44].mxu0 %v8385_v42  ;;  %3705 = vmatmul.mubr.bf16.gmra.mrb[44].mxu1 %v8385_v42 }
 0x299   :  { %2942 = vmatprep.mubr.bf16.mxu0 %v8895_v1  ;;  %3714 = vmatprep.mubr.bf16.mxu1 %v8895_v1 }
 0x2a0   :  { %2943 = vmatmul.mubr.bf16.gmra.mrb[48].mxu0 %v8389_v45  ;;  %3715 = vmatmul.mubr.bf16.gmra.mrb[48].mxu1 %v8389_v45 }
 0x2a1   :  { %2952 = vmatprep.mubr.bf16.mxu0 %v8895_v1  ;;  %3724 = vmatprep.mubr.bf16.mxu1 %v8895_v1 }
 0x2a8   :  { %2953 = vmatmul.mubr.bf16.gmra.mrb[52].mxu0 %v8393_v47  ;;  %3725 = vmatmul.mubr.bf16.gmra.mrb[52].mxu1 %v8393_v47 }
 0x2a9   :  { %2962 = vmatprep.mubr.bf16.mxu0 %v8895_v1  ;;  %3734 = vmatprep.mubr.bf16.mxu1 %v8895_v1 }
 0x2b0   :  { %2963 = vmatmul.mubr.bf16.gmra.mrb[56].mxu0 %v8397_v48  ;;  %3735 = vmatmul.mubr.bf16.gmra.mrb[56].mxu1 %v8397_v48  ;;  %v8446_v48 = vld [vmem:[#allocation7 + $0x124] ss:$8 sps:$4 sm:$0xff]  }
 0x2b1   :  { %2972 = vmatprep.mubr.bf16.mxu0 %v8895_v1  ;;  %3744 = vmatprep.mubr.bf16.mxu1 %v8895_v1 }
 0x2b8   :  { %2973 = vmatmul.mubr.bf16.gmra.mrb[60].mxu0 %v8401_v49  ;;  %3745 = vmatmul.mubr.bf16.gmra.mrb[60].mxu1 %v8401_v49 }
 0x313   :  { %v2824_v61 = vpop.f32.mrb[0].mxu0  ;;  %v3596_v62 = vpop.f32.mrb[0].mxu1 }
 0x314   :  { %v7237_v63 = vadd.f32 %v2824_v61, %v9120_v57  ;;  %v7301_v0 = vadd.f32 %v3596_v62, %v9122_v58  ;;  %v2826_v1 = vpop.f32.mrb[1].mxu0  ;;  %v3598_v2 = vpop.f32.mrb[1].mxu1 }
 0x315   :  { %v7238_v3 = vadd.f32 %v2826_v1, %v9125_v59  ;;  %v7302_v4 = vadd.f32 %v3598_v2, %v9127_v60  ;;  %v2828_v5 = vpop.f32.mrb[2].mxu0  ;;  %v3600_v6 = vpop.f32.mrb[2].mxu1  ;;  %v8444_v1 = vld [vmem:[#allocation7 + $0x120] ss:$8 sps:$4 sm:$0xff]  }
 0x316   :  { %v7239_v7 = vadd.f32 %v2828_v5, %v9120_v57  ;;  %v7303_v8 = vadd.f32 %v3600_v6, %v9122_v58  ;;  %v2830_v9 = vpop.f32.mrb[3].mxu0  ;;  %v3602_v10 = vpop.f32.mrb[3].mxu1  ;;  %v3755_v13 = vmax.f32 %v7237_v63, 0.0  ;;  %v3757_v14 = vmax.f32 %v7301_v0, 0.0  ;;  %v8449_v6 = vld [vmem:[#allocation7 + $0x134] ss:$8 sps:$4 sm:$0xff]  }
 0x317   :  { %v7240_v11 = vadd.f32 %v2830_v9, %v9125_v59  ;;  %v7304_v12 = vadd.f32 %v3602_v10, %v9127_v60  ;;  %v3756_v17 = vmax.f32 %v7238_v3, 0.0  ;;  %v3758_v18 = vmax.f32 %v7302_v4, 0.0 }
 0x318   :  { %v3759_v15 = vmax.f32 %v7239_v7, 0.0  ;;  %v3761_v16 = vmax.f32 %v7303_v8, 0.0 }
 0x319   :  { %v3760_v19 = vmax.f32 %v7240_v11, 0.0  ;;  %v3762_v20 = vmax.f32 %v7304_v12, 0.0 }
 0x31a   :  { %v3883_v21 = vpack.c.bf16 %v3759_v15, %v3755_v13  ;;  %v9137_v22 = vpack.c.bf16 %v3761_v16, %v3757_v14 }
 0x31b   :  { %v3884_v23 = vpack.c.bf16 %v3760_v19, %v3756_v17  ;;  %v9139_v24 = vpack.c.bf16 %v3762_v20, %v3758_v18  ;;  %v2834_v25 = vpop.f32.mrb[4].mxu0  ;;  %v3606_v26 = vpop.f32.mrb[4].mxu1  ;;  %v8447_v17 = vld [vmem:[#allocation7 + $0x130] ss:$8 sps:$4 sm:$0xff]  }
 0x31c   :  { %v7241_v28 = vadd.f32 %v2834_v25, %v9120_v57  ;;  %v7305_v29 = vadd.f32 %v3606_v26, %v9122_v58  ;;  %v2836_v30 = vpop.f32.mrb[5].mxu0  ;;  %v3608_v31 = vpop.f32.mrb[5].mxu1 }
 0x31d   :  { %v7242_v33 = vadd.f32 %v2836_v30, %v9125_v59  ;;  %v7306_v34 = vadd.f32 %v3608_v31, %v9127_v60  ;;  %v2838_v35 = vpop.f32.mrb[6].mxu0  ;;  %v3610_v36 = vpop.f32.mrb[6].mxu1  ;;  %4375 = vmatprep.mubr.bf16.mxu0 %v3884_v23  ;;  %v8452_v23 = vld [vmem:[#allocation7 + $0x144] ss:$8 sps:$4 sm:$0xff]  }
 0x31e   :  { %v7243_v37 = vadd.f32 %v2838_v35, %v9120_v57  ;;  %v7307_v38 = vadd.f32 %v3610_v36, %v9122_v58  ;;  %v2840_v39 = vpop.f32.mrb[7].mxu0  ;;  %v3612_v40 = vpop.f32.mrb[7].mxu1  ;;  %4376 = vmatmul.mubr.bf16.vlgmr.msra.gmra.mrb[64].mxu0 %v3883_v21  ;;  %v3763_v44 = vmax.f32 %v7241_v28, 0.0  ;;  %v3765_v45 = vmax.f32 %v7305_v29, 0.0  ;;  %v8450_v35 = vld [vmem:[#allocation7 + $0x140] ss:$8 sps:$4 sm:$0xff]  }
 0x31f   :  { %v7244_v41 = vadd.f32 %v2840_v39, %v9125_v59  ;;  %v7308_v42 = vadd.f32 %v3612_v40, %v9127_v60  ;;  %4537 = vmatpush1.bf16.msra.mxu0 %v8438_v27  ;;  %v3764_v49 = vmax.f32 %v7242_v33, 0.0  ;;  %v3766_v50 = vmax.f32 %v7306_v34, 0.0  ;;  %v8455_v40 = vld [vmem:[#allocation7 + $0x154] ss:$8 sps:$4 sm:$0xff]  }
 0x320   :  { %v3767_v46 = vmax.f32 %v7243_v37, 0.0  ;;  %v3769_v47 = vmax.f32 %v7307_v38, 0.0  ;;  %4538 = vmatprep.subr.bf16.mxu0 %v8443_v32 }
 0x321   :  { %v3768_v51 = vmax.f32 %v7244_v41, 0.0  ;;  %v3770_v53 = vmax.f32 %v7308_v42, 0.0 }
 0x322   :  { %v3887_v54 = vpack.c.bf16 %v3767_v46, %v3763_v44  ;;  %v9149_v56 = vpack.c.bf16 %v3769_v47, %v3765_v45 }
 0x323   :  { %v3888_v61 = vpack.c.bf16 %v3768_v51, %v3764_v49  ;;  %v9151_v62 = vpack.c.bf16 %v3770_v53, %v3766_v50  ;;  %v2844_v63 = vpop.f32.mrb[8].mxu0  ;;  %v3616_v0 = vpop.f32.mrb[8].mxu1  ;;  %4539 = vmatpush1.bf16.msra.mxu0 %v8441_v43  ;;  %v8453_v51 = vld [vmem:[#allocation7 + $0x150] ss:$8 sps:$4 sm:$0xff]  }
 0x324   :  { %v7245_v2 = vadd.f32 %v2844_v63, %v9120_v57  ;;  %v7309_v3 = vadd.f32 %v3616_v0, %v9122_v58  ;;  %v2846_v4 = vpop.f32.mrb[9].mxu0  ;;  %v3618_v5 = vpop.f32.mrb[9].mxu1  ;;  %4540 = vmatprep.subr.bf16.mxu0 %v8446_v48  ;;  %v8458_v0 = vld [vmem:[#allocation7 + $0x164] ss:$8 sps:$4 sm:$0xff]  }
 0x325   :  { %v7246_v7 = vadd.f32 %v2846_v4, %v9125_v59  ;;  %v7310_v8 = vadd.f32 %v3618_v5, %v9127_v60  ;;  %v2848_v9 = vpop.f32.mrb[10].mxu0  ;;  %v3620_v10 = vpop.f32.mrb[10].mxu1  ;;  %4385 = vmatprep.mubr.bf16.mxu0 %v3888_v61 }
 0x326   :  { %v7247_v11 = vadd.f32 %v2848_v9, %v9120_v57  ;;  %v7311_v12 = vadd.f32 %v3620_v10, %v9122_v58  ;;  %v2850_v13 = vpop.f32.mrb[11].mxu0  ;;  %v3622_v14 = vpop.f32.mrb[11].mxu1  ;;  %4386 = vmatmul.mubr.bf16.gmra.mrb[68].mxu0 %v3887_v54  ;;  %v3771_v18 = vmax.f32 %v7245_v2, 0.0  ;;  %v3773_v19 = vmax.f32 %v7309_v3, 0.0 }
 0x327   :  { %v7248_v15 = vadd.f32 %v2850_v13, %v9125_v59  ;;  %v7312_v16 = vadd.f32 %v3622_v14, %v9127_v60  ;;  %4541 = vmatpush1.bf16.msra.mxu0 %v8444_v1  ;;  %v3772_v25 = vmax.f32 %v7246_v7, 0.0  ;;  %v3774_v26 = vmax.f32 %v7310_v8, 0.0 }
 0x328   :  { %v3775_v20 = vmax.f32 %v7247_v11, 0.0  ;;  %v3777_v21 = vmax.f32 %v7311_v12, 0.0  ;;  %4542 = vmatprep.subr.bf16.mxu0 %v8449_v6  ;;  %v8456_v11 = vld [vmem:[#allocation7 + $0x160] ss:$8 sps:$4 sm:$0xff]  }
 0x329   :  { %v3776_v27 = vmax.f32 %v7248_v15, 0.0  ;;  %v3778_v28 = vmax.f32 %v7312_v16, 0.0  ;;  %v8461_v16 = vld [vmem:[#allocation7 + $0x174] ss:$8 sps:$4 sm:$0xff]  }
 0x32a   :  { %v3891_v29 = vpack.c.bf16 %v3775_v20, %v3771_v18  ;;  %v9161_v30 = vpack.c.bf16 %v3777_v21, %v3773_v19 }
 0x32b   :  { %v3892_v31 = vpack.c.bf16 %v3776_v27, %v3772_v25  ;;  %v9163_v32 = vpack.c.bf16 %v3778_v28, %v3774_v26  ;;  %v2854_v33 = vpop.f32.mrb[12].mxu0  ;;  %v3626_v34 = vpop.f32.mrb[12].mxu1  ;;  %4543 = vmatpush1.bf16.msra.mxu0 %v8447_v17 }
 0x32c   :  { %v7249_v36 = vadd.f32 %v2854_v33, %v9120_v57  ;;  %v7313_v37 = vadd.f32 %v3626_v34, %v9122_v58  ;;  %v2856_v38 = vpop.f32.mrb[13].mxu0  ;;  %v3628_v39 = vpop.f32.mrb[13].mxu1  ;;  %4544 = vmatprep.subr.bf16.mxu0 %v8452_v23 }
 0x32d   :  { %v7250_v41 = vadd.f32 %v2856_v38, %v9125_v59  ;;  %v7314_v42 = vadd.f32 %v3628_v39, %v9127_v60  ;;  %v2858_v43 = vpop.f32.mrb[14].mxu0  ;;  %v3630_v44 = vpop.f32.mrb[14].mxu1  ;;  %4395 = vmatprep.mubr.bf16.mxu0 %v3892_v31 }
 0x32e   :  { %v7251_v45 = vadd.f32 %v2858_v43, %v9120_v57  ;;  %v7315_v46 = vadd.f32 %v3630_v44, %v9122_v58  ;;  %v2860_v47 = vpop.f32.mrb[15].mxu0  ;;  %v3632_v48 = vpop.f32.mrb[15].mxu1  ;;  %4396 = vmatmul.mubr.bf16.gmra.mrb[72].mxu0 %v3891_v29  ;;  %v3779_v53 = vmax.f32 %v7249_v36, 0.0  ;;  %v3781_v54 = vmax.f32 %v7313_v37, 0.0  ;;  %v8459_v29 = vld [vmem:[#allocation7 + $0x170] ss:$8 sps:$4 sm:$0xff]  }
 0x32f   :  { %v7252_v49 = vadd.f32 %v2860_v47, %v9125_v59  ;;  %v7316_v50 = vadd.f32 %v3632_v48, %v9127_v60  ;;  %4545 = vmatpush1.bf16.msra.mxu0 %v8450_v35  ;;  %v3780_v1 = vmax.f32 %v7250_v41, 0.0  ;;  %v3782_v2 = vmax.f32 %v7314_v42, 0.0  ;;  %v8464_v36 = vld [vmem:[#allocation7 + $0x184] ss:$8 sps:$4 sm:$0xff]   ;;  %v8462_v47 = vld [vmem:[#allocation7 + $0x180] ss:$8 sps:$4 sm:$0xff]  }
 0x330   :  { %v3783_v61 = vmax.f32 %v7251_v45, 0.0  ;;  %v3785_v63 = vmax.f32 %v7315_v46, 0.0  ;;  %4546 = vmatprep.subr.bf16.mxu0 %v8455_v40 }
 0x331   :  { %v3784_v3 = vmax.f32 %v7252_v49, 0.0  ;;  %v3786_v4 = vmax.f32 %v7316_v50, 0.0 }
 0x332   :  { %v3895_v5 = vpack.c.bf16 %v3783_v61, %v3779_v53  ;;  %v9173_v6 = vpack.c.bf16 %v3785_v63, %v3781_v54  ;;  %v8467_v53 = vld [vmem:[#allocation7 + $0x194] ss:$8 sps:$4 sm:$0xff]  }
 0x333   :  { %v3896_v7 = vpack.c.bf16 %v3784_v3, %v3780_v1  ;;  %v9175_v8 = vpack.c.bf16 %v3786_v4, %v3782_v2  ;;  %v2864_v9 = vpop.f32.mrb[16].mxu0  ;;  %v3636_v10 = vpop.f32.mrb[16].mxu1  ;;  %4547 = vmatpush1.bf16.msra.mxu0 %v8453_v51 }
 0x334   :  { %v7253_v12 = vadd.f32 %v2864_v9, %v9120_v57  ;;  %v7317_v13 = vadd.f32 %v3636_v10, %v9122_v58  ;;  %v2866_v14 = vpop.f32.mrb[17].mxu0  ;;  %v3638_v15 = vpop.f32.mrb[17].mxu1  ;;  %4548 = vmatprep.subr.bf16.mxu0 %v8458_v0  ;;  %v8465_v9 = vld [vmem:[#allocation7 + $0x190] ss:$8 sps:$4 sm:$0xff]  }
 0x335   :  { %v7254_v17 = vadd.f32 %v2866_v14, %v9125_v59  ;;  %v7318_v18 = vadd.f32 %v3638_v15, %v9127_v60  ;;  %v2868_v19 = vpop.f32.mrb[18].mxu0  ;;  %v3640_v20 = vpop.f32.mrb[18].mxu1  ;;  %4405 = vmatprep.mubr.bf16.mxu0 %v3896_v7  ;;  %v8470_v14 = vld [vmem:[#allocation7 + $0x1a4] ss:$8 sps:$4 sm:$0xff]  }
 0x336   :  { %v7255_v21 = vadd.f32 %v2868_v19, %v9120_v57  ;;  %v7319_v23 = vadd.f32 %v3640_v20, %v9122_v58  ;;  %v2870_v25 = vpop.f32.mrb[19].mxu0  ;;  %v3642_v26 = vpop.f32.mrb[19].mxu1  ;;  %4406 = vmatmul.mubr.bf16.gmra.mrb[76].mxu0 %v3895_v5  ;;  %v3787_v31 = vmax.f32 %v7253_v12, 0.0  ;;  %v3789_v33 = vmax.f32 %v7317_v13, 0.0 }
 0x337   :  { %v7256_v27 = vadd.f32 %v2870_v25, %v9125_v59  ;;  %v7320_v28 = vadd.f32 %v3642_v26, %v9127_v60  ;;  %4549 = vmatpush1.bf16.msra.mxu0 %v8456_v11  ;;  %v3788_v37 = vmax.f32 %v7254_v17, 0.0  ;;  %v3790_v38 = vmax.f32 %v7318_v18, 0.0 }
 0x338   :  { %v3791_v34 = vmax.f32 %v7255_v21, 0.0  ;;  %v3793_v35 = vmax.f32 %v7319_v23, 0.0  ;;  %4550 = vmatprep.subr.bf16.mxu0 %v8461_v16 }
 0x339   :  { %v3792_v39 = vmax.f32 %v7256_v27, 0.0  ;;  %v3794_v40 = vmax.f32 %v7320_v28, 0.0  ;;  %v8468_v27 = vld [vmem:[#allocation7 + $0x1a0] ss:$8 sps:$4 sm:$0xff]  }
 0x33a   :  { %v3899_v41 = vpack.c.bf16 %v3791_v34, %v3787_v31  ;;  %v9185_v42 = vpack.c.bf16 %v3793_v35, %v3789_v33  ;;  %v8473_v34 = vld [vmem:[#allocation7 + $0x1b4] ss:$8 sps:$4 sm:$0xff]  }
 0x33b   :  { %v3900_v43 = vpack.c.bf16 %v3792_v39, %v3788_v37  ;;  %v9187_v44 = vpack.c.bf16 %v3794_v40, %v3790_v38  ;;  %v2874_v45 = vpop.f32.mrb[20].mxu0  ;;  %v3646_v46 = vpop.f32.mrb[20].mxu1  ;;  %4551 = vmatpush1.bf16.msra.mxu0 %v8459_v29 }
 0x33c   :  { %v7257_v48 = vadd.f32 %v2874_v45, %v9120_v57  ;;  %v7321_v49 = vadd.f32 %v3646_v46, %v9122_v58  ;;  %v2876_v50 = vpop.f32.mrb[21].mxu0  ;;  %v3648_v51 = vpop.f32.mrb[21].mxu1  ;;  %4552 = vmatprep.subr.bf16.mxu0 %v8464_v36 }
 0x33d   :  { %v7258_v54 = vadd.f32 %v2876_v50, %v9125_v59  ;;  %v7322_v61 = vadd.f32 %v3648_v51, %v9127_v60  ;;  %v2878_v63 = vpop.f32.mrb[22].mxu0  ;;  %v3650_v0 = vpop.f32.mrb[22].mxu1  ;;  %4415 = vmatprep.mubr.bf16.mxu0 %v3900_v43 }
 0x33e   :  { %v7259_v1 = vadd.f32 %v2878_v63, %v9120_v57  ;;  %v7323_v2 = vadd.f32 %v3650_v0, %v9122_v58  ;;  %v2880_v3 = vpop.f32.mrb[23].mxu0  ;;  %v3652_v4 = vpop.f32.mrb[23].mxu1  ;;  %4416 = vmatmul.mubr.bf16.gmra.mrb[80].mxu0 %v3899_v41  ;;  %v3795_v10 = vmax.f32 %v7257_v48, 0.0  ;;  %v3797_v11 = vmax.f32 %v7321_v49, 0.0 }
 0x33f   :  { %v7260_v5 = vadd.f32 %v2880_v3, %v9125_v59  ;;  %v7324_v7 = vadd.f32 %v3652_v4, %v9127_v60  ;;  %4553 = vmatpush1.bf16.msra.mxu0 %v8462_v47  ;;  %v3796_v15 = vmax.f32 %v7258_v54, 0.0  ;;  %v3798_v16 = vmax.f32 %v7322_v61, 0.0  ;;  %v8471_v47 = vld [vmem:[#allocation7 + $0x1b0] ss:$8 sps:$4 sm:$0xff]  }
 0x340   :  { %v3799_v12 = vmax.f32 %v7259_v1, 0.0  ;;  %v3801_v13 = vmax.f32 %v7323_v2, 0.0  ;;  %4554 = vmatprep.subr.bf16.mxu0 %v8467_v53  ;;  %v8476_v53 = vld [vmem:[#allocation7 + $0x1c4] ss:$8 sps:$4 sm:$0xff]  }
 0x341   :  { %v3800_v17 = vmax.f32 %v7260_v5, 0.0  ;;  %v3802_v18 = vmax.f32 %v7324_v7, 0.0 }
 0x342   :  { %v3903_v19 = vpack.c.bf16 %v3799_v12, %v3795_v10  ;;  %v9197_v20 = vpack.c.bf16 %v3801_v13, %v3797_v11 }
 0x343   :  { %v3904_v21 = vpack.c.bf16 %v3800_v17, %v3796_v15  ;;  %v9199_v23 = vpack.c.bf16 %v3802_v18, %v3798_v16  ;;  %v2884_v25 = vpop.f32.mrb[24].mxu0  ;;  %v3656_v26 = vpop.f32.mrb[24].mxu1  ;;  %4555 = vmatpush1.bf16.msra.mxu0 %v8465_v9  ;;  %v8474_v9 = vld [vmem:[#allocation7 + $0x1c0] ss:$8 sps:$4 sm:$0xff]  }
 0x344   :  { %v7261_v28 = vadd.f32 %v2884_v25, %v9120_v57  ;;  %v7325_v29 = vadd.f32 %v3656_v26, %v9122_v58  ;;  %v2886_v31 = vpop.f32.mrb[25].mxu0  ;;  %v3658_v33 = vpop.f32.mrb[25].mxu1  ;;  %4556 = vmatprep.subr.bf16.mxu0 %v8470_v14  ;;  %v8479_v14 = vld [vmem:[#allocation7 + $0x1d4] ss:$8 sps:$4 sm:$0xff]  }
 0x345   :  { %v7262_v35 = vadd.f32 %v2886_v31, %v9125_v59  ;;  %v7326_v36 = vadd.f32 %v3658_v33, %v9127_v60  ;;  %v2888_v37 = vpop.f32.mrb[26].mxu0  ;;  %v3660_v38 = vpop.f32.mrb[26].mxu1  ;;  %4425 = vmatprep.mubr.bf16.mxu0 %v3904_v21 }
 0x346   :  { %v7263_v39 = vadd.f32 %v2888_v37, %v9120_v57  ;;  %v7327_v40 = vadd.f32 %v3660_v38, %v9122_v58  ;;  %v2890_v41 = vpop.f32.mrb[27].mxu0  ;;  %v3662_v43 = vpop.f32.mrb[27].mxu1  ;;  %4426 = vmatmul.mubr.bf16.gmra.mrb[84].mxu0 %v3903_v19  ;;  %v3803_v48 = vmax.f32 %v7261_v28, 0.0  ;;  %v3805_v49 = vmax.f32 %v7325_v29, 0.0  ;;  %v8477_v29 = vld [vmem:[#allocation7 + $0x1d0] ss:$8 sps:$4 sm:$0xff]  }
 0x347   :  { %v7264_v45 = vadd.f32 %v2890_v41, %v9125_v59  ;;  %v7328_v46 = vadd.f32 %v3662_v43, %v9127_v60  ;;  %4557 = vmatpush1.bf16.msra.mxu0 %v8468_v27  ;;  %v3804_v54 = vmax.f32 %v7262_v35, 0.0  ;;  %v3806_v61 = vmax.f32 %v7326_v36, 0.0  ;;  %v8482_v36 = vld [vmem:[#allocation7 + $0x1e4] ss:$8 sps:$4 sm:$0xff]  }
 0x348   :  { %v3807_v50 = vmax.f32 %v7263_v39, 0.0  ;;  %v3809_v51 = vmax.f32 %v7327_v40, 0.0  ;;  %4558 = vmatprep.subr.bf16.mxu0 %v8473_v34 }
 0x349   :  { %v3808_v63 = vmax.f32 %v7264_v45, 0.0  ;;  %v3810_v0 = vmax.f32 %v7328_v46, 0.0 }
 0x34a   :  { %v3907_v1 = vpack.c.bf16 %v3807_v50, %v3803_v48  ;;  %v9209_v2 = vpack.c.bf16 %v3809_v51, %v3805_v49  ;;  %v8480_v49 = vld [vmem:[#allocation7 + $0x1e0] ss:$8 sps:$4 sm:$0xff]  }
 0x34b   :  { %v3908_v3 = vpack.c.bf16 %v3808_v63, %v3804_v54  ;;  %v9211_v4 = vpack.c.bf16 %v3810_v0, %v3806_v61  ;;  %v2894_v5 = vpop.f32.mrb[28].mxu0  ;;  %v3666_v7 = vpop.f32.mrb[28].mxu1  ;;  %4559 = vmatpush1.bf16.msra.mxu0 %v8471_v47  ;;  %v8485_v61 = vld [vmem:[#allocation7 + $0x1f4] ss:$8 sps:$4 sm:$0xff]  }
 0x34c   :  { %v7265_v10 = vadd.f32 %v2894_v5, %v9120_v57  ;;  %v7329_v11 = vadd.f32 %v3666_v7, %v9122_v58  ;;  %v2896_v12 = vpop.f32.mrb[29].mxu0  ;;  %v3668_v13 = vpop.f32.mrb[29].mxu1  ;;  %4560 = vmatprep.subr.bf16.mxu0 %v8476_v53 }
 0x34d   :  { %v7266_v15 = vadd.f32 %v2896_v12, %v9125_v59  ;;  %v7330_v16 = vadd.f32 %v3668_v13, %v9127_v60  ;;  %v2898_v17 = vpop.f32.mrb[30].mxu0  ;;  %v3670_v18 = vpop.f32.mrb[30].mxu1  ;;  %4435 = vmatprep.mubr.bf16.mxu0 %v3908_v3  ;;  %v8483_v13 = vld [vmem:[#allocation7 + $0x1f0] ss:$8 sps:$4 sm:$0xff]  }
 0x34e   :  { %v7267_v19 = vadd.f32 %v2898_v17, %v9120_v57  ;;  %v7331_v21 = vadd.f32 %v3670_v18, %v9122_v58  ;;  %v2900_v25 = vpop.f32.mrb[31].mxu0  ;;  %v3672_v26 = vpop.f32.mrb[31].mxu1  ;;  %4436 = vmatmul.mubr.bf16.gmra.mrb[88].mxu0 %v3907_v1  ;;  %v3811_v31 = vmax.f32 %v7265_v10, 0.0  ;;  %v3813_v33 = vmax.f32 %v7329_v11, 0.0 }
 0x34f   :  { %v7268_v27 = vadd.f32 %v2900_v25, %v9125_v59  ;;  %v7332_v28 = vadd.f32 %v3672_v26, %v9127_v60  ;;  %4561 = vmatpush1.bf16.msra.mxu0 %v8474_v9  ;;  %v3812_v37 = vmax.f32 %v7266_v15, 0.0  ;;  %v3814_v38 = vmax.f32 %v7330_v16, 0.0 }
 0x350   :  { %v3815_v34 = vmax.f32 %v7267_v19, 0.0  ;;  %v3817_v35 = vmax.f32 %v7331_v21, 0.0  ;;  %4562 = vmatprep.subr.bf16.mxu0 %v8479_v14 }
 0x351   :  { %v3816_v39 = vmax.f32 %v7268_v27, 0.0  ;;  %v3818_v40 = vmax.f32 %v7332_v28, 0.0 }
 0x352   :  { %v3911_v41 = vpack.c.bf16 %v3815_v34, %v3811_v31  ;;  %v9221_v43 = vpack.c.bf16 %v3817_v35, %v3813_v33 }
 0x353   :  { %v3912_v45 = vpack.c.bf16 %v3816_v39, %v3812_v37  ;;  %v9223_v46 = vpack.c.bf16 %v3818_v40, %v3814_v38  ;;  %v2904_v47 = vpop.f32.mrb[32].mxu0  ;;  %v3676_v48 = vpop.f32.mrb[32].mxu1  ;;  %4563 = vmatpush1.bf16.msra.mxu0 %v8477_v29 }
 0x354   :  { %v7269_v50 = vadd.f32 %v2904_v47, %v9120_v57  ;;  %v7333_v51 = vadd.f32 %v3676_v48, %v9122_v58  ;;  %v2906_v53 = vpop.f32.mrb[33].mxu0  ;;  %v3678_v54 = vpop.f32.mrb[33].mxu1  ;;  %4564 = vmatprep.subr.bf16.mxu0 %v8482_v36 }
 0x355   :  { %v7270_v63 = vadd.f32 %v2906_v53, %v9125_v59  ;;  %v7334_v0 = vadd.f32 %v3678_v54, %v9127_v60  ;;  %v2908_v1 = vpop.f32.mrb[34].mxu0  ;;  %v3680_v3 = vpop.f32.mrb[34].mxu1  ;;  %4445 = vmatprep.mubr.bf16.mxu0 %v3912_v45 }
 0x356   :  { %v7271_v5 = vadd.f32 %v2908_v1, %v9120_v57  ;;  %v7335_v7 = vadd.f32 %v3680_v3, %v9122_v58  ;;  %v2910_v9 = vpop.f32.mrb[35].mxu0  ;;  %v3682_v10 = vpop.f32.mrb[35].mxu1  ;;  %4446 = vmatmul.mubr.bf16.gmra.mrb[92].mxu0 %v3911_v41  ;;  %v3819_v14 = vmax.f32 %v7269_v50, 0.0  ;;  %v3821_v15 = vmax.f32 %v7333_v51, 0.0 }
 0x357   :  { %v7272_v11 = vadd.f32 %v2910_v9, %v9125_v59  ;;  %v7336_v12 = vadd.f32 %v3682_v10, %v9127_v60  ;;  %4565 = vmatpush1.bf16.msra.mxu0 %v8480_v49  ;;  %v3820_v18 = vmax.f32 %v7270_v63, 0.0  ;;  %v3822_v19 = vmax.f32 %v7334_v0, 0.0 }
 0x358   :  { %v3823_v16 = vmax.f32 %v7271_v5, 0.0  ;;  %v3825_v17 = vmax.f32 %v7335_v7, 0.0  ;;  %4566 = vmatprep.subr.bf16.mxu0 %v8485_v61 }
 0x359   :  { %v3824_v21 = vmax.f32 %v7272_v11, 0.0  ;;  %v3826_v25 = vmax.f32 %v7336_v12, 0.0 }
 0x35a   :  { %v3915_v26 = vpack.c.bf16 %v3823_v16, %v3819_v14  ;;  %v9233_v27 = vpack.c.bf16 %v3825_v17, %v3821_v15 }
 0x35b   :  { %v3916_v28 = vpack.c.bf16 %v3824_v21, %v3820_v18  ;;  %v9235_v29 = vpack.c.bf16 %v3826_v25, %v3822_v19  ;;  %v2914_v31 = vpop.f32.mrb[36].mxu0  ;;  %v3686_v33 = vpop.f32.mrb[36].mxu1  ;;  %4567 = vmatpush1.bf16.msra.mxu0 %v8483_v13 }
 0x35c   :  { %v7273_v34 = vadd.f32 %v2914_v31, %v9120_v57  ;;  %v7337_v35 = vadd.f32 %v3686_v33, %v9122_v58  ;;  %v2916_v36 = vpop.f32.mrb[37].mxu0  ;;  %v3688_v37 = vpop.f32.mrb[37].mxu1 }
 0x35d   :  { %v7274_v38 = vadd.f32 %v2916_v36, %v9125_v59  ;;  %v7338_v39 = vadd.f32 %v3688_v37, %v9127_v60  ;;  %v2918_v40 = vpop.f32.mrb[38].mxu0  ;;  %v3690_v41 = vpop.f32.mrb[38].mxu1  ;;  %4455 = vmatprep.mubr.bf16.mxu0 %v3916_v28 }
 0x35e   :  { %v7275_v45 = vadd.f32 %v2918_v40, %v9120_v57  ;;  %v7339_v47 = vadd.f32 %v3690_v41, %v9122_v58  ;;  %v2920_v48 = vpop.f32.mrb[39].mxu0  ;;  %v3692_v49 = vpop.f32.mrb[39].mxu1  ;;  %4456 = vmatmul.mubr.bf16.gmra.mrb[96].mxu0 %v3915_v26  ;;  %v3827_v53 = vmax.f32 %v7273_v34, 0.0  ;;  %v3829_v54 = vmax.f32 %v7337_v35, 0.0 }
 0x35f   :  { %v7276_v50 = vadd.f32 %v2920_v48, %v9125_v59  ;;  %v7340_v51 = vadd.f32 %v3692_v49, %v9127_v60  ;;  %v3828_v0 = vmax.f32 %v7274_v38, 0.0  ;;  %v3830_v1 = vmax.f32 %v7338_v39, 0.0 }
 0x360   :  { %v3831_v61 = vmax.f32 %v7275_v45, 0.0  ;;  %v3833_v63 = vmax.f32 %v7339_v47, 0.0 }
 0x361   :  { %v3832_v3 = vmax.f32 %v7276_v50, 0.0  ;;  %v3834_v5 = vmax.f32 %v7340_v51, 0.0 }
 0x362   :  { %v3919_v7 = vpack.c.bf16 %v3831_v61, %v3827_v53  ;;  %v9245_v9 = vpack.c.bf16 %v3833_v63, %v3829_v54 }
 0x363   :  { %v3920_v10 = vpack.c.bf16 %v3832_v3, %v3828_v0  ;;  %v9247_v11 = vpack.c.bf16 %v3834_v5, %v3830_v1  ;;  %v2924_v12 = vpop.f32.mrb[40].mxu0  ;;  %v3696_v13 = vpop.f32.mrb[40].mxu1 }
 0x364   :  { %v7277_v14 = vadd.f32 %v2924_v12, %v9120_v57  ;;  %v7341_v15 = vadd.f32 %v3696_v13, %v9122_v58  ;;  %v2926_v16 = vpop.f32.mrb[41].mxu0  ;;  %v3698_v17 = vpop.f32.mrb[41].mxu1 }
 0x365   :  { %v7278_v18 = vadd.f32 %v2926_v16, %v9125_v59  ;;  %v7342_v19 = vadd.f32 %v3698_v17, %v9127_v60  ;;  %v2928_v21 = vpop.f32.mrb[42].mxu0  ;;  %v3700_v25 = vpop.f32.mrb[42].mxu1  ;;  %4465 = vmatprep.mubr.bf16.mxu0 %v3920_v10 }
 0x366   :  { %v7279_v26 = vadd.f32 %v2928_v21, %v9120_v57  ;;  %v7343_v28 = vadd.f32 %v3700_v25, %v9122_v58  ;;  %v2930_v31 = vpop.f32.mrb[43].mxu0  ;;  %v3702_v33 = vpop.f32.mrb[43].mxu1  ;;  %4466 = vmatmul.mubr.bf16.gmra.mrb[100].mxu0 %v3919_v7  ;;  %v3835_v36 = vmax.f32 %v7277_v14, 0.0  ;;  %v3837_v37 = vmax.f32 %v7341_v15, 0.0 }
 0x367   :  { %v7280_v34 = vadd.f32 %v2930_v31, %v9125_v59  ;;  %v7344_v35 = vadd.f32 %v3702_v33, %v9127_v60  ;;  %v3836_v40 = vmax.f32 %v7278_v18, 0.0  ;;  %v3838_v41 = vmax.f32 %v7342_v19, 0.0 }
 0x368   :  { %v3839_v38 = vmax.f32 %v7279_v26, 0.0  ;;  %v3841_v39 = vmax.f32 %v7343_v28, 0.0 }
 0x369   :  { %v3840_v45 = vmax.f32 %v7280_v34, 0.0  ;;  %v3842_v47 = vmax.f32 %v7344_v35, 0.0 }
 0x36a   :  { %v3923_v48 = vpack.c.bf16 %v3839_v38, %v3835_v36  ;;  %v9257_v49 = vpack.c.bf16 %v3841_v39, %v3837_v37 }
 0x36b   :  { %v3924_v50 = vpack.c.bf16 %v3840_v45, %v3836_v40  ;;  %v9259_v51 = vpack.c.bf16 %v3842_v47, %v3838_v41  ;;  %v2934_v53 = vpop.f32.mrb[44].mxu0  ;;  %v3706_v54 = vpop.f32.mrb[44].mxu1 }
 0x36c   :  { %v7281_v61 = vadd.f32 %v2934_v53, %v9120_v57  ;;  %v7345_v63 = vadd.f32 %v3706_v54, %v9122_v58  ;;  %v2936_v0 = vpop.f32.mrb[45].mxu0  ;;  %v3708_v1 = vpop.f32.mrb[45].mxu1 }
 0x36d   :  { %v7282_v3 = vadd.f32 %v2936_v0, %v9125_v59  ;;  %v7346_v5 = vadd.f32 %v3708_v1, %v9127_v60  ;;  %v2938_v7 = vpop.f32.mrb[46].mxu0  ;;  %v3710_v10 = vpop.f32.mrb[46].mxu1  ;;  %4475 = vmatprep.mubr.bf16.mxu0 %v3924_v50 }
 0x36e   :  { %v7283_v12 = vadd.f32 %v2938_v7, %v9120_v57  ;;  %v7347_v13 = vadd.f32 %v3710_v10, %v9122_v58  ;;  %v2940_v14 = vpop.f32.mrb[47].mxu0  ;;  %v3712_v15 = vpop.f32.mrb[47].mxu1  ;;  %4476 = vmatmul.mubr.bf16.gmra.mrb[104].mxu0 %v3923_v48  ;;  %v3843_v18 = vmax.f32 %v7281_v61, 0.0  ;;  %v3845_v19 = vmax.f32 %v7345_v63, 0.0  ;;  %v8486_v7 = vld [vmem:[#allocation8] ss:$8 sps:$4 sm:$0xff]  }
 0x36f   :  { %v7284_v16 = vadd.f32 %v2940_v14, %v9125_v59  ;;  %v7348_v17 = vadd.f32 %v3712_v15, %v9127_v60  ;;  %v3844_v26 = vmax.f32 %v7282_v3, 0.0  ;;  %v3846_v28 = vmax.f32 %v7346_v5, 0.0  ;;  %v8488_v10 = vld [vmem:[#allocation8 + $0x4] ss:$8 sps:$4 sm:$0xff]  }
 0x370   :  { %v3847_v21 = vmax.f32 %v7283_v12, 0.0  ;;  %v3849_v25 = vmax.f32 %v7347_v13, 0.0  ;;  %5029 = vmatprep.subr.bf16.mxu1 %v8488_v10 }
 0x371   :  { %v3848_v31 = vmax.f32 %v7284_v16, 0.0  ;;  %v3850_v33 = vmax.f32 %v7348_v17, 0.0  ;;  %5030 = vmatpush1.bf16.msra.mxu1 %v8486_v7 }
 0x372   :  { %v3927_v34 = vpack.c.bf16 %v3847_v21, %v3843_v18  ;;  %v9269_v35 = vpack.c.bf16 %v3849_v25, %v3845_v19 }
 0x373   :  { %v3928_v36 = vpack.c.bf16 %v3848_v31, %v3844_v26  ;;  %v9271_v37 = vpack.c.bf16 %v3850_v33, %v3846_v28  ;;  %v2944_v38 = vpop.f32.mrb[48].mxu0  ;;  %v3716_v39 = vpop.f32.mrb[48].mxu1 }
 0x374   :  { %v7285_v40 = vadd.f32 %v2944_v38, %v9120_v57  ;;  %v7349_v41 = vadd.f32 %v3716_v39, %v9122_v58  ;;  %v2946_v45 = vpop.f32.mrb[49].mxu0  ;;  %v3718_v47 = vpop.f32.mrb[49].mxu1 }
 0x375   :  { %v7286_v48 = vadd.f32 %v2946_v45, %v9125_v59  ;;  %v7350_v50 = vadd.f32 %v3718_v47, %v9127_v60  ;;  %v2948_v53 = vpop.f32.mrb[50].mxu0  ;;  %v3720_v54 = vpop.f32.mrb[50].mxu1  ;;  %4485 = vmatprep.mubr.bf16.mxu0 %v3928_v36 }
 0x376   :  { %v7287_v61 = vadd.f32 %v2948_v53, %v9120_v57  ;;  %v7351_v63 = vadd.f32 %v3720_v54, %v9122_v58  ;;  %v2950_v0 = vpop.f32.mrb[51].mxu0  ;;  %v3722_v1 = vpop.f32.mrb[51].mxu1  ;;  %4486 = vmatmul.mubr.bf16.gmra.mrb[108].mxu0 %v3927_v34  ;;  %v3851_v12 = vmax.f32 %v7285_v40, 0.0  ;;  %v3853_v13 = vmax.f32 %v7349_v41, 0.0 }
 0x377   :  { %v7288_v3 = vadd.f32 %v2950_v0, %v9125_v59  ;;  %v7352_v5 = vadd.f32 %v3722_v1, %v9127_v60  ;;  %v3852_v16 = vmax.f32 %v7286_v48, 0.0  ;;  %v3854_v17 = vmax.f32 %v7350_v50, 0.0  ;;  %v8489_v0 = vld [vmem:[#allocation8 + $0x10] ss:$8 sps:$4 sm:$0xff]   ;;  %v8491_v1 = vld [vmem:[#allocation8 + $0x14] ss:$8 sps:$4 sm:$0xff]  }
 0x378   :  { %v3855_v14 = vmax.f32 %v7287_v61, 0.0  ;;  %v3857_v15 = vmax.f32 %v7351_v63, 0.0  ;;  %5031 = vmatprep.subr.bf16.mxu1 %v8491_v1 }
 0x379   :  { %v3856_v18 = vmax.f32 %v7288_v3, 0.0  ;;  %v3858_v19 = vmax.f32 %v7352_v5, 0.0  ;;  %5032 = vmatpush1.bf16.msra.mxu1 %v8489_v0 }
 0x37a   :  { %v3931_v21 = vpack.c.bf16 %v3855_v14, %v3851_v12  ;;  %v9281_v25 = vpack.c.bf16 %v3857_v15, %v3853_v13 }
 0x37b   :  { %v3932_v26 = vpack.c.bf16 %v3856_v18, %v3852_v16  ;;  %v9283_v28 = vpack.c.bf16 %v3858_v19, %v3854_v17  ;;  %v2954_v31 = vpop.f32.mrb[52].mxu0  ;;  %v3726_v33 = vpop.f32.mrb[52].mxu1 }
 0x37c   :  { %v7289_v34 = vadd.f32 %v2954_v31, %v9120_v57  ;;  %v7353_v36 = vadd.f32 %v3726_v33, %v9122_v58  ;;  %v2956_v38 = vpop.f32.mrb[53].mxu0  ;;  %v3728_v39 = vpop.f32.mrb[53].mxu1 }
 0x37d   :  { %v7290_v40 = vadd.f32 %v2956_v38, %v9125_v59  ;;  %v7354_v41 = vadd.f32 %v3728_v39, %v9127_v60  ;;  %v2958_v45 = vpop.f32.mrb[54].mxu0  ;;  %v3730_v47 = vpop.f32.mrb[54].mxu1  ;;  %4495 = vmatprep.mubr.bf16.mxu0 %v3932_v26 }
 0x37e   :  { %v7291_v48 = vadd.f32 %v2958_v45, %v9120_v57  ;;  %v7355_v50 = vadd.f32 %v3730_v47, %v9122_v58  ;;  %v2960_v53 = vpop.f32.mrb[55].mxu0  ;;  %v3732_v54 = vpop.f32.mrb[55].mxu1  ;;  %4496 = vmatmul.mubr.bf16.gmra.mrb[112].mxu0 %v3931_v21  ;;  %v3859_v3 = vmax.f32 %v7289_v34, 0.0  ;;  %v3861_v5 = vmax.f32 %v7353_v36, 0.0 }
 0x37f   :  { %v7292_v61 = vadd.f32 %v2960_v53, %v9125_v59  ;;  %v7356_v63 = vadd.f32 %v3732_v54, %v9127_v60  ;;  %v3860_v12 = vmax.f32 %v7290_v40, 0.0  ;;  %v3862_v13 = vmax.f32 %v7354_v41, 0.0 }
 0x380   :  { %v3863_v7 = vmax.f32 %v7291_v48, 0.0  ;;  %v3865_v10 = vmax.f32 %v7355_v50, 0.0 }
 0x381   :  { %v3864_v14 = vmax.f32 %v7292_v61, 0.0  ;;  %v3866_v15 = vmax.f32 %v7356_v63, 0.0  ;;  %v8492_v61 = vld [vmem:[#allocation8 + $0x20] ss:$8 sps:$4 sm:$0xff]   ;;  %v8494_v63 = vld [vmem:[#allocation8 + $0x24] ss:$8 sps:$4 sm:$0xff]  }
 0x382   :  { %v3935_v16 = vpack.c.bf16 %v3863_v7, %v3859_v3  ;;  %v9293_v17 = vpack.c.bf16 %v3865_v10, %v3861_v5  ;;  %5033 = vmatprep.subr.bf16.mxu1 %v8494_v63  ;;  %v8497_v63 = vld [vmem:[#allocation8 + $0x34] ss:$8 sps:$4 sm:$0xff]  }
 0x383   :  { %v3936_v18 = vpack.c.bf16 %v3864_v14, %v3860_v12  ;;  %v9295_v19 = vpack.c.bf16 %v3866_v15, %v3862_v13  ;;  %v2964_v21 = vpop.f32.mrb[56].mxu0  ;;  %v3736_v26 = vpop.f32.mrb[56].mxu1  ;;  %5034 = vmatpush1.bf16.msra.mxu1 %v8492_v61  ;;  %v8495_v61 = vld [vmem:[#allocation8 + $0x30] ss:$8 sps:$4 sm:$0xff]  }
 0x384   :  { %v7293_v31 = vadd.f32 %v2964_v21, %v9120_v57  ;;  %v7357_v33 = vadd.f32 %v3736_v26, %v9122_v58  ;;  %v2966_v34 = vpop.f32.mrb[57].mxu0  ;;  %v3738_v36 = vpop.f32.mrb[57].mxu1  ;;  %5035 = vmatprep.subr.bf16.mxu1 %v8497_v63 }
 0x385   :  { %v7294_v38 = vadd.f32 %v2966_v34, %v9125_v59  ;;  %v7358_v39 = vadd.f32 %v3738_v36, %v9127_v60  ;;  %v2968_v40 = vpop.f32.mrb[58].mxu0  ;;  %v3740_v41 = vpop.f32.mrb[58].mxu1  ;;  %4505 = vmatprep.mubr.bf16.mxu0 %v3936_v18 }
 0x386   :  { %v7295_v45 = vadd.f32 %v2968_v40, %v9120_v57  ;;  %v7359_v47 = vadd.f32 %v3740_v41, %v9122_v58  ;;  %v2970_v48 = vpop.f32.mrb[59].mxu0  ;;  %v3742_v50 = vpop.f32.mrb[59].mxu1  ;;  %4506 = vmatmul.mubr.bf16.gmra.mrb[116].mxu0 %v3935_v16  ;;  %v3867_v0 = vmax.f32 %v7293_v31, 0.0  ;;  %v3869_v1 = vmax.f32 %v7357_v33, 0.0 }
 0x387   :  { %v7296_v53 = vadd.f32 %v2970_v48, %v9125_v59  ;;  %v7360_v54 = vadd.f32 %v3742_v50, %v9127_v60  ;;  %v3868_v7 = vmax.f32 %v7294_v38, 0.0  ;;  %v3870_v10 = vmax.f32 %v7358_v39, 0.0  ;;  %5036 = vmatpush1.bf16.msra.mxu1 %v8495_v61 }
 0x388   :  { %v3871_v3 = vmax.f32 %v7295_v45, 0.0  ;;  %v3873_v5 = vmax.f32 %v7359_v47, 0.0 }
 0x389   :  { %v3872_v12 = vmax.f32 %v7296_v53, 0.0  ;;  %v3874_v13 = vmax.f32 %v7360_v54, 0.0 }
 0x38a   :  { %v3939_v14 = vpack.c.bf16 %v3871_v3, %v3867_v0  ;;  %v9305_v15 = vpack.c.bf16 %v3873_v5, %v3869_v1 }
 0x38b   :  { %v3940_v16 = vpack.c.bf16 %v3872_v12, %v3868_v7  ;;  %v9307_v18 = vpack.c.bf16 %v3874_v13, %v3870_v10  ;;  %v2974_v21 = vpop.f32.mrb[60].mxu0  ;;  %v3746_v26 = vpop.f32.mrb[60].mxu1 }
 0x38c   :  { %v7297_v34 = vadd.f32 %v2974_v21, %v9120_v57  ;;  %v7361_v31 = vadd.f32 %v3746_v26, %v9122_v58  ;;  %v2976_v33 = vpop.f32.mrb[61].mxu0  ;;  %v3748_v36 = vpop.f32.mrb[61].mxu1  ;;  %v8503_v21 = vld [vmem:[#allocation8 + $0x54] ss:$8 sps:$4 sm:$0xff]   ;;  %v8501_v26 = vld [vmem:[#allocation8 + $0x50] ss:$8 sps:$4 sm:$0xff]  }
 0x38d   :  { %v7298_v38 = vadd.f32 %v2976_v33, %v9125_v59  ;;  %v7362_v39 = vadd.f32 %v3748_v36, %v9127_v60  ;;  %v2978_v40 = vpop.f32.mrb[62].mxu0  ;;  %v3750_v41 = vpop.f32.mrb[62].mxu1  ;;  %4515 = vmatprep.mubr.bf16.mxu0 %v3940_v16  ;;  %v8509_v33 = vld [vmem:[#allocation8 + $0x74] ss:$8 sps:$4 sm:$0xff]   ;;  %v8507_v36 = vld [vmem:[#allocation8 + $0x70] ss:$8 sps:$4 sm:$0xff]  }
 0x38e   :  { %v7299_v45 = vadd.f32 %v2978_v40, %v9120_v57  ;;  %v7363_v47 = vadd.f32 %v3750_v41, %v9122_v58  ;;  %v2980_v48 = vpop.f32.mrb[63].mxu0  ;;  %v3752_v50 = vpop.f32.mrb[63].mxu1  ;;  %4516 = vmatmul.mubr.bf16.gmra.mrb[120].mxu0 %v3939_v14  ;;  %v3875_v0 = vmax.f32 %v7297_v34, 0.0  ;;  %v3877_v1 = vmax.f32 %v7361_v31, 0.0  ;;  %v8506_v34 = vld [vmem:[#allocation8 + $0x64] ss:$8 sps:$4 sm:$0xff]  }
 0x38f   :  { %v7300_v53 = vadd.f32 %v2980_v48, %v9125_v59  ;;  %v7364_v54 = vadd.f32 %v3752_v50, %v9127_v60  ;;  %v3876_v7 = vmax.f32 %v7298_v38, 0.0  ;;  %v3878_v10 = vmax.f32 %v7362_v39, 0.0  ;;  %v8498_v59 = vld [vmem:[#allocation8 + $0x40] ss:$8 sps:$4 sm:$0xff]   ;;  %v8500_v60 = vld [vmem:[#allocation8 + $0x44] ss:$8 sps:$4 sm:$0xff]  }
 0x390   :  { %v3879_v3 = vmax.f32 %v7299_v45, 0.0  ;;  %v3881_v5 = vmax.f32 %v7363_v47, 0.0  ;;  %5037 = vmatprep.subr.bf16.mxu1 %v8500_v60  ;;  %v8504_v31 = vld [vmem:[#allocation8 + $0x60] ss:$8 sps:$4 sm:$0xff]   ;;  %v8512_v38 = vld [vmem:[#allocation8 + $0x84] ss:$8 sps:$4 sm:$0xff]  }
 0x391   :  { %v3880_v12 = vmax.f32 %v7300_v53, 0.0  ;;  %v3882_v13 = vmax.f32 %v7364_v54, 0.0  ;;  %5038 = vmatpush1.bf16.msra.mxu1 %v8498_v59  ;;  %v8515_v39 = vld [vmem:[#allocation8 + $0x94] ss:$8 sps:$4 sm:$0xff]   ;;  %v8513_v40 = vld [vmem:[#allocation8 + $0x90] ss:$8 sps:$4 sm:$0xff]  }
 0x392   :  { %v3943_v57 = vpack.c.bf16 %v3879_v3, %v3875_v0  ;;  %v9317_v58 = vpack.c.bf16 %v3881_v5, %v3877_v1  ;;  %5039 = vmatprep.subr.bf16.mxu1 %v8503_v21  ;;  %v8516_v41 = vld [vmem:[#allocation8 + $0xa0] ss:$8 sps:$4 sm:$0xff]   ;;  %v8519_v45 = vld [vmem:[#allocation8 + $0xb0] ss:$8 sps:$4 sm:$0xff]  }
 0x393   :  { %v3944_v14 = vpack.c.bf16 %v3880_v12, %v3876_v7  ;;  %v9319_v16 = vpack.c.bf16 %v3882_v13, %v3878_v10  ;;  %v8522_v47 = vld [vmem:[#allocation8 + $0xc0] ss:$8 sps:$4 sm:$0xff]   ;;  %v8525_v48 = vld [vmem:[#allocation8 + $0xd0] ss:$8 sps:$4 sm:$0xff]  }
 0x394   :  { %v8528_v50 = vld [vmem:[#allocation8 + $0xe0] ss:$8 sps:$4 sm:$0xff]   ;;  %v8538_v10 = vld [vmem:[#allocation10 + $0x50] sm:$0xff]   ;;  %v8540_v21 = vld [vmem:[#allocation10 + $0x58] sm:$0xff]  }
 0x395   :  { %4525 = vmatprep.mubr.bf16.mxu0 %v3944_v14  ;;  %5040 = vmatpush1.bf16.msra.mxu1 %v8501_v26  ;;  %v8536_v53 = vld [vmem:[#allocation10 + $0x48] sm:$0xff]  }
 0x396   :  { %4526 = vmatmul.mubr.bf16.gmra.mrb[124].mxu0 %v3943_v57  ;;  %5041 = vmatprep.subr.bf16.mxu1 %v8506_v34  ;;  %v8537_v3 = vld [vmem:[#allocation10 + $0x8] sm:$0xff]  }
 0x397   :  { %4568 = vmatprep.mubr.bf16.mxu0 %v9139_v24  ;;  %v8510_v24 = vld [vmem:[#allocation8 + $0x80] ss:$8 sps:$4 sm:$0xff]  }
 0x399   :  { %5042 = vmatpush1.bf16.msra.mxu1 %v8504_v31 }
 0x39a   :  { %5043 = vmatprep.subr.bf16.mxu1 %v8509_v33 }
 0x39d   :  { %5044 = vmatpush1.bf16.msra.mxu1 %v8507_v36 }
 0x39e   :  { %4569 = vmatmul.mubr.bf16.vlgmr.msra.gmra.mrb[64].mxu0 %v9137_v22  ;;  %5045 = vmatprep.subr.bf16.mxu1 %v8512_v38  ;;  %v8518_v22 = vld [vmem:[#allocation8 + $0xa4] ss:$8 sps:$4 sm:$0xff]   ;;  %v8541_v38 = vld [vmem:[#allocation10 + $0x18] sm:$0xff]  }
 0x39f   :  { %4578 = vmatprep.mubr.bf16.mxu0 %v9151_v62  ;;  %v8521_v62 = vld [vmem:[#allocation8 + $0xb4] ss:$8 sps:$4 sm:$0xff]  }
 0x3a1   :  { %5046 = vmatpush1.bf16.msra.mxu1 %v8510_v24 }
 0x3a2   :  { %5047 = vmatprep.subr.bf16.mxu1 %v8515_v39 }
 0x3a5   :  { %5048 = vmatpush1.bf16.msra.mxu1 %v8513_v40  ;;  %v8542_v40 = vld [vmem:[#allocation10 + $0x60] sm:$0xff]  }
 0x3a6   :  { %4579 = vmatmul.mubr.bf16.gmra.mrb[68].mxu0 %v9149_v56  ;;  %5049 = vmatprep.subr.bf16.mxu1 %v8518_v22  ;;  %v8524_v56 = vld [vmem:[#allocation8 + $0xc4] ss:$8 sps:$4 sm:$0xff]  }
 0x3a7   :  { %4588 = vmatprep.mubr.bf16.mxu0 %v9163_v32  ;;  %v8527_v32 = vld [vmem:[#allocation8 + $0xd4] ss:$8 sps:$4 sm:$0xff]  }
 0x3a9   :  { %5050 = vmatpush1.bf16.msra.mxu1 %v8516_v41 }
 0x3aa   :  { %5051 = vmatprep.subr.bf16.mxu1 %v8521_v62 }
 0x3ad   :  { %5052 = vmatpush1.bf16.msra.mxu1 %v8519_v45 }
 0x3ae   :  { %4589 = vmatmul.mubr.bf16.gmra.mrb[72].mxu0 %v9161_v30  ;;  %5053 = vmatprep.subr.bf16.mxu1 %v8524_v56  ;;  %v8530_v30 = vld [vmem:[#allocation8 + $0xe4] ss:$8 sps:$4 sm:$0xff]  }
 0x3af   :  { %4598 = vmatprep.mubr.bf16.mxu0 %v9175_v8  ;;  %v8531_v8 = vld [vmem:[#allocation8 + $0xf0] ss:$8 sps:$4 sm:$0xff]  }
 0x3b1   :  { %5054 = vmatpush1.bf16.msra.mxu1 %v8522_v47  ;;  %v8543_v47 = vld [vmem:[#allocation10 + $0x20] sm:$0xff]  }
 0x3b2   :  { %5055 = vmatprep.subr.bf16.mxu1 %v8527_v32 }
 0x3b5   :  { %5056 = vmatpush1.bf16.msra.mxu1 %v8525_v48 }
 0x3b6   :  { %4599 = vmatmul.mubr.bf16.gmra.mrb[76].mxu0 %v9173_v6  ;;  %5057 = vmatprep.subr.bf16.mxu1 %v8530_v30  ;;  %v8533_v6 = vld [vmem:[#allocation8 + $0xf4] ss:$8 sps:$4 sm:$0xff]   ;;  %v8544_v30 = vld [vmem:[#allocation10 + $0x68] sm:$0xff]  }
 0x3b7   :  { %4608 = vmatprep.mubr.bf16.mxu0 %v9187_v44  ;;  %v4011_v44 = vld [vmem:[%s9885_s4] sm:$0x3] }
 0x3b9   :  { %5058 = vmatpush1.bf16.msra.mxu1 %v8528_v50 }
 0x3ba   :  { %5059 = vmatprep.subr.bf16.mxu1 %v8533_v6 }
 0x3bd   :  { %5060 = vmatpush1.bf16.msra.mxu1 %v8531_v8 }
 0x3be   :  { %4609 = vmatmul.mubr.bf16.gmra.mrb[80].mxu0 %v9185_v42  ;;  %v8534_v42 = vld [vmem:[#allocation10 + $0x40] sm:$0xff]  }
 0x3bf   :  { %4618 = vmatprep.mubr.bf16.mxu0 %v9199_v23  ;;  %6981 = vmatprep.subr.bf16.mxu1 %v8534_v42  ;;  %v9360_v23 = vrot.slane %v4011_v44, %v9117_v55 }
 0x3c6   :  { %4619 = vmatmul.mubr.bf16.gmra.mrb[84].mxu0 %v9197_v20  ;;  %v9357_v20 = vrot.slane %v4011_v44, %v9112_v52 }
 0x3c7   :  { %4628 = vmatprep.mubr.bf16.mxu0 %v9211_v4 }
 0x3ce   :  { %4629 = vmatmul.mubr.bf16.gmra.mrb[88].mxu0 %v9209_v2 }
 0x3cf   :  { %4638 = vmatprep.mubr.bf16.mxu0 %v9223_v46 }
 0x3d6   :  { %4639 = vmatmul.mubr.bf16.gmra.mrb[92].mxu0 %v9221_v43 }
 0x3d7   :  { %4648 = vmatprep.mubr.bf16.mxu0 %v9235_v29 }
 0x3de   :  { %4649 = vmatmul.mubr.bf16.gmra.mrb[96].mxu0 %v9233_v27 }
 0x3df   :  { %4658 = vmatprep.mubr.bf16.mxu0 %v9247_v11 }
 0x3e6   :  { %4659 = vmatmul.mubr.bf16.gmra.mrb[100].mxu0 %v9245_v9 }
 0x3e7   :  { %4668 = vmatprep.mubr.bf16.mxu0 %v9259_v51 }
 0x3ee   :  { %4669 = vmatmul.mubr.bf16.gmra.mrb[104].mxu0 %v9257_v49 }
 0x3ef   :  { %4678 = vmatprep.mubr.bf16.mxu0 %v9271_v37 }
 0x3f6   :  { %4679 = vmatmul.mubr.bf16.gmra.mrb[108].mxu0 %v9269_v35 }
 0x3f7   :  { %4688 = vmatprep.mubr.bf16.mxu0 %v9283_v28 }
 0x3fe   :  { %4689 = vmatmul.mubr.bf16.gmra.mrb[112].mxu0 %v9281_v25 }
 0x3ff   :  { %4698 = vmatprep.mubr.bf16.mxu0 %v9295_v19  ;;  %v8535_v19 = vld [vmem:[#allocation10] sm:$0xff]  }
 0x406   :  { %4699 = vmatmul.mubr.bf16.gmra.mrb[116].mxu0 %v9293_v17 }
 0x407   :  { %4708 = vmatprep.mubr.bf16.mxu0 %v9307_v18 }
 0x40e   :  { %4709 = vmatmul.mubr.bf16.gmra.mrb[120].mxu0 %v9305_v15 }
 0x40f   :  { %4718 = vmatprep.mubr.bf16.mxu0 %v9319_v16  ;;  %v8539_v16 = vld [vmem:[#allocation10 + $0x10] sm:$0xff]  }
 0x416   :  { %4719 = vmatmul.mubr.bf16.gmra.mrb[124].mxu0 %v9317_v58 }
 0x471   :  { %v4570_v2 = vpop.f32.mrb[64].mxu0 }
 0x472   :  { %v7365_v4 = vadd.f32 %v4570_v2, %v9357_v20  ;;  %v4572_v43 = vpop.f32.mrb[65].mxu0  ;;  %v8545_v2 = vld [vmem:[#allocation10 + $0x28] sm:$0xff]  }
 0x473   :  { %v7366_v46 = vadd.f32 %v4572_v43, %v9360_v23  ;;  %v4574_v27 = vpop.f32.mrb[66].mxu0 }
 0x474   :  { %v7367_v29 = vadd.f32 %v4574_v27, %v9357_v20  ;;  %v4576_v9 = vpop.f32.mrb[67].mxu0  ;;  %v4729_v49 = vmax.f32 %v7365_v4, 0.0 }
 0x475   :  { %v7368_v11 = vadd.f32 %v4576_v9, %v9360_v23  ;;  %v4730_v35 = vmax.f32 %v7366_v46, 0.0  ;;  %v8546_v46 = vld [vmem:[#allocation10 + $0x70] sm:$0xff]  }
 0x476   :  { %v4731_v51 = vmax.f32 %v7367_v29, 0.0 }
 0x477   :  { %v4732_v37 = vmax.f32 %v7368_v11, 0.0 }
 0x478   :  { %v4793_v25 = vpack.c.bf16 %v4731_v51, %v4729_v49  ;;  %v8547_v51 = vld [vmem:[#allocation10 + $0x30] sm:$0xff]  }
 0x479   :  { %v4794_v28 = vpack.c.bf16 %v4732_v37, %v4730_v35  ;;  %v4580_v17 = vpop.f32.mrb[68].mxu0 }
 0x47a   :  { %v7369_v15 = vadd.f32 %v4580_v17, %v9357_v20  ;;  %v4582_v18 = vpop.f32.mrb[69].mxu0 }
 0x47b   :  { %v7370_v54 = vadd.f32 %v4582_v18, %v9360_v23  ;;  %v4584_v61 = vpop.f32.mrb[70].mxu0  ;;  %5061 = vmatprep.mubr.bf16.mxu1 %v4794_v28 }
 0x47c   :  { %v7371_v63 = vadd.f32 %v4584_v61, %v9357_v20  ;;  %v4586_v0 = vpop.f32.mrb[71].mxu0  ;;  %5062 = vmatmul.mubr.bf16.vlgmr.msra.gmra.mrb[64].mxu1 %v4793_v25  ;;  %v4733_v5 = vmax.f32 %v7369_v15, 0.0  ;;  %v8548_v25 = vld [vmem:[#allocation10 + $0x78] sm:$0xff]  }
 0x47d   :  { %v7372_v1 = vadd.f32 %v4586_v0, %v9360_v23  ;;  %6982 = vmatpush3.bf16.msra.mxu1 %v8535_v19  ;;  %v4734_v12 = vmax.f32 %v7370_v54, 0.0 }
 0x47e   :  { %v4735_v7 = vmax.f32 %v7371_v63, 0.0  ;;  %6983 = vmatprep.subr.bf16.mxu1 %v8536_v53  ;;  %v8549_v53 = vld [vmem:[#allocation10 + $0x38] sm:$0xff]  }
 0x47f   :  { %v4736_v13 = vmax.f32 %v7372_v1, 0.0 }
 0x480   :  { %v4795_v57 = vpack.c.bf16 %v4735_v7, %v4733_v5 }
 0x481   :  { %v4796_v58 = vpack.c.bf16 %v4736_v13, %v4734_v12  ;;  %v4590_v14 = vpop.f32.mrb[72].mxu0  ;;  %6984 = vmatpush3.bf16.msra.mxu1 %v8537_v3 }
 0x482   :  { %v7373_v59 = vadd.f32 %v4590_v14, %v9357_v20  ;;  %v4592_v60 = vpop.f32.mrb[73].mxu0  ;;  %6985 = vmatprep.subr.bf16.mxu1 %v8538_v10 }
 0x483   :  { %v7374_v26 = vadd.f32 %v4592_v60, %v9360_v23  ;;  %v4594_v34 = vpop.f32.mrb[74].mxu0  ;;  %5071 = vmatprep.mubr.bf16.mxu1 %v4796_v58 }
 0x484   :  { %v7375_v31 = vadd.f32 %v4594_v34, %v9357_v20  ;;  %v4596_v33 = vpop.f32.mrb[75].mxu0  ;;  %5072 = vmatmul.mubr.bf16.gmra.mrb[68].mxu1 %v4795_v57  ;;  %v4737_v24 = vmax.f32 %v7373_v59, 0.0 }
 0x485   :  { %v7376_v36 = vadd.f32 %v4596_v33, %v9360_v23  ;;  %6986 = vmatpush3.bf16.msra.mxu1 %v8539_v16  ;;  %v4738_v22 = vmax.f32 %v7374_v26, 0.0 }
 0x486   :  { %v4739_v39 = vmax.f32 %v7375_v31, 0.0  ;;  %6987 = vmatprep.subr.bf16.mxu1 %v8540_v21 }
 0x487   :  { %v4740_v41 = vmax.f32 %v7376_v36, 0.0 }
 0x488   :  { %v4797_v62 = vpack.c.bf16 %v4739_v39, %v4737_v24 }
 0x489   :  { %v4798_v45 = vpack.c.bf16 %v4740_v41, %v4738_v22  ;;  %v4600_v56 = vpop.f32.mrb[76].mxu0  ;;  %6988 = vmatpush3.bf16.msra.mxu1 %v8541_v38 }
 0x48a   :  { %v7377_v32 = vadd.f32 %v4600_v56, %v9357_v20  ;;  %v4602_v48 = vpop.f32.mrb[77].mxu0  ;;  %6989 = vmatprep.subr.bf16.mxu1 %v8542_v40 }
 0x48b   :  { %v7378_v50 = vadd.f32 %v4602_v48, %v9360_v23  ;;  %v4604_v6 = vpop.f32.mrb[78].mxu0  ;;  %5081 = vmatprep.mubr.bf16.mxu1 %v4798_v45 }
 0x48c   :  { %v7379_v8 = vadd.f32 %v4604_v6, %v9357_v20  ;;  %v4606_v42 = vpop.f32.mrb[79].mxu0  ;;  %5082 = vmatmul.mubr.bf16.gmra.mrb[72].mxu1 %v4797_v62  ;;  %v4741_v4 = vmax.f32 %v7377_v32, 0.0 }
 0x48d   :  { %v7380_v44 = vadd.f32 %v4606_v42, %v9360_v23  ;;  %6990 = vmatpush3.bf16.msra.mxu1 %v8543_v47  ;;  %v4742_v27 = vmax.f32 %v7378_v50, 0.0 }
 0x48e   :  { %v4743_v43 = vmax.f32 %v7379_v8, 0.0  ;;  %6991 = vmatprep.subr.bf16.mxu1 %v8544_v30 }
 0x48f   :  { %v4744_v29 = vmax.f32 %v7380_v44, 0.0 }
 0x490   :  { %v4799_v9 = vpack.c.bf16 %v4743_v43, %v4741_v4 }
 0x491   :  { %v4800_v11 = vpack.c.bf16 %v4744_v29, %v4742_v27  ;;  %v4610_v49 = vpop.f32.mrb[80].mxu0  ;;  %6992 = vmatpush3.bf16.msra.mxu1 %v8545_v2 }
 0x492   :  { %v7381_v35 = vadd.f32 %v4610_v49, %v9357_v20  ;;  %v4612_v37 = vpop.f32.mrb[81].mxu0  ;;  %6993 = vmatprep.subr.bf16.mxu1 %v8546_v46 }
 0x493   :  { %v7382_v28 = vadd.f32 %v4612_v37, %v9360_v23  ;;  %v4614_v17 = vpop.f32.mrb[82].mxu0  ;;  %5091 = vmatprep.mubr.bf16.mxu1 %v4800_v11 }
 0x494   :  { %v7383_v19 = vadd.f32 %v4614_v17, %v9357_v20  ;;  %v4616_v15 = vpop.f32.mrb[83].mxu0  ;;  %5092 = vmatmul.mubr.bf16.gmra.mrb[76].mxu1 %v4799_v9  ;;  %v4745_v54 = vmax.f32 %v7381_v35, 0.0 }
 0x495   :  { %v7384_v18 = vadd.f32 %v4616_v15, %v9360_v23  ;;  %6994 = vmatpush3.bf16.msra.mxu1 %v8547_v51  ;;  %v4746_v63 = vmax.f32 %v7382_v28, 0.0 }
 0x496   :  { %v4747_v61 = vmax.f32 %v7383_v19, 0.0  ;;  %6995 = vmatprep.subr.bf16.mxu1 %v8548_v25 }
 0x497   :  { %v4748_v0 = vmax.f32 %v7384_v18, 0.0 }
 0x498   :  { %v4801_v1 = vpack.c.bf16 %v4747_v61, %v4745_v54 }
 0x499   :  { %v4802_v3 = vpack.c.bf16 %v4748_v0, %v4746_v63  ;;  %v4620_v5 = vpop.f32.mrb[84].mxu0  ;;  %6996 = vmatpush3.bf16.msra.mxu1 %v8549_v53 }
 0x49a   :  { %v7385_v7 = vadd.f32 %v4620_v5, %v9357_v20  ;;  %v4622_v10 = vpop.f32.mrb[85].mxu0 }
 0x49b   :  { %v7386_v12 = vadd.f32 %v4622_v10, %v9360_v23  ;;  %v4624_v13 = vpop.f32.mrb[86].mxu0  ;;  %5101 = vmatprep.mubr.bf16.mxu1 %v4802_v3 }
 0x49c   :  { %v7387_v57 = vadd.f32 %v4624_v13, %v9357_v20  ;;  %v4626_v58 = vpop.f32.mrb[87].mxu0  ;;  %5102 = vmatmul.mubr.bf16.gmra.mrb[80].mxu1 %v4801_v1  ;;  %v4749_v16 = vmax.f32 %v7385_v7, 0.0 }
 0x49d   :  { %v7388_v14 = vadd.f32 %v4626_v58, %v9360_v23  ;;  %v4750_v60 = vmax.f32 %v7386_v12, 0.0 }
 0x49e   :  { %v4751_v59 = vmax.f32 %v7387_v57, 0.0 }
 0x49f   :  { %v4752_v21 = vmax.f32 %v7388_v14, 0.0 }
 0x4a0   :  { %v4803_v26 = vpack.c.bf16 %v4751_v59, %v4749_v16 }
 0x4a1   :  { %v4804_v34 = vpack.c.bf16 %v4752_v21, %v4750_v60  ;;  %v4630_v31 = vpop.f32.mrb[88].mxu0 }
 0x4a2   :  { %v7389_v33 = vadd.f32 %v4630_v31, %v9357_v20  ;;  %v4632_v36 = vpop.f32.mrb[89].mxu0 }
 0x4a3   :  { %v7390_v38 = vadd.f32 %v4632_v36, %v9360_v23  ;;  %v4634_v24 = vpop.f32.mrb[90].mxu0  ;;  %5111 = vmatprep.mubr.bf16.mxu1 %v4804_v34 }
 0x4a4   :  { %v7391_v39 = vadd.f32 %v4634_v24, %v9357_v20  ;;  %v4636_v40 = vpop.f32.mrb[91].mxu0  ;;  %5112 = vmatmul.mubr.bf16.gmra.mrb[84].mxu1 %v4803_v26  ;;  %v4753_v41 = vmax.f32 %v7389_v33, 0.0 }
 0x4a5   :  { %v7392_v22 = vadd.f32 %v4636_v40, %v9360_v23  ;;  %v4754_v45 = vmax.f32 %v7390_v38, 0.0 }
 0x4a6   :  { %v4755_v62 = vmax.f32 %v7391_v39, 0.0 }
 0x4a7   :  { %v4756_v56 = vmax.f32 %v7392_v22, 0.0 }
 0x4a8   :  { %v4805_v47 = vpack.c.bf16 %v4755_v62, %v4753_v41 }
 0x4a9   :  { %v4806_v32 = vpack.c.bf16 %v4756_v56, %v4754_v45  ;;  %v4640_v48 = vpop.f32.mrb[92].mxu0 }
 0x4aa   :  { %v7393_v30 = vadd.f32 %v4640_v48, %v9357_v20  ;;  %v4642_v50 = vpop.f32.mrb[93].mxu0 }
 0x4ab   :  { %v7394_v6 = vadd.f32 %v4642_v50, %v9360_v23  ;;  %v4644_v8 = vpop.f32.mrb[94].mxu0  ;;  %5121 = vmatprep.mubr.bf16.mxu1 %v4806_v32 }
 0x4ac   :  { %v7395_v42 = vadd.f32 %v4644_v8, %v9357_v20  ;;  %v4646_v44 = vpop.f32.mrb[95].mxu0  ;;  %5122 = vmatmul.mubr.bf16.gmra.mrb[88].mxu1 %v4805_v47  ;;  %v4757_v4 = vmax.f32 %v7393_v30, 0.0 }
 0x4ad   :  { %v7396_v2 = vadd.f32 %v4646_v44, %v9360_v23  ;;  %v4758_v46 = vmax.f32 %v7394_v6, 0.0 }
 0x4ae   :  { %v4759_v43 = vmax.f32 %v7395_v42, 0.0 }
 0x4af   :  { %v4760_v27 = vmax.f32 %v7396_v2, 0.0 }
 0x4b0   :  { %v4807_v29 = vpack.c.bf16 %v4759_v43, %v4757_v4 }
 0x4b1   :  { %v4808_v9 = vpack.c.bf16 %v4760_v27, %v4758_v46  ;;  %v4650_v11 = vpop.f32.mrb[96].mxu0 }
 0x4b2   :  { %v7397_v49 = vadd.f32 %v4650_v11, %v9357_v20  ;;  %v4652_v51 = vpop.f32.mrb[97].mxu0 }
 0x4b3   :  { %v7398_v35 = vadd.f32 %v4652_v51, %v9360_v23  ;;  %v4654_v37 = vpop.f32.mrb[98].mxu0  ;;  %5131 = vmatprep.mubr.bf16.mxu1 %v4808_v9 }
 0x4b4   :  { %v7399_v25 = vadd.f32 %v4654_v37, %v9357_v20  ;;  %v4656_v28 = vpop.f32.mrb[99].mxu0  ;;  %5132 = vmatmul.mubr.bf16.gmra.mrb[92].mxu1 %v4807_v29  ;;  %v4761_v19 = vmax.f32 %v7397_v49, 0.0 }
 0x4b5   :  { %v7400_v17 = vadd.f32 %v4656_v28, %v9360_v23  ;;  %v4762_v18 = vmax.f32 %v7398_v35, 0.0 }
 0x4b6   :  { %v4763_v15 = vmax.f32 %v7399_v25, 0.0 }
 0x4b7   :  { %v4764_v53 = vmax.f32 %v7400_v17, 0.0 }
 0x4b8   :  { %v4809_v54 = vpack.c.bf16 %v4763_v15, %v4761_v19 }
 0x4b9   :  { %v4810_v61 = vpack.c.bf16 %v4764_v53, %v4762_v18  ;;  %v4660_v63 = vpop.f32.mrb[100].mxu0 }
 0x4ba   :  { %v7401_v0 = vadd.f32 %v4660_v63, %v9357_v20  ;;  %v4662_v1 = vpop.f32.mrb[101].mxu0 }
 0x4bb   :  { %v7402_v3 = vadd.f32 %v4662_v1, %v9360_v23  ;;  %v4664_v5 = vpop.f32.mrb[102].mxu0  ;;  %5141 = vmatprep.mubr.bf16.mxu1 %v4810_v61 }
 0x4bc   :  { %v7403_v7 = vadd.f32 %v4664_v5, %v9357_v20  ;;  %v4666_v10 = vpop.f32.mrb[103].mxu0  ;;  %5142 = vmatmul.mubr.bf16.gmra.mrb[96].mxu1 %v4809_v54  ;;  %v4765_v13 = vmax.f32 %v7401_v0, 0.0 }
 0x4bd   :  { %v7404_v12 = vadd.f32 %v4666_v10, %v9360_v23  ;;  %v4766_v58 = vmax.f32 %v7402_v3, 0.0 }
 0x4be   :  { %v4767_v57 = vmax.f32 %v7403_v7, 0.0 }
 0x4bf   :  { %v4768_v14 = vmax.f32 %v7404_v12, 0.0 }
 0x4c0   :  { %v4811_v16 = vpack.c.bf16 %v4767_v57, %v4765_v13 }
 0x4c1   :  { %v4812_v59 = vpack.c.bf16 %v4768_v14, %v4766_v58  ;;  %v4670_v60 = vpop.f32.mrb[104].mxu0 }
 0x4c2   :  { %v7405_v21 = vadd.f32 %v4670_v60, %v9357_v20  ;;  %v4672_v26 = vpop.f32.mrb[105].mxu0 }
 0x4c3   :  { %v7406_v34 = vadd.f32 %v4672_v26, %v9360_v23  ;;  %v4674_v31 = vpop.f32.mrb[106].mxu0  ;;  %5151 = vmatprep.mubr.bf16.mxu1 %v4812_v59 }
 0x4c4   :  { %v7407_v33 = vadd.f32 %v4674_v31, %v9357_v20  ;;  %v4676_v36 = vpop.f32.mrb[107].mxu0  ;;  %5152 = vmatmul.mubr.bf16.gmra.mrb[100].mxu1 %v4811_v16  ;;  %v4769_v24 = vmax.f32 %v7405_v21, 0.0 }
 0x4c5   :  { %v7408_v38 = vadd.f32 %v4676_v36, %v9360_v23  ;;  %v4770_v40 = vmax.f32 %v7406_v34, 0.0 }
 0x4c6   :  { %v4771_v39 = vmax.f32 %v7407_v33, 0.0 }
 0x4c7   :  { %v4772_v22 = vmax.f32 %v7408_v38, 0.0 }
 0x4c8   :  { %v4813_v41 = vpack.c.bf16 %v4771_v39, %v4769_v24 }
 0x4c9   :  { %v4814_v62 = vpack.c.bf16 %v4772_v22, %v4770_v40  ;;  %v4680_v45 = vpop.f32.mrb[108].mxu0 }
 0x4ca   :  { %v7409_v56 = vadd.f32 %v4680_v45, %v9357_v20  ;;  %v4682_v47 = vpop.f32.mrb[109].mxu0 }
 0x4cb   :  { %v7410_v32 = vadd.f32 %v4682_v47, %v9360_v23  ;;  %v4684_v48 = vpop.f32.mrb[110].mxu0  ;;  %5161 = vmatprep.mubr.bf16.mxu1 %v4814_v62 }
 0x4cc   :  { %v7411_v30 = vadd.f32 %v4684_v48, %v9357_v20  ;;  %v4686_v50 = vpop.f32.mrb[111].mxu0  ;;  %5162 = vmatmul.mubr.bf16.gmra.mrb[104].mxu1 %v4813_v41  ;;  %v4773_v8 = vmax.f32 %v7409_v56, 0.0 }
 0x4cd   :  { %v7412_v6 = vadd.f32 %v4686_v50, %v9360_v23  ;;  %v4774_v44 = vmax.f32 %v7410_v32, 0.0 }
 0x4ce   :  { %v4775_v42 = vmax.f32 %v7411_v30, 0.0 }
 0x4cf   :  { %v4776_v2 = vmax.f32 %v7412_v6, 0.0 }
 0x4d0   :  { %v4815_v4 = vpack.c.bf16 %v4775_v42, %v4773_v8 }
 0x4d1   :  { %v4816_v43 = vpack.c.bf16 %v4776_v2, %v4774_v44  ;;  %v4690_v46 = vpop.f32.mrb[112].mxu0  ;;  %v4857_v44 = vld [vmem:[%s9887_s6] sm:$0x3] }
 0x4d2   :  { %v7413_v27 = vadd.f32 %v4690_v46, %v9357_v20  ;;  %v4692_v29 = vpop.f32.mrb[113].mxu0  ;;  %v9430_v2 = vrot.slane %v4857_v44, %v9112_v52 }
 0x4d3   :  { %v7414_v9 = vadd.f32 %v4692_v29, %v9360_v23  ;;  %v4694_v11 = vpop.f32.mrb[114].mxu0  ;;  %5171 = vmatprep.mubr.bf16.mxu1 %v4816_v43 }
 0x4d4   :  { %v7415_v49 = vadd.f32 %v4694_v11, %v9357_v20  ;;  %v4696_v51 = vpop.f32.mrb[115].mxu0  ;;  %5172 = vmatmul.mubr.bf16.gmra.mrb[108].mxu1 %v4815_v4  ;;  %v4777_v37 = vmax.f32 %v7413_v27, 0.0  ;;  %v8550_v11 = vld [vmem:[#allocation11] sm:$0xff]  }
 0x4d5   :  { %v7416_v35 = vadd.f32 %v4696_v51, %v9360_v23  ;;  %v4778_v28 = vmax.f32 %v7414_v9, 0.0  ;;  %7141 = vmatprep.subr.bf16.mxu0 %v8550_v11 }
 0x4d6   :  { %v4779_v25 = vmax.f32 %v7415_v49, 0.0  ;;  %v8551_v49 = vld [vmem:[#allocation11 + $0x8] sm:$0xff]   ;;  %7142 = vmatpush3.bf16.msra.mxu0 %v8550_v11 }
 0x4d7   :  { %v4780_v17 = vmax.f32 %v7416_v35, 0.0  ;;  %7143 = vmatprep.subr.bf16.mxu0 %v8551_v49 }
 0x4d8   :  { %v4817_v19 = vpack.c.bf16 %v4779_v25, %v4777_v37 }
 0x4d9   :  { %v4818_v15 = vpack.c.bf16 %v4780_v17, %v4778_v28  ;;  %v4700_v18 = vpop.f32.mrb[116].mxu0  ;;  %v8552_v28 = vld [vmem:[#allocation11 + $0x10] sm:$0xff]  }
 0x4da   :  { %v7417_v53 = vadd.f32 %v4700_v18, %v9357_v20  ;;  %v4702_v54 = vpop.f32.mrb[117].mxu0  ;;  %7144 = vmatpush3.bf16.msra.mxu0 %v8551_v49 }
 0x4db   :  { %v7418_v61 = vadd.f32 %v4702_v54, %v9360_v23  ;;  %v4704_v63 = vpop.f32.mrb[118].mxu0  ;;  %5181 = vmatprep.mubr.bf16.mxu1 %v4818_v15  ;;  %7145 = vmatprep.subr.bf16.mxu0 %v8552_v28 }
 0x4dc   :  { %v7419_v0 = vadd.f32 %v4704_v63, %v9357_v20  ;;  %v4706_v1 = vpop.f32.mrb[119].mxu0  ;;  %5182 = vmatmul.mubr.bf16.gmra.mrb[112].mxu1 %v4817_v19  ;;  %v4781_v5 = vmax.f32 %v7417_v53, 0.0 }
 0x4dd   :  { %v7420_v3 = vadd.f32 %v4706_v1, %v9360_v23  ;;  %v4782_v10 = vmax.f32 %v7418_v61, 0.0 }
 0x4de   :  { %v4783_v7 = vmax.f32 %v7419_v0, 0.0  ;;  %v8553_v0 = vld [vmem:[#allocation11 + $0x18] sm:$0xff]   ;;  %7146 = vmatpush3.bf16.msra.mxu0 %v8552_v28 }
 0x4df   :  { %v4784_v12 = vmax.f32 %v7420_v3, 0.0  ;;  %7147 = vmatprep.subr.bf16.mxu0 %v8553_v0 }
 0x4e0   :  { %v4819_v13 = vpack.c.bf16 %v4783_v7, %v4781_v5 }
 0x4e1   :  { %v4820_v57 = vpack.c.bf16 %v4784_v12, %v4782_v10  ;;  %v4710_v58 = vpop.f32.mrb[120].mxu0 }
 0x4e2   :  { %v7421_v14 = vadd.f32 %v4710_v58, %v9357_v20  ;;  %v4712_v16 = vpop.f32.mrb[121].mxu0  ;;  %7148 = vmatpush3.bf16.msra.mxu0 %v8553_v0 }
 0x4e3   :  { %v7422_v59 = vadd.f32 %v4712_v16, %v9360_v23  ;;  %v4714_v60 = vpop.f32.mrb[122].mxu0  ;;  %5191 = vmatprep.mubr.bf16.mxu1 %v4820_v57 }
 0x4e4   :  { %v7423_v21 = vadd.f32 %v4714_v60, %v9357_v20  ;;  %v4716_v26 = vpop.f32.mrb[123].mxu0  ;;  %5192 = vmatmul.mubr.bf16.gmra.mrb[116].mxu1 %v4819_v13  ;;  %v4785_v31 = vmax.f32 %v7421_v14, 0.0 }
 0x4e5   :  { %v7424_v34 = vadd.f32 %v4716_v26, %v9360_v23  ;;  %v4786_v36 = vmax.f32 %v7422_v59, 0.0 }
 0x4e6   :  { %v4787_v33 = vmax.f32 %v7423_v21, 0.0 }
 0x4e7   :  { %v4788_v38 = vmax.f32 %v7424_v34, 0.0 }
 0x4e8   :  { %v4821_v24 = vpack.c.bf16 %v4787_v33, %v4785_v31 }
 0x4e9   :  { %v4822_v39 = vpack.c.bf16 %v4788_v38, %v4786_v36  ;;  %v4720_v40 = vpop.f32.mrb[124].mxu0 }
 0x4ea   :  { %v7425_v22 = vadd.f32 %v4720_v40, %v9357_v20  ;;  %v4722_v41 = vpop.f32.mrb[125].mxu0 }
 0x4eb   :  { %v7426_v62 = vadd.f32 %v4722_v41, %v9360_v23  ;;  %v4724_v45 = vpop.f32.mrb[126].mxu0  ;;  %5201 = vmatprep.mubr.bf16.mxu1 %v4822_v39 }
 0x4ec   :  { %v7427_v56 = vadd.f32 %v4724_v45, %v9357_v20  ;;  %v4726_v47 = vpop.f32.mrb[127].mxu0  ;;  %5202 = vmatmul.mubr.bf16.gmra.mrb[120].mxu1 %v4821_v24  ;;  %v4789_v48 = vmax.f32 %v7425_v22, 0.0  ;;  %v9433_v20 = vrot.slane %v4857_v44, %v9117_v55 }
 0x4ed   :  { %v7428_v32 = vadd.f32 %v4726_v47, %v9360_v23  ;;  %v4790_v50 = vmax.f32 %v7426_v62, 0.0 }
 0x4ee   :  { %v4791_v30 = vmax.f32 %v7427_v56, 0.0 }
 0x4ef   :  { %v4792_v6 = vmax.f32 %v7428_v32, 0.0 }
 0x4f0   :  { %v4823_v8 = vpack.c.bf16 %v4791_v30, %v4789_v48 }
 0x4f1   :  { %v4824_v42 = vpack.c.bf16 %v4792_v6, %v4790_v50 }
 0x4f3   :  { %5211 = vmatprep.mubr.bf16.mxu1 %v4824_v42 }
 0x4f4   :  { %5212 = vmatmul.mubr.bf16.gmra.mrb[124].mxu1 %v4823_v8 }
 0x54f   :  { %v5063_v4 = vpop.f32.mrb[64].mxu1 }
 0x550   :  { %v5064_v23 = vadd.f32 %v5063_v4, %v9430_v2  ;;  %v5065_v43 = vpop.f32.mrb[65].mxu1 }
 0x551   :  { %v5066_v46 = vadd.f32 %v5065_v43, %v9433_v20  ;;  %v5067_v27 = vpop.f32.mrb[66].mxu1 }
 0x552   :  { %v5068_v29 = vadd.f32 %v5067_v27, %v9430_v2  ;;  %v5069_v9 = vpop.f32.mrb[67].mxu1  ;;  %v5222_v35 = vmax.f32 %v5064_v23, 0.0 }
 0x553   :  { %v5070_v51 = vadd.f32 %v5069_v9, %v9433_v20  ;;  %v5223_v37 = vmax.f32 %v5066_v46, 0.0 }
 0x554   :  { %v5224_v52 = vmax.f32 %v5068_v29, 0.0 }
 0x555   :  { %v5225_v55 = vmax.f32 %v5070_v51, 0.0 }
 0x556   :  { %v5286_v25 = vpack.c.bf16 %v5224_v52, %v5222_v35 }
 0x557   :  { %v5287_v17 = vpack.c.bf16 %v5225_v55, %v5223_v37  ;;  %v5073_v19 = vpop.f32.mrb[68].mxu1 }
 0x558   :  { %v5074_v15 = vadd.f32 %v5073_v19, %v9430_v2  ;;  %v5075_v18 = vpop.f32.mrb[69].mxu1 }
 0x559   :  { %v5076_v53 = vadd.f32 %v5075_v18, %v9433_v20  ;;  %v5077_v54 = vpop.f32.mrb[70].mxu1  ;;  %5485 = vmatprep.mubr.bf16.mxu1 %v5287_v17 }
 0x55a   :  { %v5078_v61 = vadd.f32 %v5077_v54, %v9430_v2  ;;  %v5079_v63 = vpop.f32.mrb[71].mxu1  ;;  %5486 = vmatmul.mubr.bf16.vlgmr.msra.gmra.mrb[128].mxu1 %v5286_v25  ;;  %v5226_v3 = vmax.f32 %v5074_v15, 0.0 }
 0x55b   :  { %v5080_v1 = vadd.f32 %v5079_v63, %v9433_v20  ;;  %v5227_v7 = vmax.f32 %v5076_v53, 0.0 }
 0x55c   :  { %v5228_v5 = vmax.f32 %v5078_v61, 0.0 }
 0x55d   :  { %v5229_v10 = vmax.f32 %v5080_v1, 0.0 }
 0x55e   :  { %v5288_v12 = vpack.c.bf16 %v5228_v5, %v5226_v3 }
 0x55f   :  { %v5289_v13 = vpack.c.bf16 %v5229_v10, %v5227_v7  ;;  %v5083_v57 = vpop.f32.mrb[72].mxu1 }
 0x560   :  { %v5084_v58 = vadd.f32 %v5083_v57, %v9430_v2  ;;  %v5085_v14 = vpop.f32.mrb[73].mxu1 }
 0x561   :  { %v5086_v16 = vadd.f32 %v5085_v14, %v9433_v20  ;;  %v5087_v59 = vpop.f32.mrb[74].mxu1  ;;  %5493 = vmatprep.mubr.bf16.mxu1 %v5289_v13 }
 0x562   :  { %v5088_v60 = vadd.f32 %v5087_v59, %v9430_v2  ;;  %v5089_v21 = vpop.f32.mrb[75].mxu1  ;;  %5494 = vmatmul.mubr.bf16.gmra.mrb[132].mxu1 %v5288_v12  ;;  %v5230_v34 = vmax.f32 %v5084_v58, 0.0 }
 0x563   :  { %v5090_v26 = vadd.f32 %v5089_v21, %v9433_v20  ;;  %v5231_v33 = vmax.f32 %v5086_v16, 0.0 }
 0x564   :  { %v5232_v31 = vmax.f32 %v5088_v60, 0.0 }
 0x565   :  { %v5233_v36 = vmax.f32 %v5090_v26, 0.0 }
 0x566   :  { %v5290_v38 = vpack.c.bf16 %v5232_v31, %v5230_v34 }
 0x567   :  { %v5291_v24 = vpack.c.bf16 %v5233_v36, %v5231_v33  ;;  %v5093_v39 = vpop.f32.mrb[76].mxu1 }
 0x568   :  { %v5094_v40 = vadd.f32 %v5093_v39, %v9430_v2  ;;  %v5095_v22 = vpop.f32.mrb[77].mxu1 }
 0x569   :  { %v5096_v41 = vadd.f32 %v5095_v22, %v9433_v20  ;;  %v5097_v62 = vpop.f32.mrb[78].mxu1  ;;  %5501 = vmatprep.mubr.bf16.mxu1 %v5291_v24 }
 0x56a   :  { %v5098_v45 = vadd.f32 %v5097_v62, %v9430_v2  ;;  %v5099_v56 = vpop.f32.mrb[79].mxu1  ;;  %5502 = vmatmul.mubr.bf16.gmra.mrb[136].mxu1 %v5290_v38  ;;  %v5234_v32 = vmax.f32 %v5094_v40, 0.0 }
 0x56b   :  { %v5100_v47 = vadd.f32 %v5099_v56, %v9433_v20  ;;  %v5235_v30 = vmax.f32 %v5096_v41, 0.0 }
 0x56c   :  { %v5236_v48 = vmax.f32 %v5098_v45, 0.0 }
 0x56d   :  { %v5237_v50 = vmax.f32 %v5100_v47, 0.0 }
 0x56e   :  { %v5292_v6 = vpack.c.bf16 %v5236_v48, %v5234_v32 }
 0x56f   :  { %v5293_v8 = vpack.c.bf16 %v5237_v50, %v5235_v30  ;;  %v5103_v42 = vpop.f32.mrb[80].mxu1 }
 0x570   :  { %v5104_v44 = vadd.f32 %v5103_v42, %v9430_v2  ;;  %v5105_v4 = vpop.f32.mrb[81].mxu1 }
 0x571   :  { %v5106_v23 = vadd.f32 %v5105_v4, %v9433_v20  ;;  %v5107_v43 = vpop.f32.mrb[82].mxu1  ;;  %5509 = vmatprep.mubr.bf16.mxu1 %v5293_v8 }
 0x572   :  { %v5108_v46 = vadd.f32 %v5107_v43, %v9430_v2  ;;  %v5109_v27 = vpop.f32.mrb[83].mxu1  ;;  %5510 = vmatmul.mubr.bf16.gmra.mrb[140].mxu1 %v5292_v6  ;;  %v5238_v9 = vmax.f32 %v5104_v44, 0.0 }
 0x573   :  { %v5110_v29 = vadd.f32 %v5109_v27, %v9433_v20  ;;  %v5239_v49 = vmax.f32 %v5106_v23, 0.0 }
 0x574   :  { %v5240_v11 = vmax.f32 %v5108_v46, 0.0 }
 0x575   :  { %v5241_v51 = vmax.f32 %v5110_v29, 0.0 }
 0x576   :  { %v5294_v35 = vpack.c.bf16 %v5240_v11, %v5238_v9 }
 0x577   :  { %v5295_v52 = vpack.c.bf16 %v5241_v51, %v5239_v49  ;;  %v5113_v37 = vpop.f32.mrb[84].mxu1 }
 0x578   :  { %v5114_v55 = vadd.f32 %v5113_v37, %v9430_v2  ;;  %v5115_v25 = vpop.f32.mrb[85].mxu1 }
 0x579   :  { %v5116_v28 = vadd.f32 %v5115_v25, %v9433_v20  ;;  %v5117_v17 = vpop.f32.mrb[86].mxu1  ;;  %5517 = vmatprep.mubr.bf16.mxu1 %v5295_v52 }
 0x57a   :  { %v5118_v19 = vadd.f32 %v5117_v17, %v9430_v2  ;;  %v5119_v15 = vpop.f32.mrb[87].mxu1  ;;  %5518 = vmatmul.mubr.bf16.gmra.mrb[144].mxu1 %v5294_v35  ;;  %v5242_v53 = vmax.f32 %v5114_v55, 0.0 }
 0x57b   :  { %v5120_v18 = vadd.f32 %v5119_v15, %v9433_v20  ;;  %v5243_v61 = vmax.f32 %v5116_v28, 0.0 }
 0x57c   :  { %v5244_v54 = vmax.f32 %v5118_v19, 0.0 }
 0x57d   :  { %v5245_v63 = vmax.f32 %v5120_v18, 0.0 }
 0x57e   :  { %v5296_v0 = vpack.c.bf16 %v5244_v54, %v5242_v53 }
 0x57f   :  { %v5297_v1 = vpack.c.bf16 %v5245_v63, %v5243_v61  ;;  %v5123_v3 = vpop.f32.mrb[88].mxu1 }
 0x580   :  { %v5124_v5 = vadd.f32 %v5123_v3, %v9430_v2  ;;  %v5125_v7 = vpop.f32.mrb[89].mxu1 }
 0x581   :  { %v5126_v10 = vadd.f32 %v5125_v7, %v9433_v20  ;;  %v5127_v12 = vpop.f32.mrb[90].mxu1  ;;  %5525 = vmatprep.mubr.bf16.mxu1 %v5297_v1 }
 0x582   :  { %v5128_v13 = vadd.f32 %v5127_v12, %v9430_v2  ;;  %v5129_v57 = vpop.f32.mrb[91].mxu1  ;;  %5526 = vmatmul.mubr.bf16.gmra.mrb[148].mxu1 %v5296_v0  ;;  %v5246_v14 = vmax.f32 %v5124_v5, 0.0 }
 0x583   :  { %v5130_v58 = vadd.f32 %v5129_v57, %v9433_v20  ;;  %v5247_v59 = vmax.f32 %v5126_v10, 0.0 }
 0x584   :  { %v5248_v16 = vmax.f32 %v5128_v13, 0.0 }
 0x585   :  { %v5249_v60 = vmax.f32 %v5130_v58, 0.0 }
 0x586   :  { %v5298_v21 = vpack.c.bf16 %v5248_v16, %v5246_v14 }
 0x587   :  { %v5299_v26 = vpack.c.bf16 %v5249_v60, %v5247_v59  ;;  %v5133_v34 = vpop.f32.mrb[92].mxu1 }
 0x588   :  { %v5134_v31 = vadd.f32 %v5133_v34, %v9430_v2  ;;  %v5135_v33 = vpop.f32.mrb[93].mxu1 }
 0x589   :  { %v5136_v36 = vadd.f32 %v5135_v33, %v9433_v20  ;;  %v5137_v38 = vpop.f32.mrb[94].mxu1  ;;  %5533 = vmatprep.mubr.bf16.mxu1 %v5299_v26 }
 0x58a   :  { %v5138_v24 = vadd.f32 %v5137_v38, %v9430_v2  ;;  %v5139_v39 = vpop.f32.mrb[95].mxu1  ;;  %5534 = vmatmul.mubr.bf16.gmra.mrb[152].mxu1 %v5298_v21  ;;  %v5250_v22 = vmax.f32 %v5134_v31, 0.0 }
 0x58b   :  { %v5140_v40 = vadd.f32 %v5139_v39, %v9433_v20  ;;  %v5251_v62 = vmax.f32 %v5136_v36, 0.0 }
 0x58c   :  { %v5252_v41 = vmax.f32 %v5138_v24, 0.0 }
 0x58d   :  { %v5253_v45 = vmax.f32 %v5140_v40, 0.0 }
 0x58e   :  { %v5300_v56 = vpack.c.bf16 %v5252_v41, %v5250_v22  ;;  %v8554_v41 = vld [vmem:[#allocation11 + $0x20] sm:$0xff]  }
 0x58f   :  { %v5301_v47 = vpack.c.bf16 %v5253_v45, %v5251_v62  ;;  %v5143_v32 = vpop.f32.mrb[96].mxu1  ;;  %7149 = vmatprep.subr.bf16.mxu0 %v8554_v41 }
 0x590   :  { %v5144_v48 = vadd.f32 %v5143_v32, %v9430_v2  ;;  %v5145_v30 = vpop.f32.mrb[97].mxu1  ;;  %7150 = vmatpush3.bf16.msra.mxu0 %v8554_v41 }
 0x591   :  { %v5146_v50 = vadd.f32 %v5145_v30, %v9433_v20  ;;  %v5147_v6 = vpop.f32.mrb[98].mxu1  ;;  %5541 = vmatprep.mubr.bf16.mxu1 %v5301_v47 }
 0x592   :  { %v5148_v8 = vadd.f32 %v5147_v6, %v9430_v2  ;;  %v5149_v42 = vpop.f32.mrb[99].mxu1  ;;  %5542 = vmatmul.mubr.bf16.gmra.mrb[156].mxu1 %v5300_v56  ;;  %v5254_v4 = vmax.f32 %v5144_v48, 0.0 }
 0x593   :  { %v5150_v44 = vadd.f32 %v5149_v42, %v9433_v20  ;;  %v5255_v43 = vmax.f32 %v5146_v50, 0.0  ;;  %v8555_v50 = vld [vmem:[#allocation11 + $0x28] sm:$0xff]  }
 0x594   :  { %v5256_v23 = vmax.f32 %v5148_v8, 0.0  ;;  %7151 = vmatprep.subr.bf16.mxu0 %v8555_v50 }
 0x595   :  { %v5257_v46 = vmax.f32 %v5150_v44, 0.0  ;;  %7152 = vmatpush3.bf16.msra.mxu0 %v8555_v50 }
 0x596   :  { %v5302_v27 = vpack.c.bf16 %v5256_v23, %v5254_v4 }
 0x597   :  { %v5303_v29 = vpack.c.bf16 %v5257_v46, %v5255_v43  ;;  %v5153_v9 = vpop.f32.mrb[100].mxu1  ;;  %v8556_v46 = vld [vmem:[#allocation11 + $0x30] sm:$0xff]  }
 0x598   :  { %v5154_v11 = vadd.f32 %v5153_v9, %v9430_v2  ;;  %v5155_v49 = vpop.f32.mrb[101].mxu1  ;;  %7153 = vmatprep.subr.bf16.mxu0 %v8556_v46 }
 0x599   :  { %v5156_v51 = vadd.f32 %v5155_v49, %v9433_v20  ;;  %v5157_v35 = vpop.f32.mrb[102].mxu1  ;;  %5549 = vmatprep.mubr.bf16.mxu1 %v5303_v29  ;;  %7154 = vmatpush3.bf16.msra.mxu0 %v8556_v46 }
 0x59a   :  { %v5158_v52 = vadd.f32 %v5157_v35, %v9430_v2  ;;  %v5159_v37 = vpop.f32.mrb[103].mxu1  ;;  %5550 = vmatmul.mubr.bf16.gmra.mrb[160].mxu1 %v5302_v27  ;;  %v5258_v25 = vmax.f32 %v5154_v11, 0.0 }
 0x59b   :  { %v5160_v55 = vadd.f32 %v5159_v37, %v9433_v20  ;;  %v5259_v17 = vmax.f32 %v5156_v51, 0.0 }
 0x59c   :  { %v5260_v28 = vmax.f32 %v5158_v52, 0.0  ;;  %v8557_v52 = vld [vmem:[#allocation11 + $0x38] sm:$0xff]  }
 0x59d   :  { %v5261_v19 = vmax.f32 %v5160_v55, 0.0  ;;  %7155 = vmatprep.subr.bf16.mxu0 %v8557_v52 }
 0x59e   :  { %v5304_v15 = vpack.c.bf16 %v5260_v28, %v5258_v25  ;;  %7156 = vmatpush3.bf16.msra.mxu0 %v8557_v52 }
 0x59f   :  { %v5305_v18 = vpack.c.bf16 %v5261_v19, %v5259_v17  ;;  %v5163_v53 = vpop.f32.mrb[104].mxu1 }
 0x5a0   :  { %v5164_v54 = vadd.f32 %v5163_v53, %v9430_v2  ;;  %v5165_v61 = vpop.f32.mrb[105].mxu1 }
 0x5a1   :  { %v5166_v63 = vadd.f32 %v5165_v61, %v9433_v20  ;;  %v5167_v0 = vpop.f32.mrb[106].mxu1  ;;  %5557 = vmatprep.mubr.bf16.mxu1 %v5305_v18 }
 0x5a2   :  { %v5168_v1 = vadd.f32 %v5167_v0, %v9430_v2  ;;  %v5169_v3 = vpop.f32.mrb[107].mxu1  ;;  %5558 = vmatmul.mubr.bf16.gmra.mrb[164].mxu1 %v5304_v15  ;;  %v5262_v7 = vmax.f32 %v5164_v54, 0.0 }
 0x5a3   :  { %v5170_v5 = vadd.f32 %v5169_v3, %v9433_v20  ;;  %v5263_v12 = vmax.f32 %v5166_v63, 0.0 }
 0x5a4   :  { %v5264_v10 = vmax.f32 %v5168_v1, 0.0 }
 0x5a5   :  { %v5265_v13 = vmax.f32 %v5170_v5, 0.0 }
 0x5a6   :  { %v5306_v57 = vpack.c.bf16 %v5264_v10, %v5262_v7 }
 0x5a7   :  { %v5307_v58 = vpack.c.bf16 %v5265_v13, %v5263_v12  ;;  %v5173_v14 = vpop.f32.mrb[108].mxu1 }
 0x5a8   :  { %v5174_v16 = vadd.f32 %v5173_v14, %v9430_v2  ;;  %v5175_v59 = vpop.f32.mrb[109].mxu1 }
 0x5a9   :  { %v5176_v60 = vadd.f32 %v5175_v59, %v9433_v20  ;;  %v5177_v21 = vpop.f32.mrb[110].mxu1  ;;  %5565 = vmatprep.mubr.bf16.mxu1 %v5307_v58 }
 0x5aa   :  { %v5178_v26 = vadd.f32 %v5177_v21, %v9430_v2  ;;  %v5179_v34 = vpop.f32.mrb[111].mxu1  ;;  %5566 = vmatmul.mubr.bf16.gmra.mrb[168].mxu1 %v5306_v57  ;;  %v5266_v33 = vmax.f32 %v5174_v16, 0.0 }
 0x5ab   :  { %v5180_v31 = vadd.f32 %v5179_v34, %v9433_v20  ;;  %v5267_v38 = vmax.f32 %v5176_v60, 0.0 }
 0x5ac   :  { %v5268_v36 = vmax.f32 %v5178_v26, 0.0 }
 0x5ad   :  { %v5269_v24 = vmax.f32 %v5180_v31, 0.0 }
 0x5ae   :  { %v5308_v39 = vpack.c.bf16 %v5268_v36, %v5266_v33 }
 0x5af   :  { %v5309_v40 = vpack.c.bf16 %v5269_v24, %v5267_v38  ;;  %v5183_v22 = vpop.f32.mrb[112].mxu1 }
 0x5b0   :  { %v5184_v62 = vadd.f32 %v5183_v22, %v9430_v2  ;;  %v5185_v45 = vpop.f32.mrb[113].mxu1 }
 0x5b1   :  { %v5186_v56 = vadd.f32 %v5185_v45, %v9433_v20  ;;  %v5187_v47 = vpop.f32.mrb[114].mxu1  ;;  %5573 = vmatprep.mubr.bf16.mxu1 %v5309_v40  ;;  %v9502_v40 = vld [vmem:[%s9889_s8] ss:$0 sm:$0xff] }
 0x5b2   :  { %v5188_v32 = vadd.f32 %v5187_v47, %v9430_v2  ;;  %v5189_v48 = vpop.f32.mrb[115].mxu1  ;;  %5574 = vmatmul.mubr.bf16.gmra.mrb[172].mxu1 %v5308_v39  ;;  %v5270_v6 = vmax.f32 %v5184_v62, 0.0  ;;  %v8559_v47 = vld [vmem:[#allocation13 + $0x8] sm:$0xff]  }
 0x5b3   :  { %v5190_v30 = vadd.f32 %v5189_v48, %v9433_v20  ;;  %v5271_v42 = vmax.f32 %v5186_v56, 0.0  ;;  %v8558_v56 = vld [vmem:[#allocation13] sm:$0xff]  }
 0x5b4   :  { %v5272_v8 = vmax.f32 %v5188_v32, 0.0  ;;  %7189 = vmatprep.subr.bf16.mxu1 %v8558_v56 }
 0x5b5   :  { %v5273_v44 = vmax.f32 %v5190_v30, 0.0  ;;  %7190 = vmatpush3.bf16.msra.mxu1 %v8558_v56 }
 0x5b6   :  { %v5310_v4 = vpack.c.bf16 %v5272_v8, %v5270_v6  ;;  %7191 = vmatprep.subr.bf16.mxu1 %v8559_v47  ;;  %v8560_v6 = vld [vmem:[#allocation13 + $0x10] sm:$0xff]  }
 0x5b7   :  { %v5311_v23 = vpack.c.bf16 %v5273_v44, %v5271_v42  ;;  %v5193_v43 = vpop.f32.mrb[116].mxu1 }
 0x5b8   :  { %v5194_v27 = vadd.f32 %v5193_v43, %v9430_v2  ;;  %v5195_v29 = vpop.f32.mrb[117].mxu1 }
 0x5b9   :  { %v5196_v9 = vadd.f32 %v5195_v29, %v9433_v20  ;;  %v5197_v11 = vpop.f32.mrb[118].mxu1  ;;  %5581 = vmatprep.mubr.bf16.mxu1 %v5311_v23  ;;  %7192 = vmatpush3.bf16.msra.mxu1 %v8559_v47 }
 0x5ba   :  { %v5198_v49 = vadd.f32 %v5197_v11, %v9430_v2  ;;  %v5199_v51 = vpop.f32.mrb[119].mxu1  ;;  %5582 = vmatmul.mubr.bf16.gmra.mrb[176].mxu1 %v5310_v4  ;;  %v5274_v37 = vmax.f32 %v5194_v27, 0.0  ;;  %7193 = vmatprep.subr.bf16.mxu1 %v8560_v6  ;;  %v8561_v27 = vld [vmem:[#allocation13 + $0x18] sm:$0xff]  }
 0x5bb   :  { %v5200_v35 = vadd.f32 %v5199_v51, %v9433_v20  ;;  %v5275_v25 = vmax.f32 %v5196_v9, 0.0  ;;  %v8562_v51 = vld [vmem:[#allocation13 + $0x20] sm:$0xff]  }
 0x5bc   :  { %v5276_v55 = vmax.f32 %v5198_v49, 0.0 }
 0x5bd   :  { %v5277_v28 = vmax.f32 %v5200_v35, 0.0  ;;  %7194 = vmatpush3.bf16.msra.mxu1 %v8560_v6 }
 0x5be   :  { %v5312_v17 = vpack.c.bf16 %v5276_v55, %v5274_v37  ;;  %7195 = vmatprep.subr.bf16.mxu1 %v8561_v27 }
 0x5bf   :  { %v5313_v19 = vpack.c.bf16 %v5277_v28, %v5275_v25  ;;  %v5203_v15 = vpop.f32.mrb[120].mxu1 }
 0x5c0   :  { %v5204_v18 = vadd.f32 %v5203_v15, %v9430_v2  ;;  %v5205_v53 = vpop.f32.mrb[121].mxu1 }
 0x5c1   :  { %v5206_v54 = vadd.f32 %v5205_v53, %v9433_v20  ;;  %v5207_v61 = vpop.f32.mrb[122].mxu1  ;;  %5589 = vmatprep.mubr.bf16.mxu1 %v5313_v19  ;;  %7196 = vmatpush3.bf16.msra.mxu1 %v8561_v27  ;;  %v8563_v19 = vld [vmem:[#allocation13 + $0x28] sm:$0xff]  }
 0x5c2   :  { %v5208_v63 = vadd.f32 %v5207_v61, %v9430_v2  ;;  %v5209_v0 = vpop.f32.mrb[123].mxu1  ;;  %5590 = vmatmul.mubr.bf16.gmra.mrb[180].mxu1 %v5312_v17  ;;  %v5278_v3 = vmax.f32 %v5204_v18, 0.0  ;;  %7197 = vmatprep.subr.bf16.mxu1 %v8562_v51 }
 0x5c3   :  { %v5210_v1 = vadd.f32 %v5209_v0, %v9433_v20  ;;  %v5279_v7 = vmax.f32 %v5206_v54, 0.0 }
 0x5c4   :  { %v5280_v5 = vmax.f32 %v5208_v63, 0.0 }
 0x5c5   :  { %v5281_v10 = vmax.f32 %v5210_v1, 0.0  ;;  %7198 = vmatpush3.bf16.msra.mxu1 %v8562_v51 }
 0x5c6   :  { %v5314_v12 = vpack.c.bf16 %v5280_v5, %v5278_v3  ;;  %7199 = vmatprep.subr.bf16.mxu1 %v8563_v19 }
 0x5c7   :  { %v5315_v13 = vpack.c.bf16 %v5281_v10, %v5279_v7  ;;  %v5213_v57 = vpop.f32.mrb[124].mxu1 }
 0x5c8   :  { %v5214_v58 = vadd.f32 %v5213_v57, %v9430_v2  ;;  %v5215_v14 = vpop.f32.mrb[125].mxu1 }
 0x5c9   :  { %v5216_v16 = vadd.f32 %v5215_v14, %v9433_v20  ;;  %v5217_v59 = vpop.f32.mrb[126].mxu1  ;;  %5597 = vmatprep.mubr.bf16.mxu1 %v5315_v13  ;;  %7200 = vmatpush3.bf16.msra.mxu1 %v8563_v19 }
 0x5ca   :  { %v5218_v60 = vadd.f32 %v5217_v59, %v9430_v2  ;;  %v5219_v21 = vpop.f32.mrb[127].mxu1  ;;  %5598 = vmatmul.mubr.bf16.gmra.mrb[184].mxu1 %v5314_v12  ;;  %v5282_v34 = vmax.f32 %v5214_v58, 0.0 }
 0x5cb   :  { %v5220_v26 = vadd.f32 %v5219_v21, %v9433_v20  ;;  %v5283_v33 = vmax.f32 %v5216_v16, 0.0 }
 0x5cc   :  { %v5284_v31 = vmax.f32 %v5218_v60, 0.0 }
 0x5cd   :  { %v5285_v36 = vmax.f32 %v5220_v26, 0.0 }
 0x5ce   :  { %v5316_v38 = vpack.c.bf16 %v5284_v31, %v5282_v34 }
 0x5cf   :  { %v5317_v24 = vpack.c.bf16 %v5285_v36, %v5283_v33 }
 0x5d1   :  { %5605 = vmatprep.mubr.bf16.mxu1 %v5317_v24 }
 0x5d2   :  { %5606 = vmatmul.mubr.bf16.gmra.mrb[188].mxu1 %v5316_v38 }
 0x62d   :  { %v6997_v39 = vpop.f32.mrb[128].mxu1 }
 0x62e   :  { %v6998_v22 = vpop.f32.mrb[129].mxu1 }
 0x62f   :  { %v6999_v2 = vadd.f32 %v6998_v22, %v6997_v39  ;;  %v7000_v41 = vpop.f32.mrb[130].mxu1 }
 0x630   :  { %v7001_v62 = vpop.f32.mrb[131].mxu1 }
 0x631   :  { %v5488_v20 = vadd.f32 %v6999_v2, %v9502_v40  ;;  %v7002_v45 = vadd.f32 %v7001_v62, %v7000_v41 }
 0x633   :  { %v5491_v32 = vadd.f32 %v7002_v45, %v9502_v40  ;;  %v5614_v48 = vmax.f32 %v5488_v20, 0.0 }
 0x635   :  { %v5615_v30 = vmax.f32 %v5491_v32, 0.0  ;;  %v7003_v50 = vpop.f32.mrb[132].mxu1 }
 0x636   :  { %v7004_v8 = vpop.f32.mrb[133].mxu1 }
 0x637   :  { %v7005_v42 = vadd.f32 %v7004_v8, %v7003_v50  ;;  %v7006_v44 = vpop.f32.mrb[134].mxu1  ;;  %v5646_v4 = vpack.c.bf16 %v5615_v30, %v5614_v48 }
 0x638   :  { %v7007_v23 = vpop.f32.mrb[135].mxu1 }
 0x639   :  { %v5496_v43 = vadd.f32 %v7005_v42, %v9502_v40  ;;  %v7008_v46 = vadd.f32 %v7007_v23, %v7006_v44  ;;  %7157 = vmatprep.mubr.bf16.mxu0 %v5646_v4 }
 0x63b   :  { %v5499_v29 = vadd.f32 %v7008_v46, %v9502_v40  ;;  %v5616_v9 = vmax.f32 %v5496_v43, 0.0 }
 0x63d   :  { %v5617_v11 = vmax.f32 %v5499_v29, 0.0  ;;  %v7009_v49 = vpop.f32.mrb[136].mxu1 }
 0x63e   :  { %v7010_v35 = vpop.f32.mrb[137].mxu1 }
 0x63f   :  { %v5647_v52 = vpack.c.bf16 %v5617_v11, %v5616_v9  ;;  %v7011_v37 = vadd.f32 %v7010_v35, %v7009_v49  ;;  %v7012_v55 = vpop.f32.mrb[138].mxu1 }
 0x640   :  { %v7013_v25 = vpop.f32.mrb[139].mxu1 }
 0x641   :  { %v5504_v28 = vadd.f32 %v7011_v37, %v9502_v40  ;;  %v7014_v17 = vadd.f32 %v7013_v25, %v7012_v55  ;;  %7158 = vmatmul.mubr.bf16.vlgmr.msra.gmra.mrb[128].mxu0 %v5647_v52 }
 0x643   :  { %v5507_v15 = vadd.f32 %v7014_v17, %v9502_v40  ;;  %v5618_v18 = vmax.f32 %v5504_v28, 0.0 }
 0x645   :  { %v5619_v53 = vmax.f32 %v5507_v15, 0.0  ;;  %v7015_v54 = vpop.f32.mrb[140].mxu1 }
 0x646   :  { %v7016_v61 = vpop.f32.mrb[141].mxu1 }
 0x647   :  { %v7017_v63 = vadd.f32 %v7016_v61, %v7015_v54  ;;  %v7018_v0 = vpop.f32.mrb[142].mxu1  ;;  %v5648_v1 = vpack.c.bf16 %v5619_v53, %v5618_v18 }
 0x648   :  { %v7019_v3 = vpop.f32.mrb[143].mxu1 }
 0x649   :  { %v5512_v5 = vadd.f32 %v7017_v63, %v9502_v40  ;;  %v7020_v7 = vadd.f32 %v7019_v3, %v7018_v0  ;;  %7161 = vmatprep.mubr.bf16.mxu0 %v5648_v1 }
 0x64b   :  { %v5515_v10 = vadd.f32 %v7020_v7, %v9502_v40  ;;  %v5620_v12 = vmax.f32 %v5512_v5, 0.0 }
 0x64d   :  { %v5621_v13 = vmax.f32 %v5515_v10, 0.0  ;;  %v7021_v57 = vpop.f32.mrb[144].mxu1 }
 0x64e   :  { %v7022_v58 = vpop.f32.mrb[145].mxu1 }
 0x64f   :  { %v7023_v14 = vadd.f32 %v7022_v58, %v7021_v57  ;;  %v7024_v16 = vpop.f32.mrb[146].mxu1  ;;  %v5649_v59 = vpack.c.bf16 %v5621_v13, %v5620_v12 }
 0x650   :  { %v7025_v60 = vpop.f32.mrb[147].mxu1 }
 0x651   :  { %v5520_v21 = vadd.f32 %v7023_v14, %v9502_v40  ;;  %v7026_v26 = vadd.f32 %v7025_v60, %v7024_v16  ;;  %7162 = vmatmul.mubr.bf16.gmra.mrb[132].mxu0 %v5649_v59 }
 0x653   :  { %v5523_v34 = vadd.f32 %v7026_v26, %v9502_v40  ;;  %v5622_v31 = vmax.f32 %v5520_v21, 0.0 }
 0x655   :  { %v5623_v33 = vmax.f32 %v5523_v34, 0.0  ;;  %v7027_v36 = vpop.f32.mrb[148].mxu1 }
 0x656   :  { %v7028_v38 = vpop.f32.mrb[149].mxu1 }
 0x657   :  { %v7029_v24 = vadd.f32 %v7028_v38, %v7027_v36  ;;  %v7030_v39 = vpop.f32.mrb[150].mxu1  ;;  %v5650_v22 = vpack.c.bf16 %v5623_v33, %v5622_v31 }
 0x658   :  { %v7031_v2 = vpop.f32.mrb[151].mxu1 }
 0x659   :  { %v5528_v41 = vadd.f32 %v7029_v24, %v9502_v40  ;;  %v7032_v62 = vadd.f32 %v7031_v2, %v7030_v39  ;;  %7165 = vmatprep.mubr.bf16.mxu0 %v5650_v22 }
 0x65b   :  { %v5531_v20 = vadd.f32 %v7032_v62, %v9502_v40  ;;  %v5624_v45 = vmax.f32 %v5528_v41, 0.0 }
 0x65d   :  { %v5625_v56 = vmax.f32 %v5531_v20, 0.0  ;;  %v7033_v47 = vpop.f32.mrb[152].mxu1 }
 0x65e   :  { %v7034_v32 = vpop.f32.mrb[153].mxu1 }
 0x65f   :  { %v7035_v48 = vadd.f32 %v7034_v32, %v7033_v47  ;;  %v7036_v30 = vpop.f32.mrb[154].mxu1  ;;  %v5651_v50 = vpack.c.bf16 %v5625_v56, %v5624_v45 }
 0x660   :  { %v7037_v6 = vpop.f32.mrb[155].mxu1 }
 0x661   :  { %v5536_v8 = vadd.f32 %v7035_v48, %v9502_v40  ;;  %v7038_v42 = vadd.f32 %v7037_v6, %v7036_v30  ;;  %7166 = vmatmul.mubr.bf16.gmra.mrb[136].mxu0 %v5651_v50 }
 0x663   :  { %v5539_v44 = vadd.f32 %v7038_v42, %v9502_v40  ;;  %v5626_v4 = vmax.f32 %v5536_v8, 0.0 }
 0x665   :  { %v5627_v23 = vmax.f32 %v5539_v44, 0.0  ;;  %v7039_v43 = vpop.f32.mrb[156].mxu1 }
 0x666   :  { %v7040_v46 = vpop.f32.mrb[157].mxu1 }
 0x667   :  { %v7041_v27 = vadd.f32 %v7040_v46, %v7039_v43  ;;  %v7042_v29 = vpop.f32.mrb[158].mxu1  ;;  %v5652_v9 = vpack.c.bf16 %v5627_v23, %v5626_v4 }
 0x668   :  { %v7043_v11 = vpop.f32.mrb[159].mxu1 }
 0x669   :  { %v5544_v49 = vadd.f32 %v7041_v27, %v9502_v40  ;;  %v7044_v51 = vadd.f32 %v7043_v11, %v7042_v29  ;;  %7169 = vmatprep.mubr.bf16.mxu0 %v5652_v9  ;;  %v8564_v9 = vld [vmem:[#allocation13 + $0x30] sm:$0xff]  }
 0x66a   :  { %7201 = vmatprep.subr.bf16.mxu1 %v8564_v9 }
 0x66b   :  { %v5547_v35 = vadd.f32 %v7044_v51, %v9502_v40  ;;  %v5628_v52 = vmax.f32 %v5544_v49, 0.0  ;;  %7202 = vmatpush3.bf16.msra.mxu1 %v8564_v9 }
 0x66d   :  { %v5629_v37 = vmax.f32 %v5547_v35, 0.0  ;;  %v7045_v55 = vpop.f32.mrb[160].mxu1 }
 0x66e   :  { %v7046_v25 = vpop.f32.mrb[161].mxu1 }
 0x66f   :  { %v7047_v28 = vadd.f32 %v7046_v25, %v7045_v55  ;;  %v7048_v17 = vpop.f32.mrb[162].mxu1  ;;  %v5653_v19 = vpack.c.bf16 %v5629_v37, %v5628_v52  ;;  %v8565_v25 = vld [vmem:[#allocation13 + $0x38] sm:$0xff]  }
 0x670   :  { %v7049_v15 = vpop.f32.mrb[163].mxu1  ;;  %7203 = vmatprep.subr.bf16.mxu1 %v8565_v25 }
 0x671   :  { %v5552_v18 = vadd.f32 %v7047_v28, %v9502_v40  ;;  %v7050_v53 = vadd.f32 %v7049_v15, %v7048_v17  ;;  %7170 = vmatmul.mubr.bf16.gmra.mrb[140].mxu0 %v5653_v19  ;;  %7204 = vmatpush3.bf16.msra.mxu1 %v8565_v25 }
 0x673   :  { %v5555_v54 = vadd.f32 %v7050_v53, %v9502_v40  ;;  %v5630_v61 = vmax.f32 %v5552_v18, 0.0 }
 0x675   :  { %v5631_v63 = vmax.f32 %v5555_v54, 0.0  ;;  %v7051_v0 = vpop.f32.mrb[164].mxu1 }
 0x676   :  { %v7052_v1 = vpop.f32.mrb[165].mxu1 }
 0x677   :  { %v7053_v3 = vadd.f32 %v7052_v1, %v7051_v0  ;;  %v7054_v5 = vpop.f32.mrb[166].mxu1  ;;  %v5654_v7 = vpack.c.bf16 %v5631_v63, %v5630_v61 }
 0x678   :  { %v7055_v10 = vpop.f32.mrb[167].mxu1 }
 0x679   :  { %v5560_v12 = vadd.f32 %v7053_v3, %v9502_v40  ;;  %v7056_v13 = vadd.f32 %v7055_v10, %v7054_v5  ;;  %7173 = vmatprep.mubr.bf16.mxu0 %v5654_v7 }
 0x67b   :  { %v5563_v57 = vadd.f32 %v7056_v13, %v9502_v40  ;;  %v5632_v58 = vmax.f32 %v5560_v12, 0.0 }
 0x67d   :  { %v5633_v14 = vmax.f32 %v5563_v57, 0.0  ;;  %v7057_v16 = vpop.f32.mrb[168].mxu1 }
 0x67e   :  { %v7058_v59 = vpop.f32.mrb[169].mxu1 }
 0x67f   :  { %v7059_v60 = vadd.f32 %v7058_v59, %v7057_v16  ;;  %v7060_v21 = vpop.f32.mrb[170].mxu1  ;;  %v5655_v26 = vpack.c.bf16 %v5633_v14, %v5632_v58 }
 0x680   :  { %v7061_v34 = vpop.f32.mrb[171].mxu1 }
 0x681   :  { %v5568_v31 = vadd.f32 %v7059_v60, %v9502_v40  ;;  %v7062_v33 = vadd.f32 %v7061_v34, %v7060_v21  ;;  %7174 = vmatmul.mubr.bf16.gmra.mrb[144].mxu0 %v5655_v26 }
 0x683   :  { %v5571_v36 = vadd.f32 %v7062_v33, %v9502_v40  ;;  %v5634_v38 = vmax.f32 %v5568_v31, 0.0  ;;  %v9539_v31 = vld [vmem:[%s9891_s10] ss:$0 sm:$0xff] }
 0x685   :  { %v5635_v24 = vmax.f32 %v5571_v36, 0.0  ;;  %v7063_v39 = vpop.f32.mrb[172].mxu1 }
 0x686   :  { %v7064_v22 = vpop.f32.mrb[173].mxu1 }
 0x687   :  { %v7065_v2 = vadd.f32 %v7064_v22, %v7063_v39  ;;  %v7066_v41 = vpop.f32.mrb[174].mxu1  ;;  %v5656_v62 = vpack.c.bf16 %v5635_v24, %v5634_v38 }
 0x688   :  { %v7067_v20 = vpop.f32.mrb[175].mxu1 }
 0x689   :  { %v5576_v45 = vadd.f32 %v7065_v2, %v9502_v40  ;;  %v7068_v56 = vadd.f32 %v7067_v20, %v7066_v41  ;;  %7177 = vmatprep.mubr.bf16.mxu0 %v5656_v62 }
 0x68b   :  { %v5579_v47 = vadd.f32 %v7068_v56, %v9502_v40  ;;  %v5636_v32 = vmax.f32 %v5576_v45, 0.0 }
 0x68d   :  { %v5637_v48 = vmax.f32 %v5579_v47, 0.0  ;;  %v7069_v30 = vpop.f32.mrb[176].mxu1 }
 0x68e   :  { %v7070_v50 = vpop.f32.mrb[177].mxu1 }
 0x68f   :  { %v7071_v6 = vadd.f32 %v7070_v50, %v7069_v30  ;;  %v7072_v8 = vpop.f32.mrb[178].mxu1  ;;  %v5657_v42 = vpack.c.bf16 %v5637_v48, %v5636_v32 }
 0x690   :  { %v7073_v44 = vpop.f32.mrb[179].mxu1 }
 0x691   :  { %v5584_v4 = vadd.f32 %v7071_v6, %v9502_v40  ;;  %v7074_v23 = vadd.f32 %v7073_v44, %v7072_v8  ;;  %7178 = vmatmul.mubr.bf16.gmra.mrb[148].mxu0 %v5657_v42 }
 0x693   :  { %v5587_v43 = vadd.f32 %v7074_v23, %v9502_v40  ;;  %v5638_v46 = vmax.f32 %v5584_v4, 0.0 }
 0x695   :  { %v5639_v27 = vmax.f32 %v5587_v43, 0.0  ;;  %v7075_v29 = vpop.f32.mrb[180].mxu1 }
 0x696   :  { %v7076_v11 = vpop.f32.mrb[181].mxu1 }
 0x697   :  { %v7077_v49 = vadd.f32 %v7076_v11, %v7075_v29  ;;  %v7078_v51 = vpop.f32.mrb[182].mxu1  ;;  %v5658_v35 = vpack.c.bf16 %v5639_v27, %v5638_v46 }
 0x698   :  { %v7079_v52 = vpop.f32.mrb[183].mxu1 }
 0x699   :  { %v5592_v37 = vadd.f32 %v7077_v49, %v9502_v40  ;;  %v7080_v55 = vadd.f32 %v7079_v52, %v7078_v51  ;;  %7181 = vmatprep.mubr.bf16.mxu0 %v5658_v35 }
 0x69b   :  { %v5595_v28 = vadd.f32 %v7080_v55, %v9502_v40  ;;  %v5640_v17 = vmax.f32 %v5592_v37, 0.0 }
 0x69d   :  { %v5641_v19 = vmax.f32 %v5595_v28, 0.0  ;;  %v7081_v15 = vpop.f32.mrb[184].mxu1 }
 0x69e   :  { %v7082_v18 = vpop.f32.mrb[185].mxu1 }
 0x69f   :  { %v7083_v53 = vadd.f32 %v7082_v18, %v7081_v15  ;;  %v7084_v54 = vpop.f32.mrb[186].mxu1  ;;  %v5659_v61 = vpack.c.bf16 %v5641_v19, %v5640_v17 }
 0x6a0   :  { %v7085_v63 = vpop.f32.mrb[187].mxu1 }
 0x6a1   :  { %v5600_v0 = vadd.f32 %v7083_v53, %v9502_v40  ;;  %v7086_v1 = vadd.f32 %v7085_v63, %v7084_v54  ;;  %7182 = vmatmul.mubr.bf16.gmra.mrb[152].mxu0 %v5659_v61 }
 0x6a3   :  { %v5603_v3 = vadd.f32 %v7086_v1, %v9502_v40  ;;  %v5642_v5 = vmax.f32 %v5600_v0, 0.0 }
 0x6a5   :  { %v5643_v7 = vmax.f32 %v5603_v3, 0.0  ;;  %v7087_v10 = vpop.f32.mrb[188].mxu1 }
 0x6a6   :  { %v7088_v12 = vpop.f32.mrb[189].mxu1 }
 0x6a7   :  { %v7089_v13 = vadd.f32 %v7088_v12, %v7087_v10  ;;  %v7090_v57 = vpop.f32.mrb[190].mxu1  ;;  %v5660_v58 = vpack.c.bf16 %v5643_v7, %v5642_v5 }
 0x6a8   :  { %v7091_v14 = vpop.f32.mrb[191].mxu1 }
 0x6a9   :  { %v5608_v16 = vadd.f32 %v7089_v13, %v9502_v40  ;;  %v7092_v59 = vadd.f32 %v7091_v14, %v7090_v57  ;;  %7185 = vmatprep.mubr.bf16.mxu0 %v5660_v58 }
 0x6ab   :  { %v5611_v60 = vadd.f32 %v7092_v59, %v9502_v40  ;;  %v5644_v21 = vmax.f32 %v5608_v16, 0.0 }
 0x6ad   :  { %v5645_v26 = vmax.f32 %v5611_v60, 0.0 }
 0x6af   :  { %v5661_v34 = vpack.c.bf16 %v5645_v26, %v5644_v21 }
 0x6b1   :  { %7186 = vmatmul.mubr.bf16.gmra.mrb[156].mxu0 %v5661_v34 }
 0x714   :  { %v7159_v33 = vpop.f32.mrb[128].mxu0 }
 0x715   :  { %v5776_v36 = vadd.f32 %v7159_v33, %v9539_v31  ;;  %v5767_v38 = vpop.f32.mrb[129].mxu0 }
 0x716   :  { %v5768_v24 = vadd.f32 %v9539_v31, %v5767_v38  ;;  %v7160_v39 = vpop.f32.mrb[130].mxu0 }
 0x717   :  { %v5779_v22 = vadd.f32 %v7160_v39, %v9539_v31  ;;  %v5770_v2 = vpop.f32.mrb[131].mxu0  ;;  %v5896_v41 = vmax.f32 %v5776_v36, 0.0 }
 0x718   :  { %v5771_v40 = vadd.f32 %v9539_v31, %v5770_v2  ;;  %v5894_v20 = vmax.f32 %v5768_v24, 0.0 }
 0x719   :  { %v5897_v62 = vmax.f32 %v5779_v22, 0.0 }
 0x71a   :  { %v5895_v45 = vmax.f32 %v5771_v40, 0.0 }
 0x71b   :  { %v5927_v56 = vpack.c.bf16 %v5897_v62, %v5896_v41 }
 0x71c   :  { %v5926_v47 = vpack.c.bf16 %v5895_v45, %v5894_v20 }
 0x71e   :  { %7205 = vmatprep.mubr.bf16.mxu1 %v5926_v47 }
 0x71f   :  { %7206 = vmatmul.mubr.bf16.vlgmr.msra.gmra.mrb[192].mxu1 %v5927_v56 }
 0x724   :  { %v7163_v32 = vpop.f32.mrb[132].mxu0 }
 0x725   :  { %v5792_v48 = vadd.f32 %v7163_v32, %v9539_v31  ;;  %v5783_v30 = vpop.f32.mrb[133].mxu0 }
 0x726   :  { %v5784_v50 = vadd.f32 %v9539_v31, %v5783_v30  ;;  %v7164_v6 = vpop.f32.mrb[134].mxu0 }
 0x727   :  { %v5795_v8 = vadd.f32 %v7164_v6, %v9539_v31  ;;  %v5786_v42 = vpop.f32.mrb[135].mxu0  ;;  %v5900_v4 = vmax.f32 %v5792_v48, 0.0 }
 0x728   :  { %v5787_v44 = vadd.f32 %v9539_v31, %v5786_v42  ;;  %v5898_v43 = vmax.f32 %v5784_v50, 0.0 }
 0x729   :  { %v5901_v23 = vmax.f32 %v5795_v8, 0.0 }
 0x72a   :  { %v5899_v46 = vmax.f32 %v5787_v44, 0.0 }
 0x72b   :  { %v5929_v27 = vpack.c.bf16 %v5901_v23, %v5900_v4 }
 0x72c   :  { %v5928_v29 = vpack.c.bf16 %v5899_v46, %v5898_v43 }
 0x72e   :  { %7209 = vmatprep.mubr.bf16.mxu1 %v5928_v29 }
 0x72f   :  { %7210 = vmatmul.mubr.bf16.gmra.mrb[196].mxu1 %v5929_v27 }
 0x734   :  { %v7167_v9 = vpop.f32.mrb[136].mxu0 }
 0x735   :  { %v5808_v11 = vadd.f32 %v7167_v9, %v9539_v31  ;;  %v5799_v49 = vpop.f32.mrb[137].mxu0 }
 0x736   :  { %v5800_v51 = vadd.f32 %v9539_v31, %v5799_v49  ;;  %v7168_v35 = vpop.f32.mrb[138].mxu0 }
 0x737   :  { %v5811_v52 = vadd.f32 %v7168_v35, %v9539_v31  ;;  %v5802_v37 = vpop.f32.mrb[139].mxu0  ;;  %v5904_v25 = vmax.f32 %v5808_v11, 0.0 }
 0x738   :  { %v5803_v55 = vadd.f32 %v9539_v31, %v5802_v37  ;;  %v5902_v17 = vmax.f32 %v5800_v51, 0.0 }
 0x739   :  { %v5905_v28 = vmax.f32 %v5811_v52, 0.0 }
 0x73a   :  { %v5903_v19 = vmax.f32 %v5803_v55, 0.0 }
 0x73b   :  { %v5931_v15 = vpack.c.bf16 %v5905_v28, %v5904_v25 }
 0x73c   :  { %v5930_v18 = vpack.c.bf16 %v5903_v19, %v5902_v17 }
 0x73e   :  { %7213 = vmatprep.mubr.bf16.mxu1 %v5930_v18 }
 0x73f   :  { %7214 = vmatmul.mubr.bf16.gmra.mrb[200].mxu1 %v5931_v15 }
 0x744   :  { %v7171_v53 = vpop.f32.mrb[140].mxu0 }
 0x745   :  { %v5824_v54 = vadd.f32 %v7171_v53, %v9539_v31  ;;  %v5815_v61 = vpop.f32.mrb[141].mxu0 }
 0x746   :  { %v5816_v63 = vadd.f32 %v9539_v31, %v5815_v61  ;;  %v7172_v0 = vpop.f32.mrb[142].mxu0 }
 0x747   :  { %v5827_v1 = vadd.f32 %v7172_v0, %v9539_v31  ;;  %v5818_v3 = vpop.f32.mrb[143].mxu0  ;;  %v5908_v7 = vmax.f32 %v5824_v54, 0.0 }
 0x748   :  { %v5819_v5 = vadd.f32 %v9539_v31, %v5818_v3  ;;  %v5906_v12 = vmax.f32 %v5816_v63, 0.0 }
 0x749   :  { %v5909_v10 = vmax.f32 %v5827_v1, 0.0 }
 0x74a   :  { %v5907_v13 = vmax.f32 %v5819_v5, 0.0  ;;  %v9576_v5 = vld [vmem:[%s9893_s12] ss:$0 sm:$0xff]  ;;  %s8896_s12 = smov [#allocation14]  }
 0x74b   :  { %v5933_v57 = vpack.c.bf16 %v5909_v10, %v5908_v7  ;;  %s6499_s22 = sshll.u32 %s8896_s12, 4  ;;  %s6500_s22 = int_to_ptr.vmem [resolvable:$true] %s6499_s22 }
 0x74c   :  { %v5932_v58 = vpack.c.bf16 %v5907_v13, %v5906_v12  ;;  %s8848_s3 = scalar_lea.vmem %s6500_s22, 4096  ;;  %p8853_p1 = scmp.lt.s32.totalorder %s6500_s22, %s6500_s22 }
 0x74d   :  { %p8849_p0 = scmp.ne.s32.totalorder %s6500_s22, %s8848_s3  ;;  %p8854_p2 = scmp.lt.s32.totalorder %s8848_s3, %s8848_s3 }
 0x74e   :  { %7217 = vmatprep.mubr.bf16.mxu1 %v5932_v58 }
 0x74f   :  { %7218 = vmatmul.mubr.bf16.gmra.mrb[204].mxu1 %v5933_v57  ;;  %p8855_p3 = por %p8854_p2, %p8853_p1 }
 0x751   :  { %p8856_p4 = pnand %p8855_p3, %p8849_p0 }
 0x754   :  { %v7175_v14 = vpop.f32.mrb[144].mxu0 }
 0x755   :  { %v5840_v16 = vadd.f32 %v7175_v14, %v9539_v31  ;;  %v5831_v59 = vpop.f32.mrb[145].mxu0 }
 0x756   :  { %v5832_v60 = vadd.f32 %v9539_v31, %v5831_v59  ;;  %v7176_v21 = vpop.f32.mrb[146].mxu0 }
 0x757   :  { %v5843_v26 = vadd.f32 %v7176_v21, %v9539_v31  ;;  %v5834_v34 = vpop.f32.mrb[147].mxu0  ;;  %v5912_v36 = vmax.f32 %v5840_v16, 0.0 }
 0x758   :  { %v5835_v33 = vadd.f32 %v9539_v31, %v5834_v34  ;;  %v5910_v24 = vmax.f32 %v5832_v60, 0.0 }
 0x759   :  { %v5913_v38 = vmax.f32 %v5843_v26, 0.0 }
 0x75a   :  { %v5911_v39 = vmax.f32 %v5835_v33, 0.0 }
 0x75b   :  { %v5935_v22 = vpack.c.bf16 %v5913_v38, %v5912_v36 }
 0x75c   :  { %v5934_v2 = vpack.c.bf16 %v5911_v39, %v5910_v24 }
 0x75e   :  { %7221 = vmatprep.mubr.bf16.mxu1 %v5934_v2 }
 0x75f   :  { %7222 = vmatmul.mubr.bf16.gmra.mrb[208].mxu1 %v5935_v22 }
 0x764   :  { %v7179_v40 = vpop.f32.mrb[148].mxu0 }
 0x765   :  { %v5856_v41 = vadd.f32 %v7179_v40, %v9539_v31  ;;  %v5847_v62 = vpop.f32.mrb[149].mxu0 }
 0x766   :  { %v5848_v20 = vadd.f32 %v9539_v31, %v5847_v62  ;;  %v7180_v45 = vpop.f32.mrb[150].mxu0 }
 0x767   :  { %v5859_v56 = vadd.f32 %v7180_v45, %v9539_v31  ;;  %v5850_v47 = vpop.f32.mrb[151].mxu0  ;;  %v5916_v48 = vmax.f32 %v5856_v41, 0.0 }
 0x768   :  { %v5851_v32 = vadd.f32 %v9539_v31, %v5850_v47  ;;  %v5914_v50 = vmax.f32 %v5848_v20, 0.0 }
 0x769   :  { %v5917_v30 = vmax.f32 %v5859_v56, 0.0 }
 0x76a   :  { %v5915_v6 = vmax.f32 %v5851_v32, 0.0 }
 0x76b   :  { %v5937_v8 = vpack.c.bf16 %v5917_v30, %v5916_v48 }
 0x76c   :  { %v5936_v42 = vpack.c.bf16 %v5915_v6, %v5914_v50 }
 0x76e   :  { %7225 = vmatprep.mubr.bf16.mxu1 %v5936_v42 }
 0x76f   :  { %7226 = vmatmul.mubr.bf16.gmra.mrb[212].mxu1 %v5937_v8 }
 0x774   :  { %v7183_v44 = vpop.f32.mrb[152].mxu0 }
 0x775   :  { %v5872_v4 = vadd.f32 %v7183_v44, %v9539_v31  ;;  %v5863_v23 = vpop.f32.mrb[153].mxu0 }
 0x776   :  { %v5864_v43 = vadd.f32 %v9539_v31, %v5863_v23  ;;  %v7184_v46 = vpop.f32.mrb[154].mxu0 }
 0x777   :  { %v5875_v27 = vadd.f32 %v7184_v46, %v9539_v31  ;;  %v5866_v29 = vpop.f32.mrb[155].mxu0  ;;  %v5920_v11 = vmax.f32 %v5872_v4, 0.0 }
 0x778   :  { %v5867_v9 = vadd.f32 %v9539_v31, %v5866_v29  ;;  %v5918_v51 = vmax.f32 %v5864_v43, 0.0 }
 0x779   :  { %v5921_v49 = vmax.f32 %v5875_v27, 0.0 }
 0x77a   :  { %v5919_v35 = vmax.f32 %v5867_v9, 0.0 }
 0x77b   :  { %v5939_v52 = vpack.c.bf16 %v5921_v49, %v5920_v11 }
 0x77c   :  { %v5938_v37 = vpack.c.bf16 %v5919_v35, %v5918_v51 }
 0x77e   :  { %7229 = vmatprep.mubr.bf16.mxu1 %v5938_v37 }
 0x77f   :  { %7230 = vmatmul.mubr.bf16.gmra.mrb[216].mxu1 %v5939_v52 }
 0x784   :  { %v7187_v55 = vpop.f32.mrb[156].mxu0 }
 0x785   :  { %v5888_v25 = vadd.f32 %v7187_v55, %v9539_v31  ;;  %v5879_v28 = vpop.f32.mrb[157].mxu0 }
 0x786   :  { %v5880_v17 = vadd.f32 %v9539_v31, %v5879_v28  ;;  %v7188_v19 = vpop.f32.mrb[158].mxu0 }
 0x787   :  { %v5891_v15 = vadd.f32 %v7188_v19, %v9539_v31  ;;  %v5882_v18 = vpop.f32.mrb[159].mxu0  ;;  %v5924_v54 = vmax.f32 %v5888_v25, 0.0 }
 0x788   :  { %v5883_v53 = vadd.f32 %v9539_v31, %v5882_v18  ;;  %v5922_v63 = vmax.f32 %v5880_v17, 0.0 }
 0x789   :  { %v5925_v61 = vmax.f32 %v5891_v15, 0.0 }
 0x78a   :  { %v5923_v0 = vmax.f32 %v5883_v53, 0.0 }
 0x78b   :  { %v5941_v1 = vpack.c.bf16 %v5925_v61, %v5924_v54 }
 0x78c   :  { %v5940_v3 = vpack.c.bf16 %v5923_v0, %v5922_v63 }
 0x78e   :  { %7233 = vmatprep.mubr.bf16.mxu1 %v5940_v3 }
 0x78f   :  { %7234 = vmatmul.mubr.bf16.gmra.mrb[220].mxu1 %v5941_v1 }
 0x7f2   :  { %v7207_v7 = vpop.f32.mrb[192].mxu1 }
 0x7f3   :  { %v9579_v10 = vadd.f32 %v7207_v7, %v9576_v5  ;;  %v6047_v12 = vpop.f32.mrb[193].mxu1 }
 0x7f4   :  { %v9582_v31 = vadd.f32 %v9576_v5, %v6047_v12  ;;  %v7208_v13 = vpop.f32.mrb[194].mxu1 }
 0x7f5   :  { %6178 = vmax.xlane.f32.xlu1 %v9579_v10  ;;  %v6050_v57 = vpop.f32.mrb[195].mxu1  ;;  %v9587_v58 = vadd.f32 %v7208_v13, %v9576_v5 }
 0x7f6   :  { %6174 = vmax.xlane.f32.xlu0 %v9582_v31  ;;  %v9590_v14 = vadd.f32 %v9576_v5, %v6050_v57 }
 0x7f9   :  { %6180 = vmax.xlane.f32.xlu1 %v9587_v58 }
 0x7fa   :  { %6176 = vmax.xlane.f32.xlu0 %v9590_v14 }
 0x802   :  { %v7211_v16 = vpop.f32.mrb[196].mxu1 }
 0x803   :  { %v9595_v59 = vadd.f32 %v7211_v16, %v9576_v5  ;;  %v6063_v60 = vpop.f32.mrb[197].mxu1 }
 0x804   :  { %v7212_v21 = vpop.f32.mrb[198].mxu1  ;;  %v9602_v33 = vadd.f32 %v9576_v5, %v6063_v60 }
 0x805   :  { %v9598_v26 = vadd.f32 %v7212_v21, %v9576_v5  ;;  %v6066_v34 = vpop.f32.mrb[199].mxu1  ;;  %6186 = vmax.xlane.f32.xlu0 %v9595_v59 }
 0x806   :  { %v9606_v36 = vadd.f32 %v9576_v5, %v6066_v34 }
 0x807   :  { %6188 = vmax.xlane.f32.xlu1 %v9598_v26 }
 0x809   :  { %6182 = vmax.xlane.f32.xlu0 %v9602_v33 }
 0x80b   :  { %6184 = vmax.xlane.f32.xlu1 %v9606_v36 }
 0x812   :  { %v7215_v38 = vpop.f32.mrb[200].mxu1 }
 0x813   :  { %v9611_v24 = vadd.f32 %v7215_v38, %v9576_v5  ;;  %v6079_v39 = vpop.f32.mrb[201].mxu1 }
 0x814   :  { %v7216_v22 = vpop.f32.mrb[202].mxu1  ;;  %v9618_v41 = vadd.f32 %v9576_v5, %v6079_v39 }
 0x815   :  { %v9614_v2 = vadd.f32 %v7216_v22, %v9576_v5  ;;  %v6082_v40 = vpop.f32.mrb[203].mxu1  ;;  %6194 = vmax.xlane.f32.xlu0 %v9611_v24 }
 0x816   :  { %v9622_v62 = vadd.f32 %v9576_v5, %v6082_v40 }
 0x817   :  { %6196 = vmax.xlane.f32.xlu1 %v9614_v2 }
 0x819   :  { %6190 = vmax.xlane.f32.xlu0 %v9618_v41 }
 0x81b   :  { %6192 = vmax.xlane.f32.xlu1 %v9622_v62 }
 0x822   :  { %v7219_v20 = vpop.f32.mrb[204].mxu1 }
 0x823   :  { %v9627_v45 = vadd.f32 %v7219_v20, %v9576_v5  ;;  %v6095_v56 = vpop.f32.mrb[205].mxu1 }
 0x824   :  { %v7220_v47 = vpop.f32.mrb[206].mxu1  ;;  %v9634_v30 = vadd.f32 %v9576_v5, %v6095_v56 }
 0x825   :  { %v9630_v32 = vadd.f32 %v7220_v47, %v9576_v5  ;;  %v6098_v48 = vpop.f32.mrb[207].mxu1  ;;  %6202 = vmax.xlane.f32.xlu0 %v9627_v45 }
 0x826   :  { %v9638_v50 = vadd.f32 %v9576_v5, %v6098_v48 }
 0x827   :  { %6204 = vmax.xlane.f32.xlu1 %v9630_v32 }
 0x829   :  { %6198 = vmax.xlane.f32.xlu0 %v9634_v30 }
 0x82b   :  { %6200 = vmax.xlane.f32.xlu1 %v9638_v50 }
 0x832   :  { %v7223_v6 = vpop.f32.mrb[208].mxu1 }
 0x833   :  { %v9643_v8 = vadd.f32 %v7223_v6, %v9576_v5  ;;  %v6111_v42 = vpop.f32.mrb[209].mxu1 }
 0x834   :  { %v7224_v44 = vpop.f32.mrb[210].mxu1  ;;  %v9650_v43 = vadd.f32 %v9576_v5, %v6111_v42 }
 0x835   :  { %v9646_v4 = vadd.f32 %v7224_v44, %v9576_v5  ;;  %v6114_v23 = vpop.f32.mrb[211].mxu1  ;;  %6210 = vmax.xlane.f32.xlu0 %v9643_v8 }
 0x836   :  { %v9654_v46 = vadd.f32 %v9576_v5, %v6114_v23 }
 0x837   :  { %6212 = vmax.xlane.f32.xlu1 %v9646_v4 }
 0x839   :  { %6206 = vmax.xlane.f32.xlu0 %v9650_v43 }
 0x83b   :  { %6208 = vmax.xlane.f32.xlu1 %v9654_v46 }
 0x842   :  { %v7227_v27 = vpop.f32.mrb[212].mxu1 }
 0x843   :  { %v9659_v29 = vadd.f32 %v7227_v27, %v9576_v5  ;;  %v6127_v9 = vpop.f32.mrb[213].mxu1 }
 0x844   :  { %v7228_v11 = vpop.f32.mrb[214].mxu1  ;;  %v9666_v35 = vadd.f32 %v9576_v5, %v6127_v9 }
 0x845   :  { %v9662_v49 = vadd.f32 %v7228_v11, %v9576_v5  ;;  %v6130_v51 = vpop.f32.mrb[215].mxu1  ;;  %6218 = vmax.xlane.f32.xlu0 %v9659_v29 }
 0x846   :  { %v9670_v52 = vadd.f32 %v9576_v5, %v6130_v51 }
 0x847   :  { %6220 = vmax.xlane.f32.xlu1 %v9662_v49 }
 0x849   :  { %6214 = vmax.xlane.f32.xlu0 %v9666_v35 }
 0x84b   :  { %6216 = vmax.xlane.f32.xlu1 %v9670_v52 }
 0x852   :  { %v7231_v37 = vpop.f32.mrb[216].mxu1 }
 0x853   :  { %v9675_v55 = vadd.f32 %v7231_v37, %v9576_v5  ;;  %v6143_v25 = vpop.f32.mrb[217].mxu1 }
 0x854   :  { %v7232_v28 = vpop.f32.mrb[218].mxu1  ;;  %v9682_v15 = vadd.f32 %v9576_v5, %v6143_v25 }
 0x855   :  { %v9678_v17 = vadd.f32 %v7232_v28, %v9576_v5  ;;  %v6146_v19 = vpop.f32.mrb[219].mxu1  ;;  %6226 = vmax.xlane.f32.xlu0 %v9675_v55 }
 0x856   :  { %v9686_v18 = vadd.f32 %v9576_v5, %v6146_v19 }
 0x857   :  { %6228 = vmax.xlane.f32.xlu1 %v9678_v17 }
 0x859   :  { %6222 = vmax.xlane.f32.xlu0 %v9682_v15 }
 0x85b   :  { %6224 = vmax.xlane.f32.xlu1 %v9686_v18 }
 0x862   :  { %v7235_v53 = vpop.f32.mrb[220].mxu1 }
 0x863   :  { %v6159_v54 = vpop.f32.mrb[221].mxu1  ;;  %v9698_v3 = vadd.f32 %v7235_v53, %v9576_v5 }
 0x864   :  { %v9691_v61 = vadd.f32 %v9576_v5, %v6159_v54  ;;  %v7236_v63 = vpop.f32.mrb[222].mxu1 }
 0x865   :  { %v6162_v0 = vpop.f32.mrb[223].mxu1  ;;  %v9702_v7 = vadd.f32 %v7236_v63, %v9576_v5 }
 0x866   :  { %v9694_v1 = vadd.f32 %v9576_v5, %v6162_v0  ;;  %6230 = vmax.xlane.f32.xlu0 %v9691_v61 }
 0x868   :  { %6232 = vmax.xlane.f32.xlu1 %v9694_v1 }
 0x86a   :  { %6234 = vmax.xlane.f32.xlu0 %v9698_v3 }
 0x86c   :  { %6236 = vmax.xlane.f32.xlu1 %v9702_v7 }
 0x882   :  { %v6179_v12 = vpop.xlane.xlu1 %6178 }
 0x883   :  { %v6240_v13 = vsub.f32 %v9579_v10, %v6179_v12  ;;  %v6175_v57 = vpop.xlane.xlu0 %6174 }
 0x884   :  { %v6238_v16 = vsub.f32 %v9582_v31, %v6175_v57 }
 0x885   :  { %v6274_v60 = vmul.f32 1.442695, %v6240_v13 }
 0x886   :  { %v6270_v21 = vmul.f32 1.442695, %v6238_v16  ;;  %v6181_v34 = vpop.xlane.xlu1 %6180 }
 0x887   :  { %8566 = vpow2.f32 %v6274_v60  ;;  %v6241_v38 = vsub.f32 %v9587_v58, %v6181_v34  ;;  %v6177_v39 = vpop.xlane.xlu0 %6176 }
 0x888   :  { %v6239_v5 = vsub.f32 %v9590_v14, %v6177_v39  ;;  %8568 = vpow2.f32 %v6270_v21 }
 0x889   :  { %v6276_v22 = vmul.f32 1.442695, %v6241_v38 }
 0x88a   :  { %v6272_v40 = vmul.f32 1.442695, %v6239_v5 }
 0x88b   :  { %8570 = vpow2.f32 %v6276_v22 }
 0x88c   :  { %8572 = vpow2.f32 %v6272_v40 }
 0x891   :  { %v9710_v20 = vpop.eup %8566 }
 0x892   :  { %6338 = vadd.xlane.f32.xlu0 %v9710_v20  ;;  %v6187_v10 = vpop.xlane.xlu0 %6186  ;;  %v9714_v56 = vpop.eup %8568 }
 0x893   :  { %v6244_v31 = vsub.f32 %v9595_v59, %v6187_v10 }
 0x894   :  { %v6189_v47 = vpop.xlane.xlu1 %6188 }
 0x895   :  { %v9716_v48 = vpop.eup %8570  ;;  %v6282_v58 = vmul.f32 1.442695, %v6244_v31  ;;  %v6245_v14 = vsub.f32 %v9598_v26, %v6189_v47 }
 0x896   :  { %6340 = vadd.xlane.f32.xlu1 %v9716_v48  ;;  %6334 = vadd.xlane.f32.xlu0 %v9714_v56  ;;  %v6183_v6 = vpop.xlane.xlu0 %6182  ;;  %v9722_v27 = vpop.eup %8572 }
 0x897   :  { %8574 = vpow2.f32 %v6282_v58  ;;  %v6284_v42 = vmul.f32 1.442695, %v6245_v14  ;;  %v6242_v44 = vsub.f32 %v9602_v33, %v6183_v6 }
 0x898   :  { %v6185_v23 = vpop.xlane.xlu1 %6184 }
 0x899   :  { %8576 = vpow2.f32 %v6284_v42  ;;  %v6278_v59 = vmul.f32 1.442695, %v6242_v44  ;;  %v6243_v9 = vsub.f32 %v9606_v36, %v6185_v23 }
 0x89a   :  { %6336 = vadd.xlane.f32.xlu1 %v9722_v27 }
 0x89b   :  { %8578 = vpow2.f32 %v6278_v59  ;;  %v6280_v26 = vmul.f32 1.442695, %v6243_v9 }
 0x89d   :  { %8580 = vpow2.f32 %v6280_v26 }
 0x8a1   :  { %v9726_v11 = vpop.eup %8574 }
 0x8a2   :  { %6346 = vadd.xlane.f32.xlu0 %v9726_v11  ;;  %v6195_v51 = vpop.xlane.xlu0 %6194 }
 0x8a3   :  { %v9729_v37 = vpop.eup %8576  ;;  %v6248_v33 = vsub.f32 %v9611_v24, %v6195_v51 }
 0x8a4   :  { %v6197_v25 = vpop.xlane.xlu1 %6196  ;;  %6348 = vadd.xlane.f32.xlu1 %v9729_v37 }
 0x8a5   :  { %v9733_v28 = vpop.eup %8578  ;;  %v6290_v36 = vmul.f32 1.442695, %v6248_v33  ;;  %v6249_v19 = vsub.f32 %v9614_v2, %v6197_v25 }
 0x8a6   :  { %6342 = vadd.xlane.f32.xlu0 %v9733_v28  ;;  %v6191_v53 = vpop.xlane.xlu0 %6190 }
 0x8a7   :  { %v9737_v54 = vpop.eup %8580  ;;  %8582 = vpow2.f32 %v6290_v36  ;;  %v6292_v63 = vmul.f32 1.442695, %v6249_v19  ;;  %v6246_v0 = vsub.f32 %v9618_v41, %v6191_v53 }
 0x8a8   :  { %v6193_v12 = vpop.xlane.xlu1 %6192  ;;  %6344 = vadd.xlane.f32.xlu1 %v9737_v54 }
 0x8a9   :  { %8584 = vpow2.f32 %v6292_v63  ;;  %v6286_v24 = vmul.f32 1.442695, %v6246_v0  ;;  %v6247_v13 = vsub.f32 %v9622_v62, %v6193_v12 }
 0x8ab   :  { %8586 = vpow2.f32 %v6286_v24  ;;  %v6288_v57 = vmul.f32 1.442695, %v6247_v13 }
 0x8ad   :  { %8588 = vpow2.f32 %v6288_v57 }
 0x8b1   :  { %v9742_v2 = vpop.eup %8582 }
 0x8b2   :  { %6354 = vadd.xlane.f32.xlu0 %v9742_v2  ;;  %v6203_v16 = vpop.xlane.xlu0 %6202 }
 0x8b3   :  { %v9745_v60 = vpop.eup %8584  ;;  %v6252_v21 = vsub.f32 %v9627_v45, %v6203_v16 }
 0x8b4   :  { %v6205_v41 = vpop.xlane.xlu1 %6204  ;;  %6356 = vadd.xlane.f32.xlu1 %v9745_v60 }
 0x8b5   :  { %v9749_v34 = vpop.eup %8586  ;;  %v6298_v38 = vmul.f32 1.442695, %v6252_v21  ;;  %v6253_v62 = vsub.f32 %v9630_v32, %v6205_v41 }
 0x8b6   :  { %6350 = vadd.xlane.f32.xlu0 %v9749_v34  ;;  %v6199_v39 = vpop.xlane.xlu0 %6198 }
 0x8b7   :  { %v9753_v5 = vpop.eup %8588  ;;  %8590 = vpow2.f32 %v6298_v38  ;;  %v6300_v22 = vmul.f32 1.442695, %v6253_v62  ;;  %v6250_v40 = vsub.f32 %v9634_v30, %v6199_v39 }
 0x8b8   :  { %v6201_v10 = vpop.xlane.xlu1 %6200  ;;  %6352 = vadd.xlane.f32.xlu1 %v9753_v5 }
 0x8b9   :  { %8592 = vpow2.f32 %v6300_v22  ;;  %v6294_v45 = vmul.f32 1.442695, %v6250_v40  ;;  %v6251_v31 = vsub.f32 %v9638_v50, %v6201_v10 }
 0x8bb   :  { %8594 = vpow2.f32 %v6294_v45  ;;  %v6296_v47 = vmul.f32 1.442695, %v6251_v31 }
 0x8bd   :  { %8596 = vpow2.f32 %v6296_v47 }
 0x8c1   :  { %v9758_v32 = vpop.eup %8590 }
 0x8c2   :  { %6362 = vadd.xlane.f32.xlu0 %v9758_v32  ;;  %v6211_v58 = vpop.xlane.xlu0 %6210 }
 0x8c3   :  { %v9761_v14 = vpop.eup %8592  ;;  %v6256_v6 = vsub.f32 %v9643_v8, %v6211_v58 }
 0x8c4   :  { %v6213_v30 = vpop.xlane.xlu1 %6212  ;;  %6364 = vadd.xlane.f32.xlu1 %v9761_v14 }
 0x8c5   :  { %v9765_v42 = vpop.eup %8594  ;;  %v6306_v44 = vmul.f32 1.442695, %v6256_v6  ;;  %v6257_v50 = vsub.f32 %v9646_v4, %v6213_v30 }
 0x8c6   :  { %6358 = vadd.xlane.f32.xlu0 %v9765_v42  ;;  %v6207_v23 = vpop.xlane.xlu0 %6206 }
 0x8c7   :  { %v9769_v59 = vpop.eup %8596  ;;  %8598 = vpow2.f32 %v6306_v44  ;;  %v6308_v9 = vmul.f32 1.442695, %v6257_v50  ;;  %v6254_v26 = vsub.f32 %v9650_v43, %v6207_v23 }
 0x8c8   :  { %v6209_v51 = vpop.xlane.xlu1 %6208  ;;  %6360 = vadd.xlane.f32.xlu1 %v9769_v59 }
 0x8c9   :  { %8600 = vpow2.f32 %v6308_v9  ;;  %v6302_v8 = vmul.f32 1.442695, %v6254_v26  ;;  %v6255_v33 = vsub.f32 %v9654_v46, %v6209_v51 }
 0x8cb   :  { %8602 = vpow2.f32 %v6302_v8  ;;  %v6304_v25 = vmul.f32 1.442695, %v6255_v33 }
 0x8cd   :  { %8604 = vpow2.f32 %v6304_v25 }
 0x8d1   :  { %v9774_v4 = vpop.eup %8598 }
 0x8d2   :  { %6370 = vadd.xlane.f32.xlu0 %v9774_v4  ;;  %v6219_v36 = vpop.xlane.xlu0 %6218 }
 0x8d3   :  { %v9777_v19 = vpop.eup %8600  ;;  %v6260_v53 = vsub.f32 %v9659_v29, %v6219_v36 }
 0x8d4   :  { %v6221_v43 = vpop.xlane.xlu1 %6220  ;;  %6372 = vadd.xlane.f32.xlu1 %v9777_v19 }
 0x8d5   :  { %v9781_v63 = vpop.eup %8602  ;;  %v6314_v0 = vmul.f32 1.442695, %v6260_v53  ;;  %v6261_v46 = vsub.f32 %v9662_v49, %v6221_v43 }
 0x8d6   :  { %6366 = vadd.xlane.f32.xlu0 %v9781_v63  ;;  %v6215_v12 = vpop.xlane.xlu0 %6214 }
 0x8d7   :  { %v9785_v24 = vpop.eup %8604  ;;  %8606 = vpow2.f32 %v6314_v0  ;;  %v6316_v13 = vmul.f32 1.442695, %v6261_v46  ;;  %v6258_v57 = vsub.f32 %v9666_v35, %v6215_v12 }
 0x8d8   :  { %v6217_v16 = vpop.xlane.xlu1 %6216  ;;  %6368 = vadd.xlane.f32.xlu1 %v9785_v24 }
 0x8d9   :  { %8608 = vpow2.f32 %v6316_v13  ;;  %v6310_v29 = vmul.f32 1.442695, %v6258_v57  ;;  %v6259_v21 = vsub.f32 %v9670_v52, %v6217_v16 }
 0x8db   :  { %8610 = vpow2.f32 %v6310_v29  ;;  %v6312_v41 = vmul.f32 1.442695, %v6259_v21 }
 0x8dd   :  { %8612 = vpow2.f32 %v6312_v41 }
 0x8e1   :  { %v9790_v49 = vpop.eup %8606 }
 0x8e2   :  { %6378 = vadd.xlane.f32.xlu0 %v9790_v49  ;;  %v6227_v38 = vpop.xlane.xlu0 %6226 }
 0x8e3   :  { %v9793_v62 = vpop.eup %8608  ;;  %v6264_v39 = vsub.f32 %v9675_v55, %v6227_v38 }
 0x8e4   :  { %v6229_v35 = vpop.xlane.xlu1 %6228  ;;  %6380 = vadd.xlane.f32.xlu1 %v9793_v62 }
 0x8e5   :  { %v9797_v22 = vpop.eup %8610  ;;  %v6322_v40 = vmul.f32 1.442695, %v6264_v39  ;;  %v6265_v52 = vsub.f32 %v9678_v17, %v6229_v35 }
 0x8e6   :  { %6374 = vadd.xlane.f32.xlu0 %v9797_v22  ;;  %v6223_v10 = vpop.xlane.xlu0 %6222 }
 0x8e7   :  { %v9801_v45 = vpop.eup %8612  ;;  %8614 = vpow2.f32 %v6322_v40  ;;  %v6324_v31 = vmul.f32 1.442695, %v6265_v52  ;;  %v6262_v47 = vsub.f32 %v9682_v15, %v6223_v10 }
 0x8e8   :  { %v6225_v58 = vpop.xlane.xlu1 %6224  ;;  %6376 = vadd.xlane.f32.xlu1 %v9801_v45 }
 0x8e9   :  { %8616 = vpow2.f32 %v6324_v31  ;;  %v6318_v55 = vmul.f32 1.442695, %v6262_v47  ;;  %v6263_v6 = vsub.f32 %v9686_v18, %v6225_v58 }
 0x8eb   :  { %8618 = vpow2.f32 %v6318_v55  ;;  %v6320_v30 = vmul.f32 1.442695, %v6263_v6 }
 0x8ed   :  { %8620 = vpow2.f32 %v6320_v30 }
 0x8f1   :  { %v9806_v17 = vpop.eup %8614 }
 0x8f2   :  { %6386 = vadd.xlane.f32.xlu0 %v9806_v17 }
 0x8f3   :  { %v9809_v44 = vpop.eup %8616  ;;  %v6231_v50 = vpop.xlane.xlu0 %6230 }
 0x8f4   :  { %v6266_v23 = vsub.f32 %v9691_v61, %v6231_v50  ;;  %6388 = vadd.xlane.f32.xlu1 %v9809_v44 }
 0x8f5   :  { %v9813_v15 = vpop.eup %8618  ;;  %v6233_v9 = vpop.xlane.xlu1 %6232 }
 0x8f6   :  { %v6326_v26 = vmul.f32 1.442695, %v6266_v23  ;;  %v6267_v18 = vsub.f32 %v9694_v1, %v6233_v9  ;;  %6382 = vadd.xlane.f32.xlu0 %v9813_v15 }
 0x8f7   :  { %v9817_v51 = vpop.eup %8620  ;;  %v6235_v8 = vpop.xlane.xlu0 %6234 }
 0x8f8   :  { %8622 = vpow2.f32 %v6326_v26  ;;  %v6328_v33 = vmul.f32 1.442695, %v6267_v18  ;;  %v6268_v25 = vsub.f32 %v9698_v3, %v6235_v8  ;;  %6384 = vadd.xlane.f32.xlu1 %v9817_v51 }
 0x8f9   :  { %v6237_v61 = vpop.xlane.xlu1 %6236 }
 0x8fa   :  { %8624 = vpow2.f32 %v6328_v33  ;;  %v6330_v36 = vmul.f32 1.442695, %v6268_v25  ;;  %v6269_v53 = vsub.f32 %v9702_v7, %v6237_v61 }
 0x8fc   :  { %8626 = vpow2.f32 %v6330_v36  ;;  %v6332_v43 = vmul.f32 1.442695, %v6269_v53 }
 0x8fe   :  { %8628 = vpow2.f32 %v6332_v43 }
 0x902   :  { %v9822_v1 = vpop.eup %8622 }
 0x903   :  { %6390 = vadd.xlane.f32.xlu0 %v9822_v1 }
 0x904   :  { %v9825_v0 = vpop.eup %8624 }
 0x905   :  { %6392 = vadd.xlane.f32.xlu1 %v9825_v0 }
 0x906   :  { %v9828_v46 = vpop.eup %8626 }
 0x907   :  { %6394 = vadd.xlane.f32.xlu0 %v9828_v46 }
 0x908   :  { %v9831_v3 = vpop.eup %8628 }
 0x909   :  { %6396 = vadd.xlane.f32.xlu1 %v9831_v3 }
 0x91f   :  { %v6339_v7 = vpop.xlane.xlu0 %6338 }
 0x920   :  { %8630 = vrcp.f32 %v6339_v7 }
 0x923   :  { %v6341_v12 = vpop.xlane.xlu1 %6340  ;;  %v6335_v13 = vpop.xlane.xlu0 %6334 }
 0x924   :  { %8632 = vrcp.f32 %v6341_v12 }
 0x925   :  { %8634 = vrcp.f32 %v6335_v13 }
 0x927   :  { %v6337_v57 = vpop.xlane.xlu1 %6336 }
 0x928   :  { %8636 = vrcp.f32 %v6337_v57 }
 0x92a   :  { %v8631_v16 = vpop.eup %8630 }
 0x92b   :  { %v6432_v29 = vmul.f32 %v8631_v16, %v9710_v20 }
 0x92d   :  { %6464 = vst [vmem:[#allocation14 + $0x10] sm:$0xff] %v6432_v29 }
 0x92e   :  { %v8633_v21 = vpop.eup %8632 }
 0x92f   :  { %v8635_v41 = vpop.eup %8634  ;;  %v6433_v38 = vmul.f32 %v8633_v21, %v9716_v48  ;;  %v6347_v39 = vpop.xlane.xlu0 %6346 }
 0x930   :  { %v6430_v35 = vmul.f32 %v8635_v41, %v9714_v56  ;;  %8638 = vrcp.f32 %v6347_v39 }
 0x931   :  { %6465 = vst [vmem:[#allocation14 + $0x18] sm:$0xff] %v6433_v38  ;;  %v6349_v40 = vpop.xlane.xlu1 %6348 }
 0x932   :  { %v8637_v52 = vpop.eup %8636  ;;  %6462 = vst [vmem:[#allocation14] sm:$0xff] %v6430_v35  ;;  %8640 = vrcp.f32 %v6349_v40 }
 0x933   :  { %v6431_v10 = vmul.f32 %v8637_v52, %v9722_v27  ;;  %v6343_v31 = vpop.xlane.xlu0 %6342 }
 0x934   :  { %8642 = vrcp.f32 %v6343_v31 }
 0x935   :  { %6463 = vst [vmem:[#allocation14 + $0x8] sm:$0xff] %v6431_v10  ;;  %v6345_v20 = vpop.xlane.xlu1 %6344 }
 0x936   :  { %8644 = vrcp.f32 %v6345_v20 }
 0x93a   :  { %v8639_v47 = vpop.eup %8638 }
 0x93b   :  { %v6436_v58 = vmul.f32 %v8639_v47, %v9726_v11 }
 0x93c   :  { %v8641_v48 = vpop.eup %8640 }
 0x93d   :  { %6468 = vst [vmem:[#allocation14 + $0x30] sm:$0xff] %v6436_v58  ;;  %v6437_v56 = vmul.f32 %v8641_v48, %v9729_v37 }
 0x93e   :  { %v8643_v55 = vpop.eup %8642 }
 0x93f   :  { %6469 = vst [vmem:[#allocation14 + $0x38] sm:$0xff] %v6437_v56  ;;  %v6434_v6 = vmul.f32 %v8643_v55, %v9733_v28  ;;  %v6355_v30 = vpop.xlane.xlu0 %6354 }
 0x940   :  { %v8645_v50 = vpop.eup %8644  ;;  %8646 = vrcp.f32 %v6355_v30 }
 0x941   :  { %6466 = vst [vmem:[#allocation14 + $0x20] sm:$0xff] %v6434_v6  ;;  %v6435_v27 = vmul.f32 %v8645_v50, %v9737_v54  ;;  %v6357_v23 = vpop.xlane.xlu1 %6356 }
 0x942   :  { %8648 = vrcp.f32 %v6357_v23 }
 0x943   :  { %6467 = vst [vmem:[#allocation14 + $0x28] sm:$0xff] %v6435_v27  ;;  %v6351_v9 = vpop.xlane.xlu0 %6350 }
 0x944   :  { %8650 = vrcp.f32 %v6351_v9 }
 0x945   :  { %v6353_v11 = vpop.xlane.xlu1 %6352 }
 0x946   :  { %8652 = vrcp.f32 %v6353_v11 }
 0x94a   :  { %v8647_v26 = vpop.eup %8646 }
 0x94b   :  { %v6440_v37 = vmul.f32 %v8647_v26, %v9742_v2 }
 0x94c   :  { %v8649_v18 = vpop.eup %8648 }
 0x94d   :  { %6472 = vst [vmem:[#allocation14 + $0x50] sm:$0xff] %v6440_v37  ;;  %v6441_v28 = vmul.f32 %v8649_v18, %v9745_v60 }
 0x94e   :  { %v8651_v8 = vpop.eup %8650 }
 0x94f   :  { %6473 = vst [vmem:[#allocation14 + $0x58] sm:$0xff] %v6441_v28  ;;  %v6438_v33 = vmul.f32 %v8651_v8, %v9749_v34  ;;  %v6363_v25 = vpop.xlane.xlu0 %6362 }
 0x950   :  { %v8653_v54 = vpop.eup %8652  ;;  %8654 = vrcp.f32 %v6363_v25 }
 0x951   :  { %6470 = vst [vmem:[#allocation14 + $0x40] sm:$0xff] %v6438_v33  ;;  %v6439_v61 = vmul.f32 %v8653_v54, %v9753_v5  ;;  %v6365_v36 = vpop.xlane.xlu1 %6364 }
 0x952   :  { %8656 = vrcp.f32 %v6365_v36 }
 0x953   :  { %6471 = vst [vmem:[#allocation14 + $0x48] sm:$0xff] %v6439_v61  ;;  %v6359_v53 = vpop.xlane.xlu0 %6358 }
 0x954   :  { %8658 = vrcp.f32 %v6359_v53 }
 0x955   :  { %v6361_v2 = vpop.xlane.xlu1 %6360 }
 0x956   :  { %8660 = vrcp.f32 %v6361_v2 }
 0x95a   :  { %v8655_v43 = vpop.eup %8654 }
 0x95b   :  { %v6444_v60 = vmul.f32 %v8655_v43, %v9758_v32 }
 0x95c   :  { %v8657_v7 = vpop.eup %8656 }
 0x95d   :  { %6476 = vst [vmem:[#allocation14 + $0x70] sm:$0xff] %v6444_v60  ;;  %v6445_v34 = vmul.f32 %v8657_v7, %v9761_v14 }
 0x95e   :  { %v8659_v12 = vpop.eup %8658 }
 0x95f   :  { %6477 = vst [vmem:[#allocation14 + $0x78] sm:$0xff] %v6445_v34  ;;  %v6442_v13 = vmul.f32 %v8659_v12, %v9765_v42  ;;  %v6371_v57 = vpop.xlane.xlu0 %6370 }
 0x960   :  { %v8661_v5 = vpop.eup %8660  ;;  %8662 = vrcp.f32 %v6371_v57 }
 0x961   :  { %6474 = vst [vmem:[#allocation14 + $0x60] sm:$0xff] %v6442_v13  ;;  %v6443_v16 = vmul.f32 %v8661_v5, %v9769_v59  ;;  %v6373_v29 = vpop.xlane.xlu1 %6372 }
 0x962   :  { %8664 = vrcp.f32 %v6373_v29 }
 0x963   :  { %6475 = vst [vmem:[#allocation14 + $0x68] sm:$0xff] %v6443_v16  ;;  %v6367_v21 = vpop.xlane.xlu0 %6366 }
 0x964   :  { %8666 = vrcp.f32 %v6367_v21 }
 0x965   :  { %v6369_v32 = vpop.xlane.xlu1 %6368 }
 0x966   :  { %8668 = vrcp.f32 %v6369_v32 }
 0x96a   :  { %v8663_v41 = vpop.eup %8662 }
 0x96b   :  { %v6448_v14 = vmul.f32 %v8663_v41, %v9774_v4 }
 0x96c   :  { %v8665_v38 = vpop.eup %8664 }
 0x96d   :  { %6480 = vst [vmem:[#allocation14 + $0x90] sm:$0xff] %v6448_v14  ;;  %v6449_v42 = vmul.f32 %v8665_v38, %v9777_v19 }
 0x96e   :  { %v8667_v39 = vpop.eup %8666 }
 0x96f   :  { %6481 = vst [vmem:[#allocation14 + $0x98] sm:$0xff] %v6449_v42  ;;  %v6446_v35 = vmul.f32 %v8667_v39, %v9781_v63  ;;  %v6379_v40 = vpop.xlane.xlu0 %6378 }
 0x970   :  { %v8669_v59 = vpop.eup %8668  ;;  %8670 = vrcp.f32 %v6379_v40 }
 0x971   :  { %6478 = vst [vmem:[#allocation14 + $0x80] sm:$0xff] %v6446_v35  ;;  %v6447_v52 = vmul.f32 %v8669_v59, %v9785_v24  ;;  %v6381_v10 = vpop.xlane.xlu1 %6380 }
 0x972   :  { %8672 = vrcp.f32 %v6381_v10 }
 0x973   :  { %6479 = vst [vmem:[#allocation14 + $0x88] sm:$0xff] %v6447_v52  ;;  %v6375_v31 = vpop.xlane.xlu0 %6374 }
 0x974   :  { %8674 = vrcp.f32 %v6375_v31 }
 0x975   :  { %v6377_v4 = vpop.xlane.xlu1 %6376 }
 0x976   :  { %8676 = vrcp.f32 %v6377_v4 }
 0x97a   :  { %v8671_v20 = vpop.eup %8670 }
 0x97b   :  { %v6452_v19 = vmul.f32 %v8671_v20, %v9790_v49 }
 0x97c   :  { %v8673_v47 = vpop.eup %8672 }
 0x97d   :  { %6484 = vst [vmem:[#allocation14 + $0xb0] sm:$0xff] %v6452_v19  ;;  %v6453_v63 = vmul.f32 %v8673_v47, %v9793_v62 }
 0x97e   :  { %v8675_v58 = vpop.eup %8674 }
 0x97f   :  { %6485 = vst [vmem:[#allocation14 + $0xb8] sm:$0xff] %v6453_v63  ;;  %v6450_v48 = vmul.f32 %v8675_v58, %v9797_v22  ;;  %v6387_v56 = vpop.xlane.xlu0 %6386 }
 0x980   :  { %v8677_v24 = vpop.eup %8676  ;;  %8678 = vrcp.f32 %v6387_v56 }
 0x981   :  { %6482 = vst [vmem:[#allocation14 + $0xa0] sm:$0xff] %v6450_v48  ;;  %v6451_v55 = vmul.f32 %v8677_v24, %v9801_v45  ;;  %v6389_v6 = vpop.xlane.xlu1 %6388 }
 0x982   :  { %8680 = vrcp.f32 %v6389_v6 }
 0x983   :  { %6483 = vst [vmem:[#allocation14 + $0xa8] sm:$0xff] %v6451_v55  ;;  %v6383_v30 = vpop.xlane.xlu0 %6382 }
 0x984   :  { %8682 = vrcp.f32 %v6383_v30 }
 0x985   :  { %v6385_v49 = vpop.xlane.xlu1 %6384 }
 0x986   :  { %8684 = vrcp.f32 %v6385_v49 }
 0x98a   :  { %v8679_v50 = vpop.eup %8678 }
 0x98b   :  { %v6456_v62 = vmul.f32 %v8679_v50, %v9806_v17 }
 0x98c   :  { %v8681_v27 = vpop.eup %8680 }
 0x98d   :  { %6488 = vst [vmem:[#allocation14 + $0xd0] sm:$0xff] %v6456_v62  ;;  %v6457_v22 = vmul.f32 %v8681_v27, %v9809_v44 }
 0x98e   :  { %v8683_v23 = vpop.eup %8682 }
 0x98f   :  { %6489 = vst [vmem:[#allocation14 + $0xd8] sm:$0xff] %v6457_v22  ;;  %v6454_v9 = vmul.f32 %v8683_v23, %v9813_v15 }
 0x990   :  { %v8685_v11 = vpop.eup %8684  ;;  %v6391_v45 = vpop.xlane.xlu0 %6390 }
 0x991   :  { %6486 = vst [vmem:[#allocation14 + $0xc0] sm:$0xff] %v6454_v9  ;;  %v6455_v26 = vmul.f32 %v8685_v11, %v9817_v51  ;;  %8686 = vrcp.f32 %v6391_v45 }
 0x992   :  { %v6393_v37 = vpop.xlane.xlu1 %6392 }
 0x993   :  { %6487 = vst [vmem:[#allocation14 + $0xc8] sm:$0xff] %v6455_v26  ;;  %8688 = vrcp.f32 %v6393_v37 }
 0x994   :  { %v6395_v18 = vpop.xlane.xlu0 %6394 }
 0x995   :  { %8690 = vrcp.f32 %v6395_v18 }
 0x996   :  { %v6397_v17 = vpop.xlane.xlu1 %6396 }
 0x997   :  { %8692 = vrcp.f32 %v6397_v17 }
 0x99b   :  { %v8687_v28 = vpop.eup %8686 }
 0x99c   :  { %v6458_v44 = vmul.f32 %v8687_v28, %v9822_v1 }
 0x99d   :  { %v8689_v8 = vpop.eup %8688 }
 0x99e   :  { %6490 = vst [vmem:[#allocation14 + $0xe0] sm:$0xff] %v6458_v44  ;;  %v6459_v15 = vmul.f32 %v8689_v8, %v9825_v0 }
 0x99f   :  { %v8691_v33 = vpop.eup %8690 }
 0x9a0   :  { %6491 = vst [vmem:[#allocation14 + $0xe8] sm:$0xff] %v6459_v15  ;;  %v6460_v51 = vmul.f32 %v8691_v33, %v9828_v46 }
 0x9a1   :  { %v8693_v25 = vpop.eup %8692 }
 0x9a2   :  { %6492 = vst [vmem:[#allocation14 + $0xf0] sm:$0xff] %v6460_v51  ;;  %v6461_v54 = vmul.f32 %v8693_v25, %v9831_v3 }
 0x9a4   :  { %6493 = vst [vmem:[#allocation14 + $0xf8] sm:$0xff] %v6461_v54 }
 0x9a5   :  { %8859 = shalt.err (!%p8856_p4)
}
 0x9a6   :  { %s8860_s25 = scalar_lea.hbm %s9894_s13, 4096 }
 0x9a7   :  { %p8861_p5 = scmp.ne.s32.totalorder %s9894_s13, %s8860_s25  ;;  %p8864_p6 = scmp.lt.u32.totalorder %s8860_s25, %s9894_s13 }
 0x9a9   :  { %p8866_p7 = pnand %p8864_p6, %p8861_p5 }
 0x9ab   :  { %8869 = shalt.err (!%p8866_p7)
}
 0x9ac   :  { %6505 = dma.vmem_to_hbm [thread:$0]  %s6500_s22, 4096, %s9894_s13, [#allocation4], %s8884_s1, %s8884_s1, %s8885_s26  }
 0x9ad   :  { %8878 = dma.done.wait [#allocation4], 4096  }
 0x9ae   :  { %8879 = vsyncadd [#allocation4], 4294963200 }
 0x9af   :  { %6509 = vsyncpa [#allocation3], 1 }
 0x9b0   :  { %6510 = vsyncpa [#allocation6], 1 }
 0x9b1   :  { %6511 = vsyncpa [#allocation9], 1 }
 0x9b2   :  { %6512 = vsyncpa [#allocation12], 1 }
 0x9b3   :  { %6513 = vsyncpa [#allocation4], 1 }

</bundles_post_ra>
